<compile_context>
chip_gen: v5e
topology: v5e:2x2
jax: 0.10.0
libtpu: 0.0.40
codegen_flags: <defaults>
</compile_context>

<pallas_src>
import functools

import jax
import jax.numpy as jnp
from jax.experimental import pallas as pl
from jax.experimental.pallas import tpu as pltpu


# (name, Cout, Cin, kernel, stride, pad) -- static architecture description.
ARCH = (
    ("conv_1",        16,   3, 3, 2, 1),
    ("layer_1",       16,  16, 1, 1, 0),
    ("layer_2",       32,  16, 3, 2, 1),
    ("layer_3",       64,  32, 3, 2, 1),
    ("layer_4",       96,  64, 3, 2, 1),
    ("layer_5",      128,  96, 3, 2, 1),
    ("conv_1x1_exp", 256, 128, 1, 1, 0),
)
N_CLASSES = 10


# -----------------------------------------------------------------------------
# Pallas kernels
# -----------------------------------------------------------------------------
def _matmul_bias_act_kernel(x_ref, w_ref, b_ref, o_ref, *, apply_relu):
    """One (TM, K) x (K, N) GEMM tile: bf16 MXU operands, f32 accumulate/epilogue."""
    acc = jnp.dot(x_ref[...], w_ref[...], preferred_element_type=jnp.float32)
    acc = acc + b_ref[...]                      # bias in f32
    if apply_relu:
        acc = jnp.maximum(acc, 0.0)
    o_ref[...] = acc.astype(o_ref.dtype)


def _head_kernel(x_ref, p_ref, w_ref, b_ref, o_ref):
    """Fused global-average-pool + linear classifier.

    x: (N*HW, C) features, p: (N, N*HW) pooling matrix (1/HW block-diagonal),
    w: (C, n_classes), b: (1, n_classes).  Pooling is expressed as a matmul so
    the whole head is two small 2-D GEMMs in one kernel launch.
    """
    feats = x_ref[...].astype(jnp.float32)
    pooled = jnp.dot(p_ref[...], feats, preferred_element_type=jnp.float32)
    logits = jnp.dot(pooled, w_ref[...], preferred_element_type=jnp.float32)
    o_ref[...] = (logits + b_ref[...]).astype(o_ref.dtype)


# -----------------------------------------------------------------------------
# Wrappers
# -----------------------------------------------------------------------------
def _round_up(x, m):
    return ((x + m - 1) // m) * m


def _choose_tm(M):
    """Row-tile size: big tiles (fewer grid steps), but >=2 steps when M is big
    enough so both v7x TensorCores get work."""
    Mr = _round_up(M, 8)
    if Mr <= 256:
        return Mr                                   # single full-extent tile
    return min(512, _round_up((Mr + 1) // 2, 64))   # >=2 grid steps, cap at 512


def matmul_bias_act(x, w, b, apply_relu, out_dtype):
    """y = relu?(x @ w + b): bf16 operands, f32 accumulate, tiled only over M."""
    M, K = x.shape
    _, N = w.shape
    TM = _choose_tm(M)
    Mp = _round_up(M, TM)

    xp = x.astype(jnp.bfloat16)
    if Mp != M:
        xp = jnp.pad(xp, ((0, Mp - M), (0, 0)))
    wp = w.astype(jnp.bfloat16)
    b2 = b.reshape(1, N).astype(jnp.float32)

    out = pl.pallas_call(
        functools.partial(_matmul_bias_act_kernel, apply_relu=apply_relu),
        out_shape=jax.ShapeDtypeStruct((Mp, N), out_dtype),
        grid=(Mp // TM,),
        in_specs=[
            pl.BlockSpec((TM, K), lambda i: (i, 0)),    # full-K block (no 128 pad)
            pl.BlockSpec((K, N), lambda i: (0, 0)),     # weights resident over M
            pl.BlockSpec((1, N), lambda i: (0, 0)),
        ],
        out_specs=pl.BlockSpec((TM, N), lambda i: (i, 0)),
        compiler_params=pltpu.CompilerParams(
            dimension_semantics=("parallel",)),
    )(xp, wp, b2)
    return out if Mp == M else out[:M]


def _im2col(x_nhwc, kh, kw, stride, pad):
    """Pure data-movement patch extraction (XLA glue, no compute)."""
    N, H, W, C = x_nhwc.shape
    if kh == 1 and kw == 1 and stride == 1 and pad == 0:
        return x_nhwc.reshape(N * H * W, C), H, W       # 1x1 conv: no blow-up
    xpad = jnp.pad(x_nhwc, ((0, 0), (pad, pad), (pad, pad), (0, 0)))
    Ho = (H + 2 * pad - kh) // stride + 1
    Wo = (W + 2 * pad - kw) // stride + 1
    cols = []
    for i in range(kh):
        for j in range(kw):
            cols.append(
                xpad[:, i:i + stride * Ho:stride, j:j + stride * Wo:stride, :])
    patches = jnp.concatenate(cols, axis=-1)            # (N, Ho, Wo, kh*kw*C)
    return patches.reshape(N * Ho * Wo, kh * kw * C), Ho, Wo


def conv2d_relu(x_nhwc, w_oihw, b, *, stride, pad, apply_relu=True,
                out_dtype=jnp.bfloat16):
    """Conv2d (PyTorch OIHW weights) as im2col + Pallas GEMM, NHWC activations."""
    Cout, Cin, kh, kw = w_oihw.shape
    patches, Ho, Wo = _im2col(x_nhwc, kh, kw, stride, pad)
    # (kh, kw, Cin) flatten order matches _im2col's tap/channel ordering.
    w2 = jnp.transpose(w_oihw, (2, 3, 1, 0)).reshape(kh * kw * Cin, Cout)
    out = matmul_bias_act(patches, w2, b, apply_relu, out_dtype=out_dtype)
    return out.reshape(x_nhwc.shape[0], Ho, Wo, Cout)


def gap_classifier(x_nhwc, w, b):
    """Fused global-average-pool + linear classifier in one pallas_call."""
    N, H, W, C = x_nhwc.shape
    HW = H * W
    n_cls = w.shape[1]
    x2 = x_nhwc.reshape(N * HW, C)
    # (N, N*HW) block-diagonal 1/HW matrix: pooled = pool @ x2.
    pool = jnp.repeat(jnp.eye(N, dtype=jnp.float32), HW, axis=1) * (1.0 / HW)
    b2 = b.reshape(1, n_cls).astype(jnp.float32)
    return pl.pallas_call(
        _head_kernel,
        out_shape=jax.ShapeDtypeStruct((N, n_cls), jnp.float32),
        grid=(1,),
        in_specs=[
            pl.BlockSpec((N * HW, C), lambda i: (0, 0)),
            pl.BlockSpec((N, N * HW), lambda i: (0, 0)),
            pl.BlockSpec((C, n_cls), lambda i: (0, 0)),
            pl.BlockSpec((1, n_cls), lambda i: (0, 0)),
        ],
        out_specs=pl.BlockSpec((N, n_cls), lambda i: (0, 0)),
    )(x2, pool, w.astype(jnp.float32), b2)


# -----------------------------------------------------------------------------
# BaseEncoder parameters & forward
# -----------------------------------------------------------------------------
def init_params(key):
    """Deterministic synthetic parameters (arrays only; structure is in ARCH)."""
    params = {}
    keys = jax.random.split(key, len(ARCH) + 1)
    for k_i, (name, cout, cin, k, _stride, _pad) in zip(keys[:-1], ARCH):
        kw_, kb_ = jax.random.split(k_i)
        params[name] = dict(
            w=0.1 * jax.random.normal(kw_, (cout, cin, k, k), jnp.float32),
            b=0.01 * jax.random.normal(kb_, (cout,), jnp.float32),
        )
    kw_, kb_ = jax.random.split(keys[-1])
    params["classifier"] = dict(
        w=0.1 * jax.random.normal(kw_, (ARCH[-1][1], N_CLASSES), jnp.float32),
        b=0.01 * jax.random.normal(kb_, (N_CLASSES,), jnp.float32),
    )
    return params


def base_encoder_forward(params, x_nchw):
    """Mirrors BaseEncoder.forward (eval / no augmentor): returns logits."""
    # NCHW -> NHWC (channels on the TPU lane axis); bf16 activations between layers.
    x = jnp.transpose(x_nchw, (0, 2, 3, 1)).astype(jnp.bfloat16)
    for (name, _cout, _cin, _k, stride, pad) in ARCH:
        p = params[name]
        x = conv2d_relu(x, p["w"], p["b"], stride=stride, pad=pad,
                        apply_relu=True, out_dtype=jnp.bfloat16)
    # classifier: fused global average pool + linear (no activation), f32 logits.
    logits = gap_classifier(x, params["classifier"]["w"],
                            params["classifier"]["b"])
    # TODO(synk): neural_augmentor / training-mode dict output not modeled
    #             (build_neural_augmentor returns None in the default config).
    return logits


if __name__ == "__main__":
    key = jax.random.PRNGKey(0)
    k_param, k_input = jax.random.split(key)
    params = init_params(k_param)
    x = jax.random.normal(k_input, (2, 3, 64, 64), jnp.float32)  # NCHW like PyTorch

    logits = jax.jit(base_encoder_forward)(params, x)
    jax.block_until_ready(logits)
    assert logits.shape == (2, N_CLASSES)
    assert bool(jnp.all(jnp.isfinite(logits)))
    print("KERNEL_OK")
</pallas_src>

<mosaic_0001>
module attributes {stable_mosaic.version = 11 : i64} {
  func.func @_matmul_bias_act_kernel(%arg0: i32, %arg1: memref<512x27xbf16, #tpu.memory_space<vmem>>, %arg2: memref<27x16xbf16, #tpu.memory_space<vmem>>, %arg3: memref<1x16xf32, #tpu.memory_space<vmem>>, %arg4: memref<512x16xbf16, #tpu.memory_space<vmem>>) attributes {dimension_semantics = [#tpu.dimension_semantics<parallel>], iteration_bounds = array<i64: 4>, scalar_prefetch = 0 : i64, scratch_operands = 0 : i64, tpu.core_type = #tpu.core_type<tc>, window_params = [{transform_indices = @transform_0, window_bounds = array<i64: 512, 27>}, {pipeline_mode = #tpu.pipeline_mode<synchronous>, transform_indices = @transform_1, window_bounds = array<i64: 27, 16>}, {pipeline_mode = #tpu.pipeline_mode<synchronous>, transform_indices = @transform_2, window_bounds = array<i64: 1, 16>}, {transform_indices = @transform_3, window_bounds = array<i64: 512, 16>}]} {
    %c0 = arith.constant 0 : index
    %c0_0 = arith.constant 0 : index
    %0 = vector.load %arg1[%c0, %c0_0] : memref<512x27xbf16, #tpu.memory_space<vmem>>, vector<512x27xbf16>
    %c0_1 = arith.constant 0 : index
    %c0_2 = arith.constant 0 : index
    %1 = vector.load %arg2[%c0_1, %c0_2] : memref<27x16xbf16, #tpu.memory_space<vmem>>, vector<27x16xbf16>
    %cst = arith.constant dense<0.000000e+00> : vector<512x16xf32>
    %2 = tpu.matmul %0, %1, %cst {dimension_numbers = #tpu.dot_dimension_numbers<[1], [0], [0], [1], [0, 0, 1, 1], [], []>} : vector<512x27xbf16>, vector<27x16xbf16>, vector<512x16xf32> -> vector<512x16xf32>
    %c0_3 = arith.constant 0 : index
    %c0_4 = arith.constant 0 : index
    %3 = vector.load %arg3[%c0_3, %c0_4] : memref<1x16xf32, #tpu.memory_space<vmem>>, vector<1x16xf32>
    %4 = vector.broadcast %3 : vector<1x16xf32> to vector<512x16xf32>
    %5 = arith.addf %2, %4 : vector<512x16xf32>
    %cst_5 = arith.constant 0.000000e+00 : f32
    %6 = vector.broadcast %cst_5 : f32 to vector<512x16xf32>
    %7 = arith.maximumf %5, %6 : vector<512x16xf32>
    %8 = arith.truncf %7 : vector<512x16xf32> to vector<512x16xbf16>
    %c0_6 = arith.constant 0 : index
    %c0_7 = arith.constant 0 : index
    %9 = vector.load %arg4[%c0_6, %c0_7] : memref<512x16xbf16, #tpu.memory_space<vmem>>, vector<512x16xbf16>
    tpu.vector_store %arg4[%c0_6, %c0_7], %8 {strides = array<i32>} : memref<512x16xbf16, #tpu.memory_space<vmem>>, vector<512x16xbf16>,
    return
  }
  func.func @transform_0(%arg0: i32) -> (i32, i32) {
    %c0_i32 = arith.constant 0 : i32
    %c0_i32_0 = arith.constant 0 : i32
    return %arg0, %c0_i32 : i32, i32
  }
  func.func @transform_1(%arg0: i32) -> (i32, i32) {
    %c0_i32 = arith.constant 0 : i32
    %c0_i32_0 = arith.constant 0 : i32
    %c0_i32_1 = arith.constant 0 : i32
    return %c0_i32, %c0_i32_0 : i32, i32
  }
  func.func @transform_2(%arg0: i32) -> (i32, i32) {
    %c0_i32 = arith.constant 0 : i32
    %c0_i32_0 = arith.constant 0 : i32
    %c0_i32_1 = arith.constant 0 : i32
    return %c0_i32, %c0_i32_0 : i32, i32
  }
  func.func @transform_3(%arg0: i32) -> (i32, i32) {
    %c0_i32 = arith.constant 0 : i32
    %c0_i32_0 = arith.constant 0 : i32
    return %arg0, %c0_i32 : i32, i32
  }
}

module attributes {stable_mosaic.version = 11 : i64} {
  func.func @_matmul_bias_act_kernel(%arg0: i32, %arg1: memref<512x16xbf16, #tpu.memory_space<vmem>>, %arg2: memref<16x16xbf16, #tpu.memory_space<vmem>>, %arg3: memref<1x16xf32, #tpu.memory_space<vmem>>, %arg4: memref<512x16xbf16, #tpu.memory_space<vmem>>) attributes {dimension_semantics = [#tpu.dimension_semantics<parallel>], iteration_bounds = array<i64: 4>, scalar_prefetch = 0 : i64, scratch_operands = 0 : i64, tpu.core_type = #tpu.core_type<tc>, window_params = [{transform_indices = @transform_0, window_bounds = array<i64: 512, 16>}, {pipeline_mode = #tpu.pipeline_mode<synchronous>, transform_indices = @transform_1, window_bounds = array<i64: 16, 16>}, {pipeline_mode = #tpu.pipeline_mode<synchronous>, transform_indices = @transform_2, window_bounds = array<i64: 1, 16>}, {transform_indices = @transform_3, window_bounds = array<i64: 512, 16>}]} {
    %c0 = arith.constant 0 : index
    %c0_0 = arith.constant 0 : index
    %0 = vector.load %arg1[%c0, %c0_0] : memref<512x16xbf16, #tpu.memory_space<vmem>>, vector<512x16xbf16>
    %c0_1 = arith.constant 0 : index
    %c0_2 = arith.constant 0 : index
    %1 = vector.load %arg2[%c0_1, %c0_2] : memref<16x16xbf16, #tpu.memory_space<vmem>>, vector<16x16xbf16>
    %cst = arith.constant dense<0.000000e+00> : vector<512x16xf32>
    %2 = tpu.matmul %0, %1, %cst {dimension_numbers = #tpu.dot_dimension_numbers<[1], [0], [0], [1], [0, 0, 1, 1], [], []>} : vector<512x16xbf16>, vector<16x16xbf16>, vector<512x16xf32> -> vector<512x16xf32>
    %c0_3 = arith.constant 0 : index
    %c0_4 = arith.constant 0 : index
    %3 = vector.load %arg3[%c0_3, %c0_4] : memref<1x16xf32, #tpu.memory_space<vmem>>, vector<1x16xf32>
    %4 = vector.broadcast %3 : vector<1x16xf32> to vector<512x16xf32>
    %5 = arith.addf %2, %4 : vector<512x16xf32>
    %cst_5 = arith.constant 0.000000e+00 : f32
    %6 = vector.broadcast %cst_5 : f32 to vector<512x16xf32>
    %7 = arith.maximumf %5, %6 : vector<512x16xf32>
    %8 = arith.truncf %7 : vector<512x16xf32> to vector<512x16xbf16>
    %c0_6 = arith.constant 0 : index
    %c0_7 = arith.constant 0 : index
    %9 = vector.load %arg4[%c0_6, %c0_7] : memref<512x16xbf16, #tpu.memory_space<vmem>>, vector<512x16xbf16>
    tpu.vector_store %arg4[%c0_6, %c0_7], %8 {strides = array<i32>} : memref<512x16xbf16, #tpu.memory_space<vmem>>, vector<512x16xbf16>,
    return
  }
  func.func @transform_0(%arg0: i32) -> (i32, i32) {
    %c0_i32 = arith.constant 0 : i32
    %c0_i32_0 = arith.constant 0 : i32
    return %arg0, %c0_i32 : i32, i32
  }
  func.func @transform_1(%arg0: i32) -> (i32, i32) {
    %c0_i32 = arith.constant 0 : i32
    %c0_i32_0 = arith.constant 0 : i32
    %c0_i32_1 = arith.constant 0 : i32
    return %c0_i32, %c0_i32_0 : i32, i32
  }
  func.func @transform_2(%arg0: i32) -> (i32, i32) {
    %c0_i32 = arith.constant 0 : i32
    %c0_i32_0 = arith.constant 0 : i32
    %c0_i32_1 = arith.constant 0 : i32
    return %c0_i32, %c0_i32_0 : i32, i32
  }
  func.func @transform_3(%arg0: i32) -> (i32, i32) {
    %c0_i32 = arith.constant 0 : i32
    %c0_i32_0 = arith.constant 0 : i32
    return %arg0, %c0_i32 : i32, i32
  }
}

module attributes {stable_mosaic.version = 11 : i64} {
  func.func @_matmul_bias_act_kernel(%arg0: i32, %arg1: memref<256x144xbf16, #tpu.memory_space<vmem>>, %arg2: memref<144x32xbf16, #tpu.memory_space<vmem>>, %arg3: memref<1x32xf32, #tpu.memory_space<vmem>>, %arg4: memref<256x32xbf16, #tpu.memory_space<vmem>>) attributes {dimension_semantics = [#tpu.dimension_semantics<parallel>], iteration_bounds = array<i64: 2>, scalar_prefetch = 0 : i64, scratch_operands = 0 : i64, tpu.core_type = #tpu.core_type<tc>, window_params = [{transform_indices = @transform_0, window_bounds = array<i64: 256, 144>}, {pipeline_mode = #tpu.pipeline_mode<synchronous>, transform_indices = @transform_1, window_bounds = array<i64: 144, 32>}, {pipeline_mode = #tpu.pipeline_mode<synchronous>, transform_indices = @transform_2, window_bounds = array<i64: 1, 32>}, {transform_indices = @transform_3, window_bounds = array<i64: 256, 32>}]} {
    %c0 = arith.constant 0 : index
    %c0_0 = arith.constant 0 : index
    %0 = vector.load %arg1[%c0, %c0_0] : memref<256x144xbf16, #tpu.memory_space<vmem>>, vector<256x144xbf16>
    %c0_1 = arith.constant 0 : index
    %c0_2 = arith.constant 0 : index
    %1 = vector.load %arg2[%c0_1, %c0_2] : memref<144x32xbf16, #tpu.memory_space<vmem>>, vector<144x32xbf16>
    %cst = arith.constant dense<0.000000e+00> : vector<256x32xf32>
    %2 = tpu.matmul %0, %1, %cst {dimension_numbers = #tpu.dot_dimension_numbers<[1], [0], [0], [1], [0, 0, 1, 1], [], []>} : vector<256x144xbf16>, vector<144x32xbf16>, vector<256x32xf32> -> vector<256x32xf32>
    %c0_3 = arith.constant 0 : index
    %c0_4 = arith.constant 0 : index
    %3 = vector.load %arg3[%c0_3, %c0_4] : memref<1x32xf32, #tpu.memory_space<vmem>>, vector<1x32xf32>
    %4 = vector.broadcast %3 : vector<1x32xf32> to vector<256x32xf32>
    %5 = arith.addf %2, %4 : vector<256x32xf32>
    %cst_5 = arith.constant 0.000000e+00 : f32
    %6 = vector.broadcast %cst_5 : f32 to vector<256x32xf32>
    %7 = arith.maximumf %5, %6 : vector<256x32xf32>
    %8 = arith.truncf %7 : vector<256x32xf32> to vector<256x32xbf16>
    %c0_6 = arith.constant 0 : index
    %c0_7 = arith.constant 0 : index
    %9 = vector.load %arg4[%c0_6, %c0_7] : memref<256x32xbf16, #tpu.memory_space<vmem>>, vector<256x32xbf16>
    tpu.vector_store %arg4[%c0_6, %c0_7], %8 {strides = array<i32>} : memref<256x32xbf16, #tpu.memory_space<vmem>>, vector<256x32xbf16>,
    return
  }
  func.func @transform_0(%arg0: i32) -> (i32, i32) {
    %c0_i32 = arith.constant 0 : i32
    %c0_i32_0 = arith.constant 0 : i32
    return %arg0, %c0_i32 : i32, i32
  }
  func.func @transform_1(%arg0: i32) -> (i32, i32) {
    %c0_i32 = arith.constant 0 : i32
    %c0_i32_0 = arith.constant 0 : i32
    %c0_i32_1 = arith.constant 0 : i32
    return %c0_i32, %c0_i32_0 : i32, i32
  }
  func.func @transform_2(%arg0: i32) -> (i32, i32) {
    %c0_i32 = arith.constant 0 : i32
    %c0_i32_0 = arith.constant 0 : i32
    %c0_i32_1 = arith.constant 0 : i32
    return %c0_i32, %c0_i32_0 : i32, i32
  }
  func.func @transform_3(%arg0: i32) -> (i32, i32) {
    %c0_i32 = arith.constant 0 : i32
    %c0_i32_0 = arith.constant 0 : i32
    return %arg0, %c0_i32 : i32, i32
  }
}

module attributes {stable_mosaic.version = 11 : i64} {
  func.func @_matmul_bias_act_kernel(%arg0: i32, %arg1: memref<128x288xbf16, #tpu.memory_space<vmem>>, %arg2: memref<288x64xbf16, #tpu.memory_space<vmem>>, %arg3: memref<1x64xf32, #tpu.memory_space<vmem>>, %arg4: memref<128x64xbf16, #tpu.memory_space<vmem>>) attributes {dimension_semantics = [#tpu.dimension_semantics<parallel>], iteration_bounds = array<i64: 1>, scalar_prefetch = 0 : i64, scratch_operands = 0 : i64, tpu.core_type = #tpu.core_type<tc>, window_params = [{transform_indices = @transform_0, window_bounds = array<i64: 128, 288>}, {pipeline_mode = #tpu.pipeline_mode<synchronous>, transform_indices = @transform_1, window_bounds = array<i64: 288, 64>}, {pipeline_mode = #tpu.pipeline_mode<synchronous>, transform_indices = @transform_2, window_bounds = array<i64: 1, 64>}, {transform_indices = @transform_3, window_bounds = array<i64: 128, 64>}]} {
    %c0 = arith.constant 0 : index
    %c0_0 = arith.constant 0 : index
    %0 = vector.load %arg1[%c0, %c0_0] : memref<128x288xbf16, #tpu.memory_space<vmem>>, vector<128x288xbf16>
    %c0_1 = arith.constant 0 : index
    %c0_2 = arith.constant 0 : index
    %1 = vector.load %arg2[%c0_1, %c0_2] : memref<288x64xbf16, #tpu.memory_space<vmem>>, vector<288x64xbf16>
    %cst = arith.constant dense<0.000000e+00> : vector<128x64xf32>
    %2 = tpu.matmul %0, %1, %cst {dimension_numbers = #tpu.dot_dimension_numbers<[1], [0], [0], [1], [0, 0, 1, 1], [], []>} : vector<128x288xbf16>, vector<288x64xbf16>, vector<128x64xf32> -> vector<128x64xf32>
    %c0_3 = arith.constant 0 : index
    %c0_4 = arith.constant 0 : index
    %3 = vector.load %arg3[%c0_3, %c0_4] : memref<1x64xf32, #tpu.memory_space<vmem>>, vector<1x64xf32>
    %4 = vector.broadcast %3 : vector<1x64xf32> to vector<128x64xf32>
    %5 = arith.addf %2, %4 : vector<128x64xf32>
    %cst_5 = arith.constant 0.000000e+00 : f32
    %6 = vector.broadcast %cst_5 : f32 to vector<128x64xf32>
    %7 = arith.maximumf %5, %6 : vector<128x64xf32>
    %8 = arith.truncf %7 : vector<128x64xf32> to vector<128x64xbf16>
    %c0_6 = arith.constant 0 : index
    %c0_7 = arith.constant 0 : index
    %9 = vector.load %arg4[%c0_6, %c0_7] : memref<128x64xbf16, #tpu.memory_space<vmem>>, vector<128x64xbf16>
    tpu.vector_store %arg4[%c0_6, %c0_7], %8 {strides = array<i32>} : memref<128x64xbf16, #tpu.memory_space<vmem>>, vector<128x64xbf16>,
    return
  }
  func.func @transform_0(%arg0: i32) -> (i32, i32) {
    %c0_i32 = arith.constant 0 : i32
    %c0_i32_0 = arith.constant 0 : i32
    return %arg0, %c0_i32 : i32, i32
  }
  func.func @transform_1(%arg0: i32) -> (i32, i32) {
    %c0_i32 = arith.constant 0 : i32
    %c0_i32_0 = arith.constant 0 : i32
    %c0_i32_1 = arith.constant 0 : i32
    return %c0_i32, %c0_i32_0 : i32, i32
  }
  func.func @transform_2(%arg0: i32) -> (i32, i32) {
    %c0_i32 = arith.constant 0 : i32
    %c0_i32_0 = arith.constant 0 : i32
    %c0_i32_1 = arith.constant 0 : i32
    return %c0_i32, %c0_i32_0 : i32, i32
  }
  func.func @transform_3(%arg0: i32) -> (i32, i32) {
    %c0_i32 = arith.constant 0 : i32
    %c0_i32_0 = arith.constant 0 : i32
    return %arg0, %c0_i32 : i32, i32
  }
}

module attributes {stable_mosaic.version = 11 : i64} {
  func.func @_matmul_bias_act_kernel(%arg0: i32, %arg1: memref<32x576xbf16, #tpu.memory_space<vmem>>, %arg2: memref<576x96xbf16, #tpu.memory_space<vmem>>, %arg3: memref<1x96xf32, #tpu.memory_space<vmem>>, %arg4: memref<32x96xbf16, #tpu.memory_space<vmem>>) attributes {dimension_semantics = [#tpu.dimension_semantics<parallel>], iteration_bounds = array<i64: 1>, scalar_prefetch = 0 : i64, scratch_operands = 0 : i64, tpu.core_type = #tpu.core_type<tc>, window_params = [{transform_indices = @transform_0, window_bounds = array<i64: 32, 576>}, {pipeline_mode = #tpu.pipeline_mode<synchronous>, transform_indices = @transform_1, window_bounds = array<i64: 576, 96>}, {pipeline_mode = #tpu.pipeline_mode<synchronous>, transform_indices = @transform_2, window_bounds = array<i64: 1, 96>}, {transform_indices = @transform_3, window_bounds = array<i64: 32, 96>}]} {
    %c0 = arith.constant 0 : index
    %c0_0 = arith.constant 0 : index
    %0 = vector.load %arg1[%c0, %c0_0] : memref<32x576xbf16, #tpu.memory_space<vmem>>, vector<32x576xbf16>
    %c0_1 = arith.constant 0 : index
    %c0_2 = arith.constant 0 : index
    %1 = vector.load %arg2[%c0_1, %c0_2] : memref<576x96xbf16, #tpu.memory_space<vmem>>, vector<576x96xbf16>
    %cst = arith.constant dense<0.000000e+00> : vector<32x96xf32>
    %2 = tpu.matmul %0, %1, %cst {dimension_numbers = #tpu.dot_dimension_numbers<[1], [0], [0], [1], [0, 0, 1, 1], [], []>} : vector<32x576xbf16>, vector<576x96xbf16>, vector<32x96xf32> -> vector<32x96xf32>
    %c0_3 = arith.constant 0 : index
    %c0_4 = arith.constant 0 : index
    %3 = vector.load %arg3[%c0_3, %c0_4] : memref<1x96xf32, #tpu.memory_space<vmem>>, vector<1x96xf32>
    %4 = vector.broadcast %3 : vector<1x96xf32> to vector<32x96xf32>
    %5 = arith.addf %2, %4 : vector<32x96xf32>
    %cst_5 = arith.constant 0.000000e+00 : f32
    %6 = vector.broadcast %cst_5 : f32 to vector<32x96xf32>
    %7 = arith.maximumf %5, %6 : vector<32x96xf32>
    %8 = arith.truncf %7 : vector<32x96xf32> to vector<32x96xbf16>
    %c0_6 = arith.constant 0 : index
    %c0_7 = arith.constant 0 : index
    %9 = vector.load %arg4[%c0_6, %c0_7] : memref<32x96xbf16, #tpu.memory_space<vmem>>, vector<32x96xbf16>
    tpu.vector_store %arg4[%c0_6, %c0_7], %8 {strides = array<i32>} : memref<32x96xbf16, #tpu.memory_space<vmem>>, vector<32x96xbf16>,
    return
  }
  func.func @transform_0(%arg0: i32) -> (i32, i32) {
    %c0_i32 = arith.constant 0 : i32
    %c0_i32_0 = arith.constant 0 : i32
    return %arg0, %c0_i32 : i32, i32
  }
  func.func @transform_1(%arg0: i32) -> (i32, i32) {
    %c0_i32 = arith.constant 0 : i32
    %c0_i32_0 = arith.constant 0 : i32
    %c0_i32_1 = arith.constant 0 : i32
    return %c0_i32, %c0_i32_0 : i32, i32
  }
  func.func @transform_2(%arg0: i32) -> (i32, i32) {
    %c0_i32 = arith.constant 0 : i32
    %c0_i32_0 = arith.constant 0 : i32
    %c0_i32_1 = arith.constant 0 : i32
    return %c0_i32, %c0_i32_0 : i32, i32
  }
  func.func @transform_3(%arg0: i32) -> (i32, i32) {
    %c0_i32 = arith.constant 0 : i32
    %c0_i32_0 = arith.constant 0 : i32
    return %arg0, %c0_i32 : i32, i32
  }
}

module attributes {stable_mosaic.version = 11 : i64} {
  func.func @_matmul_bias_act_kernel(%arg0: i32, %arg1: memref<8x864xbf16, #tpu.memory_space<vmem>>, %arg2: memref<864x128xbf16, #tpu.memory_space<vmem>>, %arg3: memref<1x128xf32, #tpu.memory_space<vmem>>, %arg4: memref<8x128xbf16, #tpu.memory_space<vmem>>) attributes {dimension_semantics = [#tpu.dimension_semantics<parallel>], iteration_bounds = array<i64: 1>, scalar_prefetch = 0 : i64, scratch_operands = 0 : i64, tpu.core_type = #tpu.core_type<tc>, window_params = [{transform_indices = @transform_0, window_bounds = array<i64: 8, 864>}, {pipeline_mode = #tpu.pipeline_mode<synchronous>, transform_indices = @transform_1, window_bounds = array<i64: 864, 128>}, {pipeline_mode = #tpu.pipeline_mode<synchronous>, transform_indices = @transform_2, window_bounds = array<i64: 1, 128>}, {transform_indices = @transform_3, window_bounds = array<i64: 8, 128>}]} {
    %c0 = arith.constant 0 : index
    %c0_0 = arith.constant 0 : index
    %0 = vector.load %arg1[%c0, %c0_0] : memref<8x864xbf16, #tpu.memory_space<vmem>>, vector<8x864xbf16>
    %c0_1 = arith.constant 0 : index
    %c0_2 = arith.constant 0 : index
    %1 = vector.load %arg2[%c0_1, %c0_2] : memref<864x128xbf16, #tpu.memory_space<vmem>>, vector<864x128xbf16>
    %cst = arith.constant dense<0.000000e+00> : vector<8x128xf32>
    %2 = tpu.matmul %0, %1, %cst {dimension_numbers = #tpu.dot_dimension_numbers<[1], [0], [0], [1], [0, 0, 1, 1], [], []>} : vector<8x864xbf16>, vector<864x128xbf16>, vector<8x128xf32> -> vector<8x128xf32>
    %c0_3 = arith.constant 0 : index
    %c0_4 = arith.constant 0 : index
    %3 = vector.load %arg3[%c0_3, %c0_4] : memref<1x128xf32, #tpu.memory_space<vmem>>, vector<1x128xf32>
    %4 = vector.broadcast %3 : vector<1x128xf32> to vector<8x128xf32>
    %5 = arith.addf %2, %4 : vector<8x128xf32>
    %cst_5 = arith.constant 0.000000e+00 : f32
    %6 = vector.broadcast %cst_5 : f32 to vector<8x128xf32>
    %7 = arith.maximumf %5, %6 : vector<8x128xf32>
    %8 = arith.truncf %7 : vector<8x128xf32> to vector<8x128xbf16>
    %c0_6 = arith.constant 0 : index
    %c0_7 = arith.constant 0 : index
    %9 = vector.load %arg4[%c0_6, %c0_7] : memref<8x128xbf16, #tpu.memory_space<vmem>>, vector<8x128xbf16>
    tpu.vector_store %arg4[%c0_6, %c0_7], %8 {strides = array<i32>} : memref<8x128xbf16, #tpu.memory_space<vmem>>, vector<8x128xbf16>,
    return
  }
  func.func @transform_0(%arg0: i32) -> (i32, i32) {
    %c0_i32 = arith.constant 0 : i32
    %c0_i32_0 = arith.constant 0 : i32
    return %arg0, %c0_i32 : i32, i32
  }
  func.func @transform_1(%arg0: i32) -> (i32, i32) {
    %c0_i32 = arith.constant 0 : i32
    %c0_i32_0 = arith.constant 0 : i32
    %c0_i32_1 = arith.constant 0 : i32
    return %c0_i32, %c0_i32_0 : i32, i32
  }
  func.func @transform_2(%arg0: i32) -> (i32, i32) {
    %c0_i32 = arith.constant 0 : i32
    %c0_i32_0 = arith.constant 0 : i32
    %c0_i32_1 = arith.constant 0 : i32
    return %c0_i32, %c0_i32_0 : i32, i32
  }
  func.func @transform_3(%arg0: i32) -> (i32, i32) {
    %c0_i32 = arith.constant 0 : i32
    %c0_i32_0 = arith.constant 0 : i32
    return %arg0, %c0_i32 : i32, i32
  }
}

module attributes {stable_mosaic.version = 11 : i64} {
  func.func @_matmul_bias_act_kernel(%arg0: i32, %arg1: memref<8x128xbf16, #tpu.memory_space<vmem>>, %arg2: memref<128x256xbf16, #tpu.memory_space<vmem>>, %arg3: memref<1x256xf32, #tpu.memory_space<vmem>>, %arg4: memref<8x256xbf16, #tpu.memory_space<vmem>>) attributes {dimension_semantics = [#tpu.dimension_semantics<parallel>], iteration_bounds = array<i64: 1>, scalar_prefetch = 0 : i64, scratch_operands = 0 : i64, tpu.core_type = #tpu.core_type<tc>, window_params = [{transform_indices = @transform_0, window_bounds = array<i64: 8, 128>}, {pipeline_mode = #tpu.pipeline_mode<synchronous>, transform_indices = @transform_1, window_bounds = array<i64: 128, 256>}, {pipeline_mode = #tpu.pipeline_mode<synchronous>, transform_indices = @transform_2, window_bounds = array<i64: 1, 256>}, {transform_indices = @transform_3, window_bounds = array<i64: 8, 256>}]} {
    %c0 = arith.constant 0 : index
    %c0_0 = arith.constant 0 : index
    %0 = vector.load %arg1[%c0, %c0_0] : memref<8x128xbf16, #tpu.memory_space<vmem>>, vector<8x128xbf16>
    %c0_1 = arith.constant 0 : index
    %c0_2 = arith.constant 0 : index
    %1 = vector.load %arg2[%c0_1, %c0_2] : memref<128x256xbf16, #tpu.memory_space<vmem>>, vector<128x256xbf16>
    %cst = arith.constant dense<0.000000e+00> : vector<8x256xf32>
    %2 = tpu.matmul %0, %1, %cst {dimension_numbers = #tpu.dot_dimension_numbers<[1], [0], [0], [1], [0, 0, 1, 1], [], []>} : vector<8x128xbf16>, vector<128x256xbf16>, vector<8x256xf32> -> vector<8x256xf32>
    %c0_3 = arith.constant 0 : index
    %c0_4 = arith.constant 0 : index
    %3 = vector.load %arg3[%c0_3, %c0_4] : memref<1x256xf32, #tpu.memory_space<vmem>>, vector<1x256xf32>
    %4 = vector.broadcast %3 : vector<1x256xf32> to vector<8x256xf32>
    %5 = arith.addf %2, %4 : vector<8x256xf32>
    %cst_5 = arith.constant 0.000000e+00 : f32
    %6 = vector.broadcast %cst_5 : f32 to vector<8x256xf32>
    %7 = arith.maximumf %5, %6 : vector<8x256xf32>
    %8 = arith.truncf %7 : vector<8x256xf32> to vector<8x256xbf16>
    %c0_6 = arith.constant 0 : index
    %c0_7 = arith.constant 0 : index
    %9 = vector.load %arg4[%c0_6, %c0_7] : memref<8x256xbf16, #tpu.memory_space<vmem>>, vector<8x256xbf16>
    tpu.vector_store %arg4[%c0_6, %c0_7], %8 {strides = array<i32>} : memref<8x256xbf16, #tpu.memory_space<vmem>>, vector<8x256xbf16>,
    return
  }
  func.func @transform_0(%arg0: i32) -> (i32, i32) {
    %c0_i32 = arith.constant 0 : i32
    %c0_i32_0 = arith.constant 0 : i32
    return %arg0, %c0_i32 : i32, i32
  }
  func.func @transform_1(%arg0: i32) -> (i32, i32) {
    %c0_i32 = arith.constant 0 : i32
    %c0_i32_0 = arith.constant 0 : i32
    %c0_i32_1 = arith.constant 0 : i32
    return %c0_i32, %c0_i32_0 : i32, i32
  }
  func.func @transform_2(%arg0: i32) -> (i32, i32) {
    %c0_i32 = arith.constant 0 : i32
    %c0_i32_0 = arith.constant 0 : i32
    %c0_i32_1 = arith.constant 0 : i32
    return %c0_i32, %c0_i32_0 : i32, i32
  }
  func.func @transform_3(%arg0: i32) -> (i32, i32) {
    %c0_i32 = arith.constant 0 : i32
    %c0_i32_0 = arith.constant 0 : i32
    return %arg0, %c0_i32 : i32, i32
  }
}

module attributes {stable_mosaic.version = 11 : i64} {
  func.func @_head_kernel(%arg0: i32, %arg1: memref<8x256xbf16, #tpu.memory_space<vmem>>, %arg2: memref<2x8xf32, #tpu.memory_space<vmem>>, %arg3: memref<256x10xf32, #tpu.memory_space<vmem>>, %arg4: memref<1x10xf32, #tpu.memory_space<vmem>>, %arg5: memref<2x10xf32, #tpu.memory_space<vmem>>) attributes {dimension_semantics = [#tpu.dimension_semantics<arbitrary>], iteration_bounds = array<i64: 1>, scalar_prefetch = 0 : i64, scratch_operands = 0 : i64, tpu.core_type = #tpu.core_type<tc>, window_params = [{pipeline_mode = #tpu.pipeline_mode<synchronous>, transform_indices = @transform_0, window_bounds = array<i64: 8, 256>}, {pipeline_mode = #tpu.pipeline_mode<synchronous>, transform_indices = @transform_1, window_bounds = array<i64: 2, 8>}, {pipeline_mode = #tpu.pipeline_mode<synchronous>, transform_indices = @transform_2, window_bounds = array<i64: 256, 10>}, {pipeline_mode = #tpu.pipeline_mode<synchronous>, transform_indices = @transform_3, window_bounds = array<i64: 1, 10>}, {pipeline_mode = #tpu.pipeline_mode<synchronous>, transform_indices = @transform_4, window_bounds = array<i64: 2, 10>}]} {
    %c0 = arith.constant 0 : index
    %c0_0 = arith.constant 0 : index
    %0 = vector.load %arg1[%c0, %c0_0] : memref<8x256xbf16, #tpu.memory_space<vmem>>, vector<8x256xbf16>
    %1 = arith.extf %0 : vector<8x256xbf16> to vector<8x256xf32>
    %c0_1 = arith.constant 0 : index
    %c0_2 = arith.constant 0 : index
    %2 = vector.load %arg2[%c0_1, %c0_2] : memref<2x8xf32, #tpu.memory_space<vmem>>, vector<2x8xf32>
    %cst = arith.constant dense<0.000000e+00> : vector<2x256xf32>
    %3 = tpu.matmul %2, %1, %cst {dimension_numbers = #tpu.dot_dimension_numbers<[1], [0], [0], [1], [0, 0, 1, 1], [], []>} : vector<2x8xf32>, vector<8x256xf32>, vector<2x256xf32> -> vector<2x256xf32>
    %c0_3 = arith.constant 0 : index
    %c0_4 = arith.constant 0 : index
    %4 = vector.load %arg3[%c0_3, %c0_4] : memref<256x10xf32, #tpu.memory_space<vmem>>, vector<256x10xf32>
    %cst_5 = arith.constant dense<0.000000e+00> : vector<2x10xf32>
    %5 = tpu.matmul %3, %4, %cst_5 {dimension_numbers = #tpu.dot_dimension_numbers<[1], [0], [0], [1], [0, 0, 1, 1], [], []>} : vector<2x256xf32>, vector<256x10xf32>, vector<2x10xf32> -> vector<2x10xf32>
    %c0_6 = arith.constant 0 : index
    %c0_7 = arith.constant 0 : index
    %6 = vector.load %arg4[%c0_6, %c0_7] : memref<1x10xf32, #tpu.memory_space<vmem>>, vector<1x10xf32>
    %7 = vector.broadcast %6 : vector<1x10xf32> to vector<2x10xf32>
    %8 = arith.addf %5, %7 : vector<2x10xf32>
    %c0_8 = arith.constant 0 : index
    %c0_9 = arith.constant 0 : index
    %9 = vector.load %arg5[%c0_8, %c0_9] : memref<2x10xf32, #tpu.memory_space<vmem>>, vector<2x10xf32>
    tpu.vector_store %arg5[%c0_8, %c0_9], %8 {strides = array<i32>} : memref<2x10xf32, #tpu.memory_space<vmem>>, vector<2x10xf32>,
    return
  }
  func.func @transform_0(%arg0: i32) -> (i32, i32) {
    %c0_i32 = arith.constant 0 : i32
    %c0_i32_0 = arith.constant 0 : i32
    %c0_i32_1 = arith.constant 0 : i32
    return %c0_i32, %c0_i32_0 : i32, i32
  }
  func.func @transform_1(%arg0: i32) -> (i32, i32) {
    %c0_i32 = arith.constant 0 : i32
    %c0_i32_0 = arith.constant 0 : i32
    %c0_i32_1 = arith.constant 0 : i32
    return %c0_i32, %c0_i32_0 : i32, i32
  }
  func.func @transform_2(%arg0: i32) -> (i32, i32) {
    %c0_i32 = arith.constant 0 : i32
    %c0_i32_0 = arith.constant 0 : i32
    %c0_i32_1 = arith.constant 0 : i32
    return %c0_i32, %c0_i32_0 : i32, i32
  }
  func.func @transform_3(%arg0: i32) -> (i32, i32) {
    %c0_i32 = arith.constant 0 : i32
    %c0_i32_0 = arith.constant 0 : i32
    %c0_i32_1 = arith.constant 0 : i32
    return %c0_i32, %c0_i32_0 : i32, i32
  }
  func.func @transform_4(%arg0: i32) -> (i32, i32) {
    %c0_i32 = arith.constant 0 : i32
    %c0_i32_0 = arith.constant 0 : i32
    %c0_i32_1 = arith.constant 0 : i32
    return %c0_i32, %c0_i32_0 : i32, i32
  }
}

</mosaic_0001>

<bundles_post_ra>
// kernel: base_encoder_forward.8
= control target key start
LH: loop header
LB: loop body
LE: loop exit
PB: predicated region body
PF: predicated region fallthrough
CT: control target
= control target key end

     0   :  { %s1198_s12 = smov 0   ;;  %s1496_s0 = inlined_call_operand.vmem [shape: bf16[2048,27], index: 0, kind: input, shape index: {}]   ;;  %s1497_s1 = inlined_call_operand.vmem [shape: bf16[27,16], index: 1, kind: input, shape index: {}]   ;;  %s1498_s2 = inlined_call_operand.vmem [shape: f32[1,16], index: 2, kind: input, shape index: {}]   ;;  %s1499_s3 = inlined_call_operand.vmem [shape: bf16[2048,16], index: 3, kind: output, shape index: {}]  }
   0x1 LB: > { %s940_s13 = sadd.s32 4294967295, %s1175_s12   ;;  %p944_p0 = scmp.ge.s32.totalorder %s1175_s12, 1  ;;  %s1175_s12 = sphi %s1198_s12, %s13_s12  }
   0x2   : > { %p138_p1 = scmp.lt.s32.totalorder %s1175_s12, 5 }
   0x4   : > { %p139_p2 = pnand %p944_p0, %p138_p1 }
   0x5   : > { %s945_s18 = sshll.u32 (!%p139_p2), %s940_s13, 6 }
   0x6   : > { %142 = sbr.rel (%p139_p2) target bundleno = 285 (0x11d), region = 32  ;;  %p163_p3 = scmp.lt.s32.totalorder (!%p139_p2), %s945_s18, 255 }
   0xb   : > { %v1083_v0 = vld [vmem:[%s1497_s1 + $0x8] sm:$0xf]  ;;  %v1152_v1 = vld [vmem:[%s1497_s1 + $0x8] sm:$0x30]  ;;  %vm515_vm0 = vcmask 1044480   ;;  %vm516_vm1 = vcmask 1045504  }
   0xc   : > { %v1084_v2 = vor.u32 %v1152_v1, %v1083_v0  ;;  %v1177_v3 = vmov 65535   ;;  %s1501_s18 = smov (!%p163_p3, %s945_s18), 255  ;;  %v1151_v7 = vld [vmem:[%s1497_s1] sm:$0xff]  ;;  %vm418_vm2 = vcmask 220160   ;;  %vm819_vm3 = vcmask 125952  }
   0xd   : > { %v517_v4 = vsel %vm515_vm0, 4294967295, %v1177_v3  ;;  %s946_s21 = sshll.u32 %s1501_s18, 2  ;;  %v1292_v40 = vld [vmem:[%s1498_s2] ss:$0 sm:$0xff] }
   0xe   : > { %v518_v5 = vsel %vm516_vm1, %v517_v4, 0  ;;  %s1223_s24 = scalar_lea.vmem %s1496_s0, %s946_s21  ;;  %s1301_s29 = scalar_lea.vmem %s1499_s3, %s946_s21 }
   0xf   : > { %v520_v6 = vand.u32 %v1084_v2, %v518_v5  ;;  %v1119_v8 = vld [vmem:[%s1223_s24] sm:$0xff]  ;;  %v1120_v12 = vld [vmem:[%s1223_s24 + $0x8] sm:$0xff]  ;;  %v1121_v16 = vld [vmem:[%s1223_s24 + $0x10] sm:$0xff] }
  0x10   : > { %v1127_v9 = vld [vmem:[%s1223_s24 + $0x40] sm:$0xff]  ;;  %v1128_v13 = vld [vmem:[%s1223_s24 + $0x48] sm:$0xff]  ;;  %v1129_v17 = vld [vmem:[%s1223_s24 + $0x50] sm:$0xff] }
  0x11   : > { %528 = vmatpush.bf16.msra.mxu0 %v520_v6  ;;  %1153 = vmatpush.bf16.msra.mxu1 %v520_v6  ;;  %v1135_v10 = vld [vmem:[%s1223_s24 + $0x80] sm:$0xff]  ;;  %v1136_v14 = vld [vmem:[%s1223_s24 + $0x88] sm:$0xff]  ;;  %v1137_v18 = vld [vmem:[%s1223_s24 + $0x90] sm:$0xff] }
  0x12   : > { %1154 = vmatpush.bf16.msra.mxu2 %v520_v6  ;;  %1155 = vmatpush.bf16.msra.mxu3 %v520_v6  ;;  %v1143_v11 = vld [vmem:[%s1223_s24 + $0xc0] sm:$0xff]  ;;  %v1144_v15 = vld [vmem:[%s1223_s24 + $0xc8] sm:$0xff]  ;;  %v1145_v19 = vld [vmem:[%s1223_s24 + $0xd0] sm:$0xff] }
  0x13   : > { %v1122_v20 = vld [vmem:[%s1223_s24 + $0x18] sm:$0xff]  ;;  %v1123_v24 = vld [vmem:[%s1223_s24 + $0x20] sm:$0xff]  ;;  %v1124_v28 = vld [vmem:[%s1223_s24 + $0x28] sm:$0xff] }
  0x14   : > { %v1130_v21 = vld [vmem:[%s1223_s24 + $0x58] sm:$0xff]  ;;  %v1131_v25 = vld [vmem:[%s1223_s24 + $0x60] sm:$0xff]  ;;  %v1132_v29 = vld [vmem:[%s1223_s24 + $0x68] sm:$0xff] }
  0x15   : > { %529 = vmatpush.bf16.msra.mxu0 %v1151_v7  ;;  %1156 = vmatpush.bf16.msra.mxu1 %v1151_v7  ;;  %v1138_v22 = vld [vmem:[%s1223_s24 + $0x98] sm:$0xff]  ;;  %v1139_v26 = vld [vmem:[%s1223_s24 + $0xa0] sm:$0xff]  ;;  %v1140_v30 = vld [vmem:[%s1223_s24 + $0xa8] sm:$0xff] }
  0x16   : > { %1157 = vmatpush.bf16.msra.mxu2 %v1151_v7  ;;  %1158 = vmatpush.bf16.msra.mxu3 %v1151_v7  ;;  %v1146_v23 = vld [vmem:[%s1223_s24 + $0xd8] sm:$0xff]  ;;  %v1147_v27 = vld [vmem:[%s1223_s24 + $0xe0] sm:$0xff]  ;;  %v1148_v31 = vld [vmem:[%s1223_s24 + $0xe8] sm:$0xff] }
  0x17   : > { %v1125_v32 = vld [vmem:[%s1223_s24 + $0x30] sm:$0xff]  ;;  %v1126_v36 = vld [vmem:[%s1223_s24 + $0x38] sm:$0xff] }
  0x18   : > { %1085 = vmatmul.msk.bf16.vlgmr.msra.gmra.mxu0 %vm418_vm2, %v1119_v8  ;;  %1093 = vmatmul.msk.bf16.vlgmr.msra.gmra.mxu1 %vm418_vm2, %v1127_v9  ;;  %v1133_v33 = vld [vmem:[%s1223_s24 + $0x70] sm:$0xff]  ;;  %v1134_v37 = vld [vmem:[%s1223_s24 + $0x78] sm:$0xff] }
  0x19   : > { %1101 = vmatmul.msk.bf16.vlgmr.msra.gmra.mxu2 %vm418_vm2, %v1135_v10  ;;  %1109 = vmatmul.msk.bf16.vlgmr.msra.gmra.mxu3 %vm418_vm2, %v1143_v11  ;;  %v1141_v34 = vld [vmem:[%s1223_s24 + $0xb0] sm:$0xff]  ;;  %v1142_v38 = vld [vmem:[%s1223_s24 + $0xb8] sm:$0xff] }
  0x1a   : > { %v1149_v35 = vld [vmem:[%s1223_s24 + $0xf0] sm:$0xff]  ;;  %v1150_v39 = vld [vmem:[%s1223_s24 + $0xf8] sm:$0xff] }
  0x28   : > { %1086 = vmatmul.msk.bf16.gmra.mxu0 %vm418_vm2, %v1120_v12  ;;  %1094 = vmatmul.msk.bf16.gmra.mxu1 %vm418_vm2, %v1128_v13 }
  0x29   : > { %1102 = vmatmul.msk.bf16.gmra.mxu2 %vm418_vm2, %v1136_v14  ;;  %1110 = vmatmul.msk.bf16.gmra.mxu3 %vm418_vm2, %v1144_v15 }
  0x38   : > { %1087 = vmatmul.msk.bf16.gmra.mxu0 %vm418_vm2, %v1121_v16  ;;  %1095 = vmatmul.msk.bf16.gmra.mxu1 %vm418_vm2, %v1129_v17 }
  0x39   : > { %1103 = vmatmul.msk.bf16.gmra.mxu2 %vm418_vm2, %v1137_v18  ;;  %1111 = vmatmul.msk.bf16.gmra.mxu3 %vm418_vm2, %v1145_v19 }
  0x48   : > { %1088 = vmatmul.msk.bf16.gmra.mxu0 %vm418_vm2, %v1122_v20  ;;  %1096 = vmatmul.msk.bf16.gmra.mxu1 %vm418_vm2, %v1130_v21 }
  0x49   : > { %1104 = vmatmul.msk.bf16.gmra.mxu2 %vm418_vm2, %v1138_v22  ;;  %1112 = vmatmul.msk.bf16.gmra.mxu3 %vm418_vm2, %v1146_v23 }
  0x58   : > { %1089 = vmatmul.msk.bf16.gmra.mxu0 %vm418_vm2, %v1123_v24  ;;  %1097 = vmatmul.msk.bf16.gmra.mxu1 %vm418_vm2, %v1131_v25 }
  0x59   : > { %1105 = vmatmul.msk.bf16.gmra.mxu2 %vm418_vm2, %v1139_v26  ;;  %1113 = vmatmul.msk.bf16.gmra.mxu3 %vm418_vm2, %v1147_v27 }
  0x68   : > { %1090 = vmatmul.msk.bf16.gmra.mxu0 %vm418_vm2, %v1124_v28  ;;  %1098 = vmatmul.msk.bf16.gmra.mxu1 %vm418_vm2, %v1132_v29 }
  0x69   : > { %1106 = vmatmul.msk.bf16.gmra.mxu2 %vm418_vm2, %v1140_v30  ;;  %1114 = vmatmul.msk.bf16.gmra.mxu3 %vm418_vm2, %v1148_v31 }
  0x78   : > { %1091 = vmatmul.msk.bf16.gmra.mxu0 %vm418_vm2, %v1125_v32  ;;  %1099 = vmatmul.msk.bf16.gmra.mxu1 %vm418_vm2, %v1133_v33 }
  0x79   : > { %1107 = vmatmul.msk.bf16.gmra.mxu2 %vm418_vm2, %v1141_v34  ;;  %1115 = vmatmul.msk.bf16.gmra.mxu3 %vm418_vm2, %v1149_v35 }
  0x88   : > { %1092 = vmatmul.msk.bf16.gmra.mxu0 %vm418_vm2, %v1126_v36  ;;  %1100 = vmatmul.msk.bf16.gmra.mxu1 %vm418_vm2, %v1134_v37 }
  0x89   : > { %1108 = vmatmul.msk.bf16.gmra.mxu2 %vm418_vm2, %v1142_v38  ;;  %1116 = vmatmul.msk.bf16.gmra.mxu3 %vm418_vm2, %v1150_v39 }
  0x95   : > { %v531_v41 = vpop.f32.mrf.mxu0  ;;  %v571_v42 = vpop.f32.mrf.mxu1 }
  0x96   : > { %v532_v43 = vadd.f32 %v1292_v40, %v531_v41  ;;  %v572_v44 = vadd.f32 %v1292_v40, %v571_v42 }
  0x98   : > { %v691_v45 = vmax.f32 %v532_v43, 0.0  ;;  %v707_v46 = vmax.f32 %v572_v44, 0.0 }
  0x9a   : > { %v755_v47 = vpack.c.bf16 %v691_v45, %v691_v45  ;;  %v771_v48 = vpack.c.bf16 %v707_v46, %v707_v46 }
  0x9c   : > { %820 = vst.msk [vmem:[%s1301_s29] sm:$0xf] %vm819_vm3, %v755_v47  ;;  %v611_v49 = vpop.f32.mrf.mxu2  ;;  %v651_v50 = vpop.f32.mrf.mxu3 }
  0x9d   : > { %836 = vst.msk [vmem:[%s1301_s29 + $0x40] sm:$0xf] %vm819_vm3, %v771_v48  ;;  %v612_v51 = vadd.f32 %v1292_v40, %v611_v49  ;;  %v652_v52 = vadd.f32 %v1292_v40, %v651_v50  ;;  %v533_v53 = vpop.f32.mrf.mxu0  ;;  %v573_v54 = vpop.f32.mrf.mxu1 }
  0x9e   : > { %v534_v55 = vadd.f32 %v1292_v40, %v533_v53  ;;  %v574_v56 = vadd.f32 %v1292_v40, %v573_v54 }
  0x9f   : > { %v723_v57 = vmax.f32 %v612_v51, 0.0  ;;  %v739_v58 = vmax.f32 %v652_v52, 0.0 }
  0xa0   : > { %v692_v59 = vmax.f32 %v534_v55, 0.0  ;;  %v708_v60 = vmax.f32 %v574_v56, 0.0 }
  0xa1   : > { %v787_v61 = vpack.c.bf16 %v723_v57, %v723_v57  ;;  %v803_v62 = vpack.c.bf16 %v739_v58, %v739_v58 }
  0xa2   : > { %v756_v63 = vpack.c.bf16 %v692_v59, %v692_v59  ;;  %v772_v0 = vpack.c.bf16 %v708_v60, %v708_v60 }
  0xa3   : > { %852 = vst.msk [vmem:[%s1301_s29 + $0x80] sm:$0xf] %vm819_vm3, %v787_v61 }
  0xa4   : > { %868 = vst.msk [vmem:[%s1301_s29 + $0xc0] sm:$0xf] %vm819_vm3, %v803_v62  ;;  %v613_v1 = vpop.f32.mrf.mxu2  ;;  %v653_v2 = vpop.f32.mrf.mxu3 }
  0xa5   : > { %821 = vst.msk [vmem:[%s1301_s29 + $0x4] sm:$0xf] %vm819_vm3, %v756_v63  ;;  %v614_v3 = vadd.f32 %v1292_v40, %v613_v1  ;;  %v654_v4 = vadd.f32 %v1292_v40, %v653_v2  ;;  %v536_v5 = vpop.f32.mrf.mxu0  ;;  %v576_v6 = vpop.f32.mrf.mxu1 }
  0xa6   : > { %837 = vst.msk [vmem:[%s1301_s29 + $0x44] sm:$0xf] %vm819_vm3, %v772_v0  ;;  %v537_v7 = vadd.f32 %v1292_v40, %v536_v5  ;;  %v577_v8 = vadd.f32 %v1292_v40, %v576_v6 }
  0xa7   : > { %v724_v9 = vmax.f32 %v614_v3, 0.0  ;;  %v740_v10 = vmax.f32 %v654_v4, 0.0 }
  0xa8   : > { %v693_v11 = vmax.f32 %v537_v7, 0.0  ;;  %v709_v12 = vmax.f32 %v577_v8, 0.0 }
  0xa9   : > { %v788_v13 = vpack.c.bf16 %v724_v9, %v724_v9  ;;  %v804_v14 = vpack.c.bf16 %v740_v10, %v740_v10 }
  0xaa   : > { %v757_v15 = vpack.c.bf16 %v693_v11, %v693_v11  ;;  %v773_v16 = vpack.c.bf16 %v709_v12, %v709_v12 }
  0xab   : > { %853 = vst.msk [vmem:[%s1301_s29 + $0x84] sm:$0xf] %vm819_vm3, %v788_v13 }
  0xac   : > { %869 = vst.msk [vmem:[%s1301_s29 + $0xc4] sm:$0xf] %vm819_vm3, %v804_v14  ;;  %v616_v17 = vpop.f32.mrf.mxu2  ;;  %v656_v18 = vpop.f32.mrf.mxu3 }
  0xad   : > { %822 = vst.msk [vmem:[%s1301_s29 + $0x8] sm:$0xf] %vm819_vm3, %v757_v15  ;;  %v617_v19 = vadd.f32 %v1292_v40, %v616_v17  ;;  %v657_v20 = vadd.f32 %v1292_v40, %v656_v18  ;;  %v538_v21 = vpop.f32.mrf.mxu0  ;;  %v578_v22 = vpop.f32.mrf.mxu1 }
  0xae   : > { %838 = vst.msk [vmem:[%s1301_s29 + $0x48] sm:$0xf] %vm819_vm3, %v773_v16  ;;  %v539_v23 = vadd.f32 %v1292_v40, %v538_v21  ;;  %v579_v24 = vadd.f32 %v1292_v40, %v578_v22 }
  0xaf   : > { %v725_v25 = vmax.f32 %v617_v19, 0.0  ;;  %v741_v26 = vmax.f32 %v657_v20, 0.0 }
  0xb0   : > { %v694_v27 = vmax.f32 %v539_v23, 0.0  ;;  %v710_v28 = vmax.f32 %v579_v24, 0.0 }
  0xb1   : > { %v789_v29 = vpack.c.bf16 %v725_v25, %v725_v25  ;;  %v805_v30 = vpack.c.bf16 %v741_v26, %v741_v26 }
  0xb2   : > { %v758_v31 = vpack.c.bf16 %v694_v27, %v694_v27  ;;  %v774_v32 = vpack.c.bf16 %v710_v28, %v710_v28 }
  0xb3   : > { %854 = vst.msk [vmem:[%s1301_s29 + $0x88] sm:$0xf] %vm819_vm3, %v789_v29 }
  0xb4   : > { %870 = vst.msk [vmem:[%s1301_s29 + $0xc8] sm:$0xf] %vm819_vm3, %v805_v30  ;;  %v618_v33 = vpop.f32.mrf.mxu2  ;;  %v658_v34 = vpop.f32.mrf.mxu3 }
  0xb5   : > { %823 = vst.msk [vmem:[%s1301_s29 + $0xc] sm:$0xf] %vm819_vm3, %v758_v31  ;;  %v619_v35 = vadd.f32 %v1292_v40, %v618_v33  ;;  %v659_v36 = vadd.f32 %v1292_v40, %v658_v34  ;;  %v541_v37 = vpop.f32.mrf.mxu0  ;;  %v581_v38 = vpop.f32.mrf.mxu1 }
  0xb6   : > { %839 = vst.msk [vmem:[%s1301_s29 + $0x4c] sm:$0xf] %vm819_vm3, %v774_v32  ;;  %v542_v39 = vadd.f32 %v1292_v40, %v541_v37  ;;  %v582_v41 = vadd.f32 %v1292_v40, %v581_v38 }
  0xb7   : > { %v726_v42 = vmax.f32 %v619_v35, 0.0  ;;  %v742_v43 = vmax.f32 %v659_v36, 0.0 }
  0xb8   : > { %v695_v44 = vmax.f32 %v542_v39, 0.0  ;;  %v711_v45 = vmax.f32 %v582_v41, 0.0 }
  0xb9   : > { %v790_v46 = vpack.c.bf16 %v726_v42, %v726_v42  ;;  %v806_v47 = vpack.c.bf16 %v742_v43, %v742_v43 }
  0xba   : > { %v759_v48 = vpack.c.bf16 %v695_v44, %v695_v44  ;;  %v775_v49 = vpack.c.bf16 %v711_v45, %v711_v45 }
  0xbb   : > { %855 = vst.msk [vmem:[%s1301_s29 + $0x8c] sm:$0xf] %vm819_vm3, %v790_v46 }
  0xbc   : > { %871 = vst.msk [vmem:[%s1301_s29 + $0xcc] sm:$0xf] %vm819_vm3, %v806_v47  ;;  %v621_v50 = vpop.f32.mrf.mxu2  ;;  %v661_v51 = vpop.f32.mrf.mxu3 }
  0xbd   : > { %824 = vst.msk [vmem:[%s1301_s29 + $0x10] sm:$0xf] %vm819_vm3, %v759_v48  ;;  %v622_v52 = vadd.f32 %v1292_v40, %v621_v50  ;;  %v662_v53 = vadd.f32 %v1292_v40, %v661_v51  ;;  %v543_v54 = vpop.f32.mrf.mxu0  ;;  %v583_v55 = vpop.f32.mrf.mxu1 }
  0xbe   : > { %840 = vst.msk [vmem:[%s1301_s29 + $0x50] sm:$0xf] %vm819_vm3, %v775_v49  ;;  %v544_v56 = vadd.f32 %v1292_v40, %v543_v54  ;;  %v584_v57 = vadd.f32 %v1292_v40, %v583_v55 }
  0xbf   : > { %v727_v58 = vmax.f32 %v622_v52, 0.0  ;;  %v743_v59 = vmax.f32 %v662_v53, 0.0 }
  0xc0   : > { %v696_v60 = vmax.f32 %v544_v56, 0.0  ;;  %v712_v61 = vmax.f32 %v584_v57, 0.0 }
  0xc1   : > { %v791_v62 = vpack.c.bf16 %v727_v58, %v727_v58  ;;  %v807_v63 = vpack.c.bf16 %v743_v59, %v743_v59 }
  0xc2   : > { %v760_v0 = vpack.c.bf16 %v696_v60, %v696_v60  ;;  %v776_v1 = vpack.c.bf16 %v712_v61, %v712_v61 }
  0xc3   : > { %856 = vst.msk [vmem:[%s1301_s29 + $0x90] sm:$0xf] %vm819_vm3, %v791_v62 }
  0xc4   : > { %872 = vst.msk [vmem:[%s1301_s29 + $0xd0] sm:$0xf] %vm819_vm3, %v807_v63  ;;  %v623_v2 = vpop.f32.mrf.mxu2  ;;  %v663_v3 = vpop.f32.mrf.mxu3 }
  0xc5   : > { %825 = vst.msk [vmem:[%s1301_s29 + $0x14] sm:$0xf] %vm819_vm3, %v760_v0  ;;  %v624_v4 = vadd.f32 %v1292_v40, %v623_v2  ;;  %v664_v5 = vadd.f32 %v1292_v40, %v663_v3  ;;  %v546_v6 = vpop.f32.mrf.mxu0  ;;  %v586_v7 = vpop.f32.mrf.mxu1 }
  0xc6   : > { %841 = vst.msk [vmem:[%s1301_s29 + $0x54] sm:$0xf] %vm819_vm3, %v776_v1  ;;  %v547_v8 = vadd.f32 %v1292_v40, %v546_v6  ;;  %v587_v9 = vadd.f32 %v1292_v40, %v586_v7 }
  0xc7   : > { %v728_v10 = vmax.f32 %v624_v4, 0.0  ;;  %v744_v11 = vmax.f32 %v664_v5, 0.0 }
  0xc8   : > { %v697_v12 = vmax.f32 %v547_v8, 0.0  ;;  %v713_v13 = vmax.f32 %v587_v9, 0.0 }
  0xc9   : > { %v792_v14 = vpack.c.bf16 %v728_v10, %v728_v10  ;;  %v808_v15 = vpack.c.bf16 %v744_v11, %v744_v11 }
  0xca   : > { %v761_v16 = vpack.c.bf16 %v697_v12, %v697_v12  ;;  %v777_v17 = vpack.c.bf16 %v713_v13, %v713_v13 }
  0xcb   : > { %857 = vst.msk [vmem:[%s1301_s29 + $0x94] sm:$0xf] %vm819_vm3, %v792_v14 }
  0xcc   : > { %873 = vst.msk [vmem:[%s1301_s29 + $0xd4] sm:$0xf] %vm819_vm3, %v808_v15  ;;  %v626_v18 = vpop.f32.mrf.mxu2  ;;  %v666_v19 = vpop.f32.mrf.mxu3 }
  0xcd   : > { %826 = vst.msk [vmem:[%s1301_s29 + $0x18] sm:$0xf] %vm819_vm3, %v761_v16  ;;  %v627_v20 = vadd.f32 %v1292_v40, %v626_v18  ;;  %v667_v21 = vadd.f32 %v1292_v40, %v666_v19  ;;  %v548_v22 = vpop.f32.mrf.mxu0  ;;  %v588_v23 = vpop.f32.mrf.mxu1 }
  0xce   : > { %842 = vst.msk [vmem:[%s1301_s29 + $0x58] sm:$0xf] %vm819_vm3, %v777_v17  ;;  %v549_v24 = vadd.f32 %v1292_v40, %v548_v22  ;;  %v589_v25 = vadd.f32 %v1292_v40, %v588_v23 }
  0xcf   : > { %v729_v26 = vmax.f32 %v627_v20, 0.0  ;;  %v745_v27 = vmax.f32 %v667_v21, 0.0 }
  0xd0   : > { %v698_v28 = vmax.f32 %v549_v24, 0.0  ;;  %v714_v29 = vmax.f32 %v589_v25, 0.0 }
  0xd1   : > { %v793_v30 = vpack.c.bf16 %v729_v26, %v729_v26  ;;  %v809_v31 = vpack.c.bf16 %v745_v27, %v745_v27 }
  0xd2   : > { %v762_v32 = vpack.c.bf16 %v698_v28, %v698_v28  ;;  %v778_v33 = vpack.c.bf16 %v714_v29, %v714_v29 }
  0xd3   : > { %858 = vst.msk [vmem:[%s1301_s29 + $0x98] sm:$0xf] %vm819_vm3, %v793_v30 }
  0xd4   : > { %874 = vst.msk [vmem:[%s1301_s29 + $0xd8] sm:$0xf] %vm819_vm3, %v809_v31  ;;  %v628_v34 = vpop.f32.mrf.mxu2  ;;  %v668_v35 = vpop.f32.mrf.mxu3 }
  0xd5   : > { %827 = vst.msk [vmem:[%s1301_s29 + $0x1c] sm:$0xf] %vm819_vm3, %v762_v32  ;;  %v629_v36 = vadd.f32 %v1292_v40, %v628_v34  ;;  %v669_v37 = vadd.f32 %v1292_v40, %v668_v35  ;;  %v551_v38 = vpop.f32.mrf.mxu0  ;;  %v591_v39 = vpop.f32.mrf.mxu1 }
  0xd6   : > { %843 = vst.msk [vmem:[%s1301_s29 + $0x5c] sm:$0xf] %vm819_vm3, %v778_v33  ;;  %v552_v41 = vadd.f32 %v1292_v40, %v551_v38  ;;  %v592_v42 = vadd.f32 %v1292_v40, %v591_v39 }
  0xd7   : > { %v730_v43 = vmax.f32 %v629_v36, 0.0  ;;  %v746_v44 = vmax.f32 %v669_v37, 0.0 }
  0xd8   : > { %v699_v45 = vmax.f32 %v552_v41, 0.0  ;;  %v715_v46 = vmax.f32 %v592_v42, 0.0 }
  0xd9   : > { %v794_v47 = vpack.c.bf16 %v730_v43, %v730_v43  ;;  %v810_v48 = vpack.c.bf16 %v746_v44, %v746_v44 }
  0xda   : > { %v763_v49 = vpack.c.bf16 %v699_v45, %v699_v45  ;;  %v779_v50 = vpack.c.bf16 %v715_v46, %v715_v46 }
  0xdb   : > { %859 = vst.msk [vmem:[%s1301_s29 + $0x9c] sm:$0xf] %vm819_vm3, %v794_v47 }
  0xdc   : > { %875 = vst.msk [vmem:[%s1301_s29 + $0xdc] sm:$0xf] %vm819_vm3, %v810_v48  ;;  %v631_v51 = vpop.f32.mrf.mxu2  ;;  %v671_v52 = vpop.f32.mrf.mxu3 }
  0xdd   : > { %828 = vst.msk [vmem:[%s1301_s29 + $0x20] sm:$0xf] %vm819_vm3, %v763_v49  ;;  %v632_v53 = vadd.f32 %v1292_v40, %v631_v51  ;;  %v672_v54 = vadd.f32 %v1292_v40, %v671_v52  ;;  %v553_v55 = vpop.f32.mrf.mxu0  ;;  %v593_v56 = vpop.f32.mrf.mxu1 }
  0xde   : > { %844 = vst.msk [vmem:[%s1301_s29 + $0x60] sm:$0xf] %vm819_vm3, %v779_v50  ;;  %v554_v57 = vadd.f32 %v1292_v40, %v553_v55  ;;  %v594_v58 = vadd.f32 %v1292_v40, %v593_v56 }
  0xdf   : > { %v731_v59 = vmax.f32 %v632_v53, 0.0  ;;  %v747_v60 = vmax.f32 %v672_v54, 0.0 }
  0xe0   : > { %v700_v61 = vmax.f32 %v554_v57, 0.0  ;;  %v716_v62 = vmax.f32 %v594_v58, 0.0 }
  0xe1   : > { %v795_v63 = vpack.c.bf16 %v731_v59, %v731_v59  ;;  %v811_v0 = vpack.c.bf16 %v747_v60, %v747_v60 }
  0xe2   : > { %v764_v1 = vpack.c.bf16 %v700_v61, %v700_v61  ;;  %v780_v2 = vpack.c.bf16 %v716_v62, %v716_v62 }
  0xe3   : > { %860 = vst.msk [vmem:[%s1301_s29 + $0xa0] sm:$0xf] %vm819_vm3, %v795_v63 }
  0xe4   : > { %876 = vst.msk [vmem:[%s1301_s29 + $0xe0] sm:$0xf] %vm819_vm3, %v811_v0  ;;  %v633_v3 = vpop.f32.mrf.mxu2  ;;  %v673_v4 = vpop.f32.mrf.mxu3 }
  0xe5   : > { %829 = vst.msk [vmem:[%s1301_s29 + $0x24] sm:$0xf] %vm819_vm3, %v764_v1  ;;  %v634_v5 = vadd.f32 %v1292_v40, %v633_v3  ;;  %v674_v6 = vadd.f32 %v1292_v40, %v673_v4  ;;  %v556_v7 = vpop.f32.mrf.mxu0  ;;  %v596_v8 = vpop.f32.mrf.mxu1 }
  0xe6   : > { %845 = vst.msk [vmem:[%s1301_s29 + $0x64] sm:$0xf] %vm819_vm3, %v780_v2  ;;  %v557_v9 = vadd.f32 %v1292_v40, %v556_v7  ;;  %v597_v10 = vadd.f32 %v1292_v40, %v596_v8 }
  0xe7   : > { %v732_v11 = vmax.f32 %v634_v5, 0.0  ;;  %v748_v12 = vmax.f32 %v674_v6, 0.0 }
  0xe8   : > { %v701_v13 = vmax.f32 %v557_v9, 0.0  ;;  %v717_v14 = vmax.f32 %v597_v10, 0.0 }
  0xe9   : > { %v796_v15 = vpack.c.bf16 %v732_v11, %v732_v11  ;;  %v812_v16 = vpack.c.bf16 %v748_v12, %v748_v12 }
  0xea   : > { %v765_v17 = vpack.c.bf16 %v701_v13, %v701_v13  ;;  %v781_v18 = vpack.c.bf16 %v717_v14, %v717_v14 }
  0xeb   : > { %861 = vst.msk [vmem:[%s1301_s29 + $0xa4] sm:$0xf] %vm819_vm3, %v796_v15 }
  0xec   : > { %877 = vst.msk [vmem:[%s1301_s29 + $0xe4] sm:$0xf] %vm819_vm3, %v812_v16  ;;  %v636_v19 = vpop.f32.mrf.mxu2  ;;  %v676_v20 = vpop.f32.mrf.mxu3 }
  0xed   : > { %830 = vst.msk [vmem:[%s1301_s29 + $0x28] sm:$0xf] %vm819_vm3, %v765_v17  ;;  %v637_v21 = vadd.f32 %v1292_v40, %v636_v19  ;;  %v677_v22 = vadd.f32 %v1292_v40, %v676_v20  ;;  %v558_v23 = vpop.f32.mrf.mxu0  ;;  %v598_v24 = vpop.f32.mrf.mxu1 }
  0xee   : > { %846 = vst.msk [vmem:[%s1301_s29 + $0x68] sm:$0xf] %vm819_vm3, %v781_v18  ;;  %v559_v25 = vadd.f32 %v1292_v40, %v558_v23  ;;  %v599_v26 = vadd.f32 %v1292_v40, %v598_v24 }
  0xef   : > { %v733_v27 = vmax.f32 %v637_v21, 0.0  ;;  %v749_v28 = vmax.f32 %v677_v22, 0.0 }
  0xf0   : > { %v702_v29 = vmax.f32 %v559_v25, 0.0  ;;  %v718_v30 = vmax.f32 %v599_v26, 0.0 }
  0xf1   : > { %v797_v31 = vpack.c.bf16 %v733_v27, %v733_v27  ;;  %v813_v32 = vpack.c.bf16 %v749_v28, %v749_v28 }
  0xf2   : > { %v766_v33 = vpack.c.bf16 %v702_v29, %v702_v29  ;;  %v782_v34 = vpack.c.bf16 %v718_v30, %v718_v30 }
  0xf3   : > { %862 = vst.msk [vmem:[%s1301_s29 + $0xa8] sm:$0xf] %vm819_vm3, %v797_v31 }
  0xf4   : > { %878 = vst.msk [vmem:[%s1301_s29 + $0xe8] sm:$0xf] %vm819_vm3, %v813_v32  ;;  %v638_v35 = vpop.f32.mrf.mxu2  ;;  %v678_v36 = vpop.f32.mrf.mxu3 }
  0xf5   : > { %831 = vst.msk [vmem:[%s1301_s29 + $0x2c] sm:$0xf] %vm819_vm3, %v766_v33  ;;  %v639_v37 = vadd.f32 %v1292_v40, %v638_v35  ;;  %v679_v38 = vadd.f32 %v1292_v40, %v678_v36  ;;  %v561_v39 = vpop.f32.mrf.mxu0  ;;  %v601_v41 = vpop.f32.mrf.mxu1 }
  0xf6   : > { %847 = vst.msk [vmem:[%s1301_s29 + $0x6c] sm:$0xf] %vm819_vm3, %v782_v34  ;;  %v562_v42 = vadd.f32 %v1292_v40, %v561_v39  ;;  %v602_v43 = vadd.f32 %v1292_v40, %v601_v41 }
  0xf7   : > { %v734_v44 = vmax.f32 %v639_v37, 0.0  ;;  %v750_v45 = vmax.f32 %v679_v38, 0.0 }
  0xf8   : > { %v703_v46 = vmax.f32 %v562_v42, 0.0  ;;  %v719_v47 = vmax.f32 %v602_v43, 0.0 }
  0xf9   : > { %v798_v48 = vpack.c.bf16 %v734_v44, %v734_v44  ;;  %v814_v49 = vpack.c.bf16 %v750_v45, %v750_v45 }
  0xfa   : > { %v767_v50 = vpack.c.bf16 %v703_v46, %v703_v46  ;;  %v783_v51 = vpack.c.bf16 %v719_v47, %v719_v47 }
  0xfb   : > { %863 = vst.msk [vmem:[%s1301_s29 + $0xac] sm:$0xf] %vm819_vm3, %v798_v48 }
  0xfc   : > { %879 = vst.msk [vmem:[%s1301_s29 + $0xec] sm:$0xf] %vm819_vm3, %v814_v49  ;;  %v641_v52 = vpop.f32.mrf.mxu2  ;;  %v681_v53 = vpop.f32.mrf.mxu3 }
  0xfd   : > { %832 = vst.msk [vmem:[%s1301_s29 + $0x30] sm:$0xf] %vm819_vm3, %v767_v50  ;;  %v642_v54 = vadd.f32 %v1292_v40, %v641_v52  ;;  %v682_v55 = vadd.f32 %v1292_v40, %v681_v53  ;;  %v563_v56 = vpop.f32.mrf.mxu0  ;;  %v603_v57 = vpop.f32.mrf.mxu1 }
  0xfe   : > { %848 = vst.msk [vmem:[%s1301_s29 + $0x70] sm:$0xf] %vm819_vm3, %v783_v51  ;;  %v564_v58 = vadd.f32 %v1292_v40, %v563_v56  ;;  %v604_v59 = vadd.f32 %v1292_v40, %v603_v57 }
  0xff   : > { %v735_v60 = vmax.f32 %v642_v54, 0.0  ;;  %v751_v61 = vmax.f32 %v682_v55, 0.0 }
 0x100   : > { %v704_v62 = vmax.f32 %v564_v58, 0.0  ;;  %v720_v63 = vmax.f32 %v604_v59, 0.0 }
 0x101   : > { %v799_v0 = vpack.c.bf16 %v735_v60, %v735_v60  ;;  %v815_v1 = vpack.c.bf16 %v751_v61, %v751_v61 }
 0x102   : > { %v768_v2 = vpack.c.bf16 %v704_v62, %v704_v62  ;;  %v784_v3 = vpack.c.bf16 %v720_v63, %v720_v63 }
 0x103   : > { %864 = vst.msk [vmem:[%s1301_s29 + $0xb0] sm:$0xf] %vm819_vm3, %v799_v0 }
 0x104   : > { %880 = vst.msk [vmem:[%s1301_s29 + $0xf0] sm:$0xf] %vm819_vm3, %v815_v1  ;;  %v643_v4 = vpop.f32.mrf.mxu2  ;;  %v683_v5 = vpop.f32.mrf.mxu3 }
 0x105   : > { %833 = vst.msk [vmem:[%s1301_s29 + $0x34] sm:$0xf] %vm819_vm3, %v768_v2  ;;  %v644_v6 = vadd.f32 %v1292_v40, %v643_v4  ;;  %v684_v7 = vadd.f32 %v1292_v40, %v683_v5  ;;  %v566_v8 = vpop.f32.mrf.mxu0  ;;  %v606_v9 = vpop.f32.mrf.mxu1 }
 0x106   : > { %849 = vst.msk [vmem:[%s1301_s29 + $0x74] sm:$0xf] %vm819_vm3, %v784_v3  ;;  %v567_v10 = vadd.f32 %v1292_v40, %v566_v8  ;;  %v607_v11 = vadd.f32 %v1292_v40, %v606_v9 }
 0x107   : > { %v736_v12 = vmax.f32 %v644_v6, 0.0  ;;  %v752_v13 = vmax.f32 %v684_v7, 0.0 }
 0x108   : > { %v705_v14 = vmax.f32 %v567_v10, 0.0  ;;  %v721_v15 = vmax.f32 %v607_v11, 0.0 }
 0x109   : > { %v800_v16 = vpack.c.bf16 %v736_v12, %v736_v12  ;;  %v816_v17 = vpack.c.bf16 %v752_v13, %v752_v13 }
 0x10a   : > { %v769_v18 = vpack.c.bf16 %v705_v14, %v705_v14  ;;  %v785_v19 = vpack.c.bf16 %v721_v15, %v721_v15 }
 0x10b   : > { %865 = vst.msk [vmem:[%s1301_s29 + $0xb4] sm:$0xf] %vm819_vm3, %v800_v16 }
 0x10c   : > { %881 = vst.msk [vmem:[%s1301_s29 + $0xf4] sm:$0xf] %vm819_vm3, %v816_v17  ;;  %v646_v20 = vpop.f32.mrf.mxu2  ;;  %v686_v21 = vpop.f32.mrf.mxu3 }
 0x10d   : > { %834 = vst.msk [vmem:[%s1301_s29 + $0x38] sm:$0xf] %vm819_vm3, %v769_v18  ;;  %v647_v22 = vadd.f32 %v1292_v40, %v646_v20  ;;  %v687_v23 = vadd.f32 %v1292_v40, %v686_v21  ;;  %v568_v24 = vpop.f32.mrf.mxu0  ;;  %v608_v25 = vpop.f32.mrf.mxu1 }
 0x10e   : > { %850 = vst.msk [vmem:[%s1301_s29 + $0x78] sm:$0xf] %vm819_vm3, %v785_v19  ;;  %v569_v26 = vadd.f32 %v1292_v40, %v568_v24  ;;  %v609_v27 = vadd.f32 %v1292_v40, %v608_v25 }
 0x10f   : > { %v737_v28 = vmax.f32 %v647_v22, 0.0  ;;  %v753_v29 = vmax.f32 %v687_v23, 0.0 }
 0x110   : > { %v706_v30 = vmax.f32 %v569_v26, 0.0  ;;  %v722_v31 = vmax.f32 %v609_v27, 0.0 }
 0x111   : > { %v801_v32 = vpack.c.bf16 %v737_v28, %v737_v28  ;;  %v817_v33 = vpack.c.bf16 %v753_v29, %v753_v29 }
 0x112   : > { %v770_v34 = vpack.c.bf16 %v706_v30, %v706_v30  ;;  %v786_v35 = vpack.c.bf16 %v722_v31, %v722_v31 }
 0x113   : > { %866 = vst.msk [vmem:[%s1301_s29 + $0xb8] sm:$0xf] %vm819_vm3, %v801_v32 }
 0x114   : > { %882 = vst.msk [vmem:[%s1301_s29 + $0xf8] sm:$0xf] %vm819_vm3, %v817_v33  ;;  %v648_v36 = vpop.f32.mrf.mxu2  ;;  %v688_v37 = vpop.f32.mrf.mxu3 }
 0x115   : > { %835 = vst.msk [vmem:[%s1301_s29 + $0x3c] sm:$0xf] %vm819_vm3, %v770_v34  ;;  %v649_v38 = vadd.f32 %v1292_v40, %v648_v36  ;;  %v689_v39 = vadd.f32 %v1292_v40, %v688_v37 }
 0x116   : > { %851 = vst.msk [vmem:[%s1301_s29 + $0x7c] sm:$0xf] %vm819_vm3, %v786_v35 }
 0x117   : > { %v738_v41 = vmax.f32 %v649_v38, 0.0  ;;  %v754_v42 = vmax.f32 %v689_v39, 0.0 }
 0x119   : > { %v802_v43 = vpack.c.bf16 %v738_v41, %v738_v41  ;;  %v818_v44 = vpack.c.bf16 %v754_v42, %v754_v42 }
 0x11b   : > { %867 = vst.msk [vmem:[%s1301_s29 + $0xbc] sm:$0xf] %vm819_vm3, %v802_v43 }
 0x11c   : > { %883 = vst.msk [vmem:[%s1301_s29 + $0xfc] sm:$0xf] %vm819_vm3, %v818_v44 }
 0x11d PF: > { %s13_s12 = sadd.s32 1, %s1175_s12  }
 0x11e   : > { %p10_p4 = scmp.ge.s32.totalorder %s13_s12, 6  }
 0x120   :  { %12 = sbr.rel (!%p10_p4) target bundleno = 1 (0x1), region = 62 }

// kernel: base_encoder_forward.9
= control target key start
LH: loop header
LB: loop body
LE: loop exit
PB: predicated region body
PF: predicated region fallthrough
CT: control target
= control target key end

     0   :  { %s1174_s12 = smov 0   ;;  %s1466_s0 = inlined_call_operand.vmem [shape: bf16[2048,16], index: 0, kind: input, shape index: {}]   ;;  %s1467_s1 = inlined_call_operand.vmem [shape: bf16[16,16], index: 1, kind: input, shape index: {}]   ;;  %s1468_s2 = inlined_call_operand.vmem [shape: f32[1,16], index: 2, kind: input, shape index: {}]   ;;  %s1469_s3 = inlined_call_operand.vmem [shape: bf16[2048,16], index: 3, kind: output, shape index: {}]  }
   0x1 LB: > { %s926_s13 = sadd.s32 4294967295, %s1152_s12   ;;  %p930_p0 = scmp.ge.s32.totalorder %s1152_s12, 1  ;;  %s1152_s12 = sphi %s1174_s12, %s13_s12  }
   0x2   : > { %p138_p1 = scmp.lt.s32.totalorder %s1152_s12, 5 }
   0x4   : > { %p139_p2 = pnand %p930_p0, %p138_p1 }
   0x5   : > { %s931_s16 = sshll.u32 (!%p139_p2), %s926_s13, 6 }
   0x6   : > { %142 = sbr.rel (%p139_p2) target bundleno = 277 (0x115), region = 32  ;;  %p163_p3 = scmp.lt.s32.totalorder (!%p139_p2), %s931_s16, 255 }
   0xb   : > { %v1133_v0 = vld [vmem:[%s1467_s1] sm:$0xff]  ;;  %s1471_s16 = smov (!%p163_p3, %s931_s16), 255  ;;  %vm411_vm0 = vcmask 130048   ;;  %vm805_vm1 = vcmask 125952  }
   0xc   : > { %515 = vmatpush.bf16.msra.mxu0 %v1133_v0  ;;  %1134 = vmatpush.bf16.msra.mxu1 %v1133_v0  ;;  %s932_s17 = sshll.u32 %s1471_s16, 2  ;;  %v1262_v33 = vld [vmem:[%s1468_s2] ss:$0 sm:$0xff] }
   0xd   : > { %1135 = vmatpush.bf16.msra.mxu2 %v1133_v0  ;;  %1136 = vmatpush.bf16.msra.mxu3 %v1133_v0  ;;  %s1193_s20 = scalar_lea.vmem %s1466_s0, %s932_s17  ;;  %s1271_s25 = scalar_lea.vmem %s1469_s3, %s932_s17 }
   0xe   : > { %v1101_v1 = vld [vmem:[%s1193_s20] sm:$0xff]  ;;  %v1102_v5 = vld [vmem:[%s1193_s20 + $0x8] sm:$0xff]  ;;  %v1103_v9 = vld [vmem:[%s1193_s20 + $0x10] sm:$0xff] }
   0xf   : > { %v1109_v2 = vld [vmem:[%s1193_s20 + $0x40] sm:$0xff]  ;;  %1067 = vmatmul.msk.bf16.vlgmr.msra.gmra.mxu0 %vm411_vm0, %v1101_v1  ;;  %v1110_v6 = vld [vmem:[%s1193_s20 + $0x48] sm:$0xff]  ;;  %v1111_v10 = vld [vmem:[%s1193_s20 + $0x50] sm:$0xff] }
  0x10   : > { %v1117_v3 = vld [vmem:[%s1193_s20 + $0x80] sm:$0xff]  ;;  %1075 = vmatmul.msk.bf16.vlgmr.msra.gmra.mxu1 %vm411_vm0, %v1109_v2  ;;  %v1118_v7 = vld [vmem:[%s1193_s20 + $0x88] sm:$0xff]  ;;  %v1119_v11 = vld [vmem:[%s1193_s20 + $0x90] sm:$0xff] }
  0x11   : > { %v1125_v4 = vld [vmem:[%s1193_s20 + $0xc0] sm:$0xff]  ;;  %1083 = vmatmul.msk.bf16.vlgmr.msra.gmra.mxu2 %vm411_vm0, %v1117_v3  ;;  %v1126_v8 = vld [vmem:[%s1193_s20 + $0xc8] sm:$0xff]  ;;  %v1127_v12 = vld [vmem:[%s1193_s20 + $0xd0] sm:$0xff] }
  0x12   : > { %1091 = vmatmul.msk.bf16.vlgmr.msra.gmra.mxu3 %vm411_vm0, %v1125_v4  ;;  %v1104_v13 = vld [vmem:[%s1193_s20 + $0x18] sm:$0xff]  ;;  %v1105_v17 = vld [vmem:[%s1193_s20 + $0x20] sm:$0xff]  ;;  %v1106_v21 = vld [vmem:[%s1193_s20 + $0x28] sm:$0xff] }
  0x13   : > { %v1112_v14 = vld [vmem:[%s1193_s20 + $0x58] sm:$0xff]  ;;  %v1113_v18 = vld [vmem:[%s1193_s20 + $0x60] sm:$0xff]  ;;  %v1114_v22 = vld [vmem:[%s1193_s20 + $0x68] sm:$0xff] }
  0x14   : > { %v1120_v15 = vld [vmem:[%s1193_s20 + $0x98] sm:$0xff]  ;;  %v1121_v19 = vld [vmem:[%s1193_s20 + $0xa0] sm:$0xff]  ;;  %v1122_v23 = vld [vmem:[%s1193_s20 + $0xa8] sm:$0xff] }
  0x15   : > { %v1128_v16 = vld [vmem:[%s1193_s20 + $0xd8] sm:$0xff]  ;;  %v1129_v20 = vld [vmem:[%s1193_s20 + $0xe0] sm:$0xff]  ;;  %v1130_v24 = vld [vmem:[%s1193_s20 + $0xe8] sm:$0xff] }
  0x16   : > { %v1107_v25 = vld [vmem:[%s1193_s20 + $0x30] sm:$0xff]  ;;  %v1108_v29 = vld [vmem:[%s1193_s20 + $0x38] sm:$0xff] }
  0x17   : > { %v1115_v26 = vld [vmem:[%s1193_s20 + $0x70] sm:$0xff]  ;;  %v1116_v30 = vld [vmem:[%s1193_s20 + $0x78] sm:$0xff] }
  0x18   : > { %v1123_v27 = vld [vmem:[%s1193_s20 + $0xb0] sm:$0xff]  ;;  %v1124_v31 = vld [vmem:[%s1193_s20 + $0xb8] sm:$0xff] }
  0x19   : > { %v1131_v28 = vld [vmem:[%s1193_s20 + $0xf0] sm:$0xff]  ;;  %v1132_v32 = vld [vmem:[%s1193_s20 + $0xf8] sm:$0xff] }
  0x1f   : > { %1068 = vmatmul.msk.bf16.gmra.mxu0 %vm411_vm0, %v1102_v5 }
  0x20   : > { %1076 = vmatmul.msk.bf16.gmra.mxu1 %vm411_vm0, %v1110_v6 }
  0x21   : > { %1084 = vmatmul.msk.bf16.gmra.mxu2 %vm411_vm0, %v1118_v7 }
  0x22   : > { %1092 = vmatmul.msk.bf16.gmra.mxu3 %vm411_vm0, %v1126_v8 }
  0x2f   : > { %1069 = vmatmul.msk.bf16.gmra.mxu0 %vm411_vm0, %v1103_v9 }
  0x30   : > { %1077 = vmatmul.msk.bf16.gmra.mxu1 %vm411_vm0, %v1111_v10 }
  0x31   : > { %1085 = vmatmul.msk.bf16.gmra.mxu2 %vm411_vm0, %v1119_v11 }
  0x32   : > { %1093 = vmatmul.msk.bf16.gmra.mxu3 %vm411_vm0, %v1127_v12 }
  0x3f   : > { %1070 = vmatmul.msk.bf16.gmra.mxu0 %vm411_vm0, %v1104_v13 }
  0x40   : > { %1078 = vmatmul.msk.bf16.gmra.mxu1 %vm411_vm0, %v1112_v14 }
  0x41   : > { %1086 = vmatmul.msk.bf16.gmra.mxu2 %vm411_vm0, %v1120_v15 }
  0x42   : > { %1094 = vmatmul.msk.bf16.gmra.mxu3 %vm411_vm0, %v1128_v16 }
  0x4f   : > { %1071 = vmatmul.msk.bf16.gmra.mxu0 %vm411_vm0, %v1105_v17 }
  0x50   : > { %1079 = vmatmul.msk.bf16.gmra.mxu1 %vm411_vm0, %v1113_v18 }
  0x51   : > { %1087 = vmatmul.msk.bf16.gmra.mxu2 %vm411_vm0, %v1121_v19 }
  0x52   : > { %1095 = vmatmul.msk.bf16.gmra.mxu3 %vm411_vm0, %v1129_v20 }
  0x5f   : > { %1072 = vmatmul.msk.bf16.gmra.mxu0 %vm411_vm0, %v1106_v21 }
  0x60   : > { %1080 = vmatmul.msk.bf16.gmra.mxu1 %vm411_vm0, %v1114_v22 }
  0x61   : > { %1088 = vmatmul.msk.bf16.gmra.mxu2 %vm411_vm0, %v1122_v23 }
  0x62   : > { %1096 = vmatmul.msk.bf16.gmra.mxu3 %vm411_vm0, %v1130_v24 }
  0x6f   : > { %1073 = vmatmul.msk.bf16.gmra.mxu0 %vm411_vm0, %v1107_v25 }
  0x70   : > { %1081 = vmatmul.msk.bf16.gmra.mxu1 %vm411_vm0, %v1115_v26 }
  0x71   : > { %1089 = vmatmul.msk.bf16.gmra.mxu2 %vm411_vm0, %v1123_v27 }
  0x72   : > { %1097 = vmatmul.msk.bf16.gmra.mxu3 %vm411_vm0, %v1131_v28 }
  0x7f   : > { %1074 = vmatmul.msk.bf16.gmra.mxu0 %vm411_vm0, %v1108_v29 }
  0x80   : > { %1082 = vmatmul.msk.bf16.gmra.mxu1 %vm411_vm0, %v1116_v30 }
  0x81   : > { %1090 = vmatmul.msk.bf16.gmra.mxu2 %vm411_vm0, %v1124_v31 }
  0x82   : > { %1098 = vmatmul.msk.bf16.gmra.mxu3 %vm411_vm0, %v1132_v32 }
  0x8c   : > { %v517_v34 = vpop.f32.mrf.mxu0 }
  0x8d   : > { %v557_v35 = vpop.f32.mrf.mxu1  ;;  %v518_v36 = vadd.f32 %v1262_v33, %v517_v34 }
  0x8e   : > { %v558_v37 = vadd.f32 %v1262_v33, %v557_v35 }
  0x8f   : > { %v677_v38 = vmax.f32 %v518_v36, 0.0 }
  0x90   : > { %v693_v39 = vmax.f32 %v558_v37, 0.0 }
  0x91   : > { %v741_v40 = vpack.c.bf16 %v677_v38, %v677_v38 }
  0x92   : > { %v757_v41 = vpack.c.bf16 %v693_v39, %v693_v39 }
  0x93   : > { %806 = vst.msk [vmem:[%s1271_s25] sm:$0xf] %vm805_vm1, %v741_v40 }
  0x94   : > { %v597_v42 = vpop.f32.mrf.mxu2  ;;  %822 = vst.msk [vmem:[%s1271_s25 + $0x40] sm:$0xf] %vm805_vm1, %v757_v41  ;;  %v519_v46 = vpop.f32.mrf.mxu0 }
  0x95   : > { %v637_v43 = vpop.f32.mrf.mxu3  ;;  %v598_v44 = vadd.f32 %v1262_v33, %v597_v42  ;;  %v559_v47 = vpop.f32.mrf.mxu1  ;;  %v520_v48 = vadd.f32 %v1262_v33, %v519_v46 }
  0x96   : > { %v638_v45 = vadd.f32 %v1262_v33, %v637_v43  ;;  %v560_v49 = vadd.f32 %v1262_v33, %v559_v47 }
  0x97   : > { %v709_v50 = vmax.f32 %v598_v44, 0.0  ;;  %v678_v52 = vmax.f32 %v520_v48, 0.0 }
  0x98   : > { %v725_v51 = vmax.f32 %v638_v45, 0.0  ;;  %v694_v53 = vmax.f32 %v560_v49, 0.0 }
  0x99   : > { %v773_v54 = vpack.c.bf16 %v709_v50, %v709_v50  ;;  %v742_v56 = vpack.c.bf16 %v678_v52, %v678_v52 }
  0x9a   : > { %v789_v55 = vpack.c.bf16 %v725_v51, %v725_v51  ;;  %v758_v57 = vpack.c.bf16 %v694_v53, %v694_v53 }
  0x9b   : > { %838 = vst.msk [vmem:[%s1271_s25 + $0x80] sm:$0xf] %vm805_vm1, %v773_v54 }
  0x9c   : > { %854 = vst.msk [vmem:[%s1271_s25 + $0xc0] sm:$0xf] %vm805_vm1, %v789_v55  ;;  %v599_v58 = vpop.f32.mrf.mxu2  ;;  %v522_v62 = vpop.f32.mrf.mxu0 }
  0x9d   : > { %v639_v59 = vpop.f32.mrf.mxu3  ;;  %807 = vst.msk [vmem:[%s1271_s25 + $0x4] sm:$0xf] %vm805_vm1, %v742_v56  ;;  %v600_v60 = vadd.f32 %v1262_v33, %v599_v58  ;;  %v562_v63 = vpop.f32.mrf.mxu1  ;;  %v523_v0 = vadd.f32 %v1262_v33, %v522_v62 }
  0x9e   : > { %v640_v61 = vadd.f32 %v1262_v33, %v639_v59  ;;  %823 = vst.msk [vmem:[%s1271_s25 + $0x44] sm:$0xf] %vm805_vm1, %v758_v57  ;;  %v563_v1 = vadd.f32 %v1262_v33, %v562_v63 }
  0x9f   : > { %v710_v2 = vmax.f32 %v600_v60, 0.0  ;;  %v679_v4 = vmax.f32 %v523_v0, 0.0 }
  0xa0   : > { %v726_v3 = vmax.f32 %v640_v61, 0.0  ;;  %v695_v5 = vmax.f32 %v563_v1, 0.0 }
  0xa1   : > { %v774_v6 = vpack.c.bf16 %v710_v2, %v710_v2  ;;  %v743_v8 = vpack.c.bf16 %v679_v4, %v679_v4 }
  0xa2   : > { %v790_v7 = vpack.c.bf16 %v726_v3, %v726_v3  ;;  %v759_v9 = vpack.c.bf16 %v695_v5, %v695_v5 }
  0xa3   : > { %839 = vst.msk [vmem:[%s1271_s25 + $0x84] sm:$0xf] %vm805_vm1, %v774_v6 }
  0xa4   : > { %855 = vst.msk [vmem:[%s1271_s25 + $0xc4] sm:$0xf] %vm805_vm1, %v790_v7  ;;  %v602_v10 = vpop.f32.mrf.mxu2  ;;  %v524_v14 = vpop.f32.mrf.mxu0 }
  0xa5   : > { %v642_v11 = vpop.f32.mrf.mxu3  ;;  %808 = vst.msk [vmem:[%s1271_s25 + $0x8] sm:$0xf] %vm805_vm1, %v743_v8  ;;  %v603_v12 = vadd.f32 %v1262_v33, %v602_v10  ;;  %v564_v15 = vpop.f32.mrf.mxu1  ;;  %v525_v16 = vadd.f32 %v1262_v33, %v524_v14 }
  0xa6   : > { %v643_v13 = vadd.f32 %v1262_v33, %v642_v11  ;;  %824 = vst.msk [vmem:[%s1271_s25 + $0x48] sm:$0xf] %vm805_vm1, %v759_v9  ;;  %v565_v17 = vadd.f32 %v1262_v33, %v564_v15 }
  0xa7   : > { %v711_v18 = vmax.f32 %v603_v12, 0.0  ;;  %v680_v20 = vmax.f32 %v525_v16, 0.0 }
  0xa8   : > { %v727_v19 = vmax.f32 %v643_v13, 0.0  ;;  %v696_v21 = vmax.f32 %v565_v17, 0.0 }
  0xa9   : > { %v775_v22 = vpack.c.bf16 %v711_v18, %v711_v18  ;;  %v744_v24 = vpack.c.bf16 %v680_v20, %v680_v20 }
  0xaa   : > { %v791_v23 = vpack.c.bf16 %v727_v19, %v727_v19  ;;  %v760_v25 = vpack.c.bf16 %v696_v21, %v696_v21 }
  0xab   : > { %840 = vst.msk [vmem:[%s1271_s25 + $0x88] sm:$0xf] %vm805_vm1, %v775_v22 }
  0xac   : > { %856 = vst.msk [vmem:[%s1271_s25 + $0xc8] sm:$0xf] %vm805_vm1, %v791_v23  ;;  %v604_v26 = vpop.f32.mrf.mxu2  ;;  %v527_v30 = vpop.f32.mrf.mxu0 }
  0xad   : > { %v644_v27 = vpop.f32.mrf.mxu3  ;;  %809 = vst.msk [vmem:[%s1271_s25 + $0xc] sm:$0xf] %vm805_vm1, %v744_v24  ;;  %v605_v28 = vadd.f32 %v1262_v33, %v604_v26  ;;  %v567_v31 = vpop.f32.mrf.mxu1  ;;  %v528_v32 = vadd.f32 %v1262_v33, %v527_v30 }
  0xae   : > { %v645_v29 = vadd.f32 %v1262_v33, %v644_v27  ;;  %825 = vst.msk [vmem:[%s1271_s25 + $0x4c] sm:$0xf] %vm805_vm1, %v760_v25  ;;  %v568_v34 = vadd.f32 %v1262_v33, %v567_v31 }
  0xaf   : > { %v712_v35 = vmax.f32 %v605_v28, 0.0  ;;  %v681_v37 = vmax.f32 %v528_v32, 0.0 }
  0xb0   : > { %v728_v36 = vmax.f32 %v645_v29, 0.0  ;;  %v697_v38 = vmax.f32 %v568_v34, 0.0 }
  0xb1   : > { %v776_v39 = vpack.c.bf16 %v712_v35, %v712_v35  ;;  %v745_v41 = vpack.c.bf16 %v681_v37, %v681_v37 }
  0xb2   : > { %v792_v40 = vpack.c.bf16 %v728_v36, %v728_v36  ;;  %v761_v42 = vpack.c.bf16 %v697_v38, %v697_v38 }
  0xb3   : > { %841 = vst.msk [vmem:[%s1271_s25 + $0x8c] sm:$0xf] %vm805_vm1, %v776_v39 }
  0xb4   : > { %857 = vst.msk [vmem:[%s1271_s25 + $0xcc] sm:$0xf] %vm805_vm1, %v792_v40  ;;  %v607_v43 = vpop.f32.mrf.mxu2  ;;  %v529_v47 = vpop.f32.mrf.mxu0 }
  0xb5   : > { %v647_v44 = vpop.f32.mrf.mxu3  ;;  %810 = vst.msk [vmem:[%s1271_s25 + $0x10] sm:$0xf] %vm805_vm1, %v745_v41  ;;  %v608_v45 = vadd.f32 %v1262_v33, %v607_v43  ;;  %v569_v48 = vpop.f32.mrf.mxu1  ;;  %v530_v49 = vadd.f32 %v1262_v33, %v529_v47 }
  0xb6   : > { %v648_v46 = vadd.f32 %v1262_v33, %v647_v44  ;;  %826 = vst.msk [vmem:[%s1271_s25 + $0x50] sm:$0xf] %vm805_vm1, %v761_v42  ;;  %v570_v50 = vadd.f32 %v1262_v33, %v569_v48 }
  0xb7   : > { %v713_v51 = vmax.f32 %v608_v45, 0.0  ;;  %v682_v53 = vmax.f32 %v530_v49, 0.0 }
  0xb8   : > { %v729_v52 = vmax.f32 %v648_v46, 0.0  ;;  %v698_v54 = vmax.f32 %v570_v50, 0.0 }
  0xb9   : > { %v777_v55 = vpack.c.bf16 %v713_v51, %v713_v51  ;;  %v746_v57 = vpack.c.bf16 %v682_v53, %v682_v53 }
  0xba   : > { %v793_v56 = vpack.c.bf16 %v729_v52, %v729_v52  ;;  %v762_v58 = vpack.c.bf16 %v698_v54, %v698_v54 }
  0xbb   : > { %842 = vst.msk [vmem:[%s1271_s25 + $0x90] sm:$0xf] %vm805_vm1, %v777_v55 }
  0xbc   : > { %858 = vst.msk [vmem:[%s1271_s25 + $0xd0] sm:$0xf] %vm805_vm1, %v793_v56  ;;  %v609_v59 = vpop.f32.mrf.mxu2  ;;  %v532_v63 = vpop.f32.mrf.mxu0 }
  0xbd   : > { %v649_v60 = vpop.f32.mrf.mxu3  ;;  %811 = vst.msk [vmem:[%s1271_s25 + $0x14] sm:$0xf] %vm805_vm1, %v746_v57  ;;  %v610_v61 = vadd.f32 %v1262_v33, %v609_v59  ;;  %v572_v0 = vpop.f32.mrf.mxu1  ;;  %v533_v1 = vadd.f32 %v1262_v33, %v532_v63 }
  0xbe   : > { %v650_v62 = vadd.f32 %v1262_v33, %v649_v60  ;;  %827 = vst.msk [vmem:[%s1271_s25 + $0x54] sm:$0xf] %vm805_vm1, %v762_v58  ;;  %v573_v2 = vadd.f32 %v1262_v33, %v572_v0 }
  0xbf   : > { %v714_v3 = vmax.f32 %v610_v61, 0.0  ;;  %v683_v5 = vmax.f32 %v533_v1, 0.0 }
  0xc0   : > { %v730_v4 = vmax.f32 %v650_v62, 0.0  ;;  %v699_v6 = vmax.f32 %v573_v2, 0.0 }
  0xc1   : > { %v778_v7 = vpack.c.bf16 %v714_v3, %v714_v3  ;;  %v747_v9 = vpack.c.bf16 %v683_v5, %v683_v5 }
  0xc2   : > { %v794_v8 = vpack.c.bf16 %v730_v4, %v730_v4  ;;  %v763_v10 = vpack.c.bf16 %v699_v6, %v699_v6 }
  0xc3   : > { %843 = vst.msk [vmem:[%s1271_s25 + $0x94] sm:$0xf] %vm805_vm1, %v778_v7 }
  0xc4   : > { %859 = vst.msk [vmem:[%s1271_s25 + $0xd4] sm:$0xf] %vm805_vm1, %v794_v8  ;;  %v612_v11 = vpop.f32.mrf.mxu2  ;;  %v534_v15 = vpop.f32.mrf.mxu0 }
  0xc5   : > { %v652_v12 = vpop.f32.mrf.mxu3  ;;  %812 = vst.msk [vmem:[%s1271_s25 + $0x18] sm:$0xf] %vm805_vm1, %v747_v9  ;;  %v613_v13 = vadd.f32 %v1262_v33, %v612_v11  ;;  %v574_v16 = vpop.f32.mrf.mxu1  ;;  %v535_v17 = vadd.f32 %v1262_v33, %v534_v15 }
  0xc6   : > { %v653_v14 = vadd.f32 %v1262_v33, %v652_v12  ;;  %828 = vst.msk [vmem:[%s1271_s25 + $0x58] sm:$0xf] %vm805_vm1, %v763_v10  ;;  %v575_v18 = vadd.f32 %v1262_v33, %v574_v16 }
  0xc7   : > { %v715_v19 = vmax.f32 %v613_v13, 0.0  ;;  %v684_v21 = vmax.f32 %v535_v17, 0.0 }
  0xc8   : > { %v731_v20 = vmax.f32 %v653_v14, 0.0  ;;  %v700_v22 = vmax.f32 %v575_v18, 0.0 }
  0xc9   : > { %v779_v23 = vpack.c.bf16 %v715_v19, %v715_v19  ;;  %v748_v25 = vpack.c.bf16 %v684_v21, %v684_v21 }
  0xca   : > { %v795_v24 = vpack.c.bf16 %v731_v20, %v731_v20  ;;  %v764_v26 = vpack.c.bf16 %v700_v22, %v700_v22 }
  0xcb   : > { %844 = vst.msk [vmem:[%s1271_s25 + $0x98] sm:$0xf] %vm805_vm1, %v779_v23 }
  0xcc   : > { %860 = vst.msk [vmem:[%s1271_s25 + $0xd8] sm:$0xf] %vm805_vm1, %v795_v24  ;;  %v614_v27 = vpop.f32.mrf.mxu2  ;;  %v537_v31 = vpop.f32.mrf.mxu0 }
  0xcd   : > { %v654_v28 = vpop.f32.mrf.mxu3  ;;  %813 = vst.msk [vmem:[%s1271_s25 + $0x1c] sm:$0xf] %vm805_vm1, %v748_v25  ;;  %v615_v29 = vadd.f32 %v1262_v33, %v614_v27  ;;  %v577_v32 = vpop.f32.mrf.mxu1  ;;  %v538_v34 = vadd.f32 %v1262_v33, %v537_v31 }
  0xce   : > { %v655_v30 = vadd.f32 %v1262_v33, %v654_v28  ;;  %829 = vst.msk [vmem:[%s1271_s25 + $0x5c] sm:$0xf] %vm805_vm1, %v764_v26  ;;  %v578_v35 = vadd.f32 %v1262_v33, %v577_v32 }
  0xcf   : > { %v716_v36 = vmax.f32 %v615_v29, 0.0  ;;  %v685_v38 = vmax.f32 %v538_v34, 0.0 }
  0xd0   : > { %v732_v37 = vmax.f32 %v655_v30, 0.0  ;;  %v701_v39 = vmax.f32 %v578_v35, 0.0 }
  0xd1   : > { %v780_v40 = vpack.c.bf16 %v716_v36, %v716_v36  ;;  %v749_v42 = vpack.c.bf16 %v685_v38, %v685_v38 }
  0xd2   : > { %v796_v41 = vpack.c.bf16 %v732_v37, %v732_v37  ;;  %v765_v43 = vpack.c.bf16 %v701_v39, %v701_v39 }
  0xd3   : > { %845 = vst.msk [vmem:[%s1271_s25 + $0x9c] sm:$0xf] %vm805_vm1, %v780_v40 }
  0xd4   : > { %861 = vst.msk [vmem:[%s1271_s25 + $0xdc] sm:$0xf] %vm805_vm1, %v796_v41  ;;  %v617_v44 = vpop.f32.mrf.mxu2  ;;  %v539_v48 = vpop.f32.mrf.mxu0 }
  0xd5   : > { %v657_v45 = vpop.f32.mrf.mxu3  ;;  %814 = vst.msk [vmem:[%s1271_s25 + $0x20] sm:$0xf] %vm805_vm1, %v749_v42  ;;  %v618_v46 = vadd.f32 %v1262_v33, %v617_v44  ;;  %v579_v49 = vpop.f32.mrf.mxu1  ;;  %v540_v50 = vadd.f32 %v1262_v33, %v539_v48 }
  0xd6   : > { %v658_v47 = vadd.f32 %v1262_v33, %v657_v45  ;;  %830 = vst.msk [vmem:[%s1271_s25 + $0x60] sm:$0xf] %vm805_vm1, %v765_v43  ;;  %v580_v51 = vadd.f32 %v1262_v33, %v579_v49 }
  0xd7   : > { %v717_v52 = vmax.f32 %v618_v46, 0.0  ;;  %v686_v54 = vmax.f32 %v540_v50, 0.0 }
  0xd8   : > { %v733_v53 = vmax.f32 %v658_v47, 0.0  ;;  %v702_v55 = vmax.f32 %v580_v51, 0.0 }
  0xd9   : > { %v781_v56 = vpack.c.bf16 %v717_v52, %v717_v52  ;;  %v750_v58 = vpack.c.bf16 %v686_v54, %v686_v54 }
  0xda   : > { %v797_v57 = vpack.c.bf16 %v733_v53, %v733_v53  ;;  %v766_v59 = vpack.c.bf16 %v702_v55, %v702_v55 }
  0xdb   : > { %846 = vst.msk [vmem:[%s1271_s25 + $0xa0] sm:$0xf] %vm805_vm1, %v781_v56 }
  0xdc   : > { %862 = vst.msk [vmem:[%s1271_s25 + $0xe0] sm:$0xf] %vm805_vm1, %v797_v57  ;;  %v619_v60 = vpop.f32.mrf.mxu2  ;;  %v542_v0 = vpop.f32.mrf.mxu0 }
  0xdd   : > { %v659_v61 = vpop.f32.mrf.mxu3  ;;  %815 = vst.msk [vmem:[%s1271_s25 + $0x24] sm:$0xf] %vm805_vm1, %v750_v58  ;;  %v620_v62 = vadd.f32 %v1262_v33, %v619_v60  ;;  %v582_v1 = vpop.f32.mrf.mxu1  ;;  %v543_v2 = vadd.f32 %v1262_v33, %v542_v0 }
  0xde   : > { %v660_v63 = vadd.f32 %v1262_v33, %v659_v61  ;;  %831 = vst.msk [vmem:[%s1271_s25 + $0x64] sm:$0xf] %vm805_vm1, %v766_v59  ;;  %v583_v3 = vadd.f32 %v1262_v33, %v582_v1 }
  0xdf   : > { %v718_v4 = vmax.f32 %v620_v62, 0.0  ;;  %v687_v6 = vmax.f32 %v543_v2, 0.0 }
  0xe0   : > { %v734_v5 = vmax.f32 %v660_v63, 0.0  ;;  %v703_v7 = vmax.f32 %v583_v3, 0.0 }
  0xe1   : > { %v782_v8 = vpack.c.bf16 %v718_v4, %v718_v4  ;;  %v751_v10 = vpack.c.bf16 %v687_v6, %v687_v6 }
  0xe2   : > { %v798_v9 = vpack.c.bf16 %v734_v5, %v734_v5  ;;  %v767_v11 = vpack.c.bf16 %v703_v7, %v703_v7 }
  0xe3   : > { %847 = vst.msk [vmem:[%s1271_s25 + $0xa4] sm:$0xf] %vm805_vm1, %v782_v8 }
  0xe4   : > { %863 = vst.msk [vmem:[%s1271_s25 + $0xe4] sm:$0xf] %vm805_vm1, %v798_v9  ;;  %v622_v12 = vpop.f32.mrf.mxu2  ;;  %v544_v16 = vpop.f32.mrf.mxu0 }
  0xe5   : > { %v662_v13 = vpop.f32.mrf.mxu3  ;;  %816 = vst.msk [vmem:[%s1271_s25 + $0x28] sm:$0xf] %vm805_vm1, %v751_v10  ;;  %v623_v14 = vadd.f32 %v1262_v33, %v622_v12  ;;  %v584_v17 = vpop.f32.mrf.mxu1  ;;  %v545_v18 = vadd.f32 %v1262_v33, %v544_v16 }
  0xe6   : > { %v663_v15 = vadd.f32 %v1262_v33, %v662_v13  ;;  %832 = vst.msk [vmem:[%s1271_s25 + $0x68] sm:$0xf] %vm805_vm1, %v767_v11  ;;  %v585_v19 = vadd.f32 %v1262_v33, %v584_v17 }
  0xe7   : > { %v719_v20 = vmax.f32 %v623_v14, 0.0  ;;  %v688_v22 = vmax.f32 %v545_v18, 0.0 }
  0xe8   : > { %v735_v21 = vmax.f32 %v663_v15, 0.0  ;;  %v704_v23 = vmax.f32 %v585_v19, 0.0 }
  0xe9   : > { %v783_v24 = vpack.c.bf16 %v719_v20, %v719_v20  ;;  %v752_v26 = vpack.c.bf16 %v688_v22, %v688_v22 }
  0xea   : > { %v799_v25 = vpack.c.bf16 %v735_v21, %v735_v21  ;;  %v768_v27 = vpack.c.bf16 %v704_v23, %v704_v23 }
  0xeb   : > { %848 = vst.msk [vmem:[%s1271_s25 + $0xa8] sm:$0xf] %vm805_vm1, %v783_v24 }
  0xec   : > { %864 = vst.msk [vmem:[%s1271_s25 + $0xe8] sm:$0xf] %vm805_vm1, %v799_v25  ;;  %v624_v28 = vpop.f32.mrf.mxu2  ;;  %v547_v32 = vpop.f32.mrf.mxu0 }
  0xed   : > { %v664_v29 = vpop.f32.mrf.mxu3  ;;  %817 = vst.msk [vmem:[%s1271_s25 + $0x2c] sm:$0xf] %vm805_vm1, %v752_v26  ;;  %v625_v30 = vadd.f32 %v1262_v33, %v624_v28  ;;  %v587_v34 = vpop.f32.mrf.mxu1  ;;  %v548_v35 = vadd.f32 %v1262_v33, %v547_v32 }
  0xee   : > { %v665_v31 = vadd.f32 %v1262_v33, %v664_v29  ;;  %833 = vst.msk [vmem:[%s1271_s25 + $0x6c] sm:$0xf] %vm805_vm1, %v768_v27  ;;  %v588_v36 = vadd.f32 %v1262_v33, %v587_v34 }
  0xef   : > { %v720_v37 = vmax.f32 %v625_v30, 0.0  ;;  %v689_v39 = vmax.f32 %v548_v35, 0.0 }
  0xf0   : > { %v736_v38 = vmax.f32 %v665_v31, 0.0  ;;  %v705_v40 = vmax.f32 %v588_v36, 0.0 }
  0xf1   : > { %v784_v41 = vpack.c.bf16 %v720_v37, %v720_v37  ;;  %v753_v43 = vpack.c.bf16 %v689_v39, %v689_v39 }
  0xf2   : > { %v800_v42 = vpack.c.bf16 %v736_v38, %v736_v38  ;;  %v769_v44 = vpack.c.bf16 %v705_v40, %v705_v40 }
  0xf3   : > { %849 = vst.msk [vmem:[%s1271_s25 + $0xac] sm:$0xf] %vm805_vm1, %v784_v41 }
  0xf4   : > { %865 = vst.msk [vmem:[%s1271_s25 + $0xec] sm:$0xf] %vm805_vm1, %v800_v42  ;;  %v627_v45 = vpop.f32.mrf.mxu2  ;;  %v549_v49 = vpop.f32.mrf.mxu0 }
  0xf5   : > { %v667_v46 = vpop.f32.mrf.mxu3  ;;  %818 = vst.msk [vmem:[%s1271_s25 + $0x30] sm:$0xf] %vm805_vm1, %v753_v43  ;;  %v628_v47 = vadd.f32 %v1262_v33, %v627_v45  ;;  %v589_v50 = vpop.f32.mrf.mxu1  ;;  %v550_v51 = vadd.f32 %v1262_v33, %v549_v49 }
  0xf6   : > { %v668_v48 = vadd.f32 %v1262_v33, %v667_v46  ;;  %834 = vst.msk [vmem:[%s1271_s25 + $0x70] sm:$0xf] %vm805_vm1, %v769_v44  ;;  %v590_v52 = vadd.f32 %v1262_v33, %v589_v50 }
  0xf7   : > { %v721_v53 = vmax.f32 %v628_v47, 0.0  ;;  %v690_v55 = vmax.f32 %v550_v51, 0.0 }
  0xf8   : > { %v737_v54 = vmax.f32 %v668_v48, 0.0  ;;  %v706_v56 = vmax.f32 %v590_v52, 0.0 }
  0xf9   : > { %v785_v57 = vpack.c.bf16 %v721_v53, %v721_v53  ;;  %v754_v59 = vpack.c.bf16 %v690_v55, %v690_v55 }
  0xfa   : > { %v801_v58 = vpack.c.bf16 %v737_v54, %v737_v54  ;;  %v770_v60 = vpack.c.bf16 %v706_v56, %v706_v56 }
  0xfb   : > { %850 = vst.msk [vmem:[%s1271_s25 + $0xb0] sm:$0xf] %vm805_vm1, %v785_v57 }
  0xfc   : > { %866 = vst.msk [vmem:[%s1271_s25 + $0xf0] sm:$0xf] %vm805_vm1, %v801_v58  ;;  %v629_v61 = vpop.f32.mrf.mxu2  ;;  %v552_v1 = vpop.f32.mrf.mxu0 }
  0xfd   : > { %v669_v62 = vpop.f32.mrf.mxu3  ;;  %819 = vst.msk [vmem:[%s1271_s25 + $0x34] sm:$0xf] %vm805_vm1, %v754_v59  ;;  %v630_v63 = vadd.f32 %v1262_v33, %v629_v61  ;;  %v592_v2 = vpop.f32.mrf.mxu1  ;;  %v553_v3 = vadd.f32 %v1262_v33, %v552_v1 }
  0xfe   : > { %v670_v0 = vadd.f32 %v1262_v33, %v669_v62  ;;  %835 = vst.msk [vmem:[%s1271_s25 + $0x74] sm:$0xf] %vm805_vm1, %v770_v60  ;;  %v593_v4 = vadd.f32 %v1262_v33, %v592_v2 }
  0xff   : > { %v722_v5 = vmax.f32 %v630_v63, 0.0  ;;  %v691_v7 = vmax.f32 %v553_v3, 0.0 }
 0x100   : > { %v738_v6 = vmax.f32 %v670_v0, 0.0  ;;  %v707_v8 = vmax.f32 %v593_v4, 0.0 }
 0x101   : > { %v786_v9 = vpack.c.bf16 %v722_v5, %v722_v5  ;;  %v755_v11 = vpack.c.bf16 %v691_v7, %v691_v7 }
 0x102   : > { %v802_v10 = vpack.c.bf16 %v738_v6, %v738_v6  ;;  %v771_v12 = vpack.c.bf16 %v707_v8, %v707_v8 }
 0x103   : > { %851 = vst.msk [vmem:[%s1271_s25 + $0xb4] sm:$0xf] %vm805_vm1, %v786_v9 }
 0x104   : > { %867 = vst.msk [vmem:[%s1271_s25 + $0xf4] sm:$0xf] %vm805_vm1, %v802_v10  ;;  %v632_v13 = vpop.f32.mrf.mxu2  ;;  %v554_v17 = vpop.f32.mrf.mxu0 }
 0x105   : > { %v672_v14 = vpop.f32.mrf.mxu3  ;;  %820 = vst.msk [vmem:[%s1271_s25 + $0x38] sm:$0xf] %vm805_vm1, %v755_v11  ;;  %v633_v15 = vadd.f32 %v1262_v33, %v632_v13  ;;  %v594_v18 = vpop.f32.mrf.mxu1  ;;  %v555_v19 = vadd.f32 %v1262_v33, %v554_v17 }
 0x106   : > { %v673_v16 = vadd.f32 %v1262_v33, %v672_v14  ;;  %836 = vst.msk [vmem:[%s1271_s25 + $0x78] sm:$0xf] %vm805_vm1, %v771_v12  ;;  %v595_v20 = vadd.f32 %v1262_v33, %v594_v18 }
 0x107   : > { %v723_v21 = vmax.f32 %v633_v15, 0.0  ;;  %v692_v23 = vmax.f32 %v555_v19, 0.0 }
 0x108   : > { %v739_v22 = vmax.f32 %v673_v16, 0.0  ;;  %v708_v24 = vmax.f32 %v595_v20, 0.0 }
 0x109   : > { %v787_v25 = vpack.c.bf16 %v723_v21, %v723_v21  ;;  %v756_v27 = vpack.c.bf16 %v692_v23, %v692_v23 }
 0x10a   : > { %v803_v26 = vpack.c.bf16 %v739_v22, %v739_v22  ;;  %v772_v28 = vpack.c.bf16 %v708_v24, %v708_v24 }
 0x10b   : > { %852 = vst.msk [vmem:[%s1271_s25 + $0xb8] sm:$0xf] %vm805_vm1, %v787_v25 }
 0x10c   : > { %868 = vst.msk [vmem:[%s1271_s25 + $0xf8] sm:$0xf] %vm805_vm1, %v803_v26  ;;  %v634_v29 = vpop.f32.mrf.mxu2 }
 0x10d   : > { %v674_v30 = vpop.f32.mrf.mxu3  ;;  %821 = vst.msk [vmem:[%s1271_s25 + $0x3c] sm:$0xf] %vm805_vm1, %v756_v27  ;;  %v635_v31 = vadd.f32 %v1262_v33, %v634_v29 }
 0x10e   : > { %v675_v32 = vadd.f32 %v1262_v33, %v674_v30  ;;  %837 = vst.msk [vmem:[%s1271_s25 + $0x7c] sm:$0xf] %vm805_vm1, %v772_v28 }
 0x10f   : > { %v724_v34 = vmax.f32 %v635_v31, 0.0 }
 0x110   : > { %v740_v35 = vmax.f32 %v675_v32, 0.0 }
 0x111   : > { %v788_v36 = vpack.c.bf16 %v724_v34, %v724_v34 }
 0x112   : > { %v804_v37 = vpack.c.bf16 %v740_v35, %v740_v35 }
 0x113   : > { %853 = vst.msk [vmem:[%s1271_s25 + $0xbc] sm:$0xf] %vm805_vm1, %v788_v36 }
 0x114   : > { %869 = vst.msk [vmem:[%s1271_s25 + $0xfc] sm:$0xf] %vm805_vm1, %v804_v37 }
 0x115 PF: > { %s13_s12 = sadd.s32 1, %s1152_s12  }
 0x116   : > { %p10_p4 = scmp.ge.s32.totalorder %s13_s12, 6  }
 0x118   :  { %12 = sbr.rel (!%p10_p4) target bundleno = 1 (0x1), region = 62 }

// kernel: base_encoder_forward.10
= control target key start
LH: loop header
LB: loop body
LE: loop exit
PB: predicated region body
PF: predicated region fallthrough
CT: control target
= control target key end

     0   :  { %s1090_s12 = smov 0   ;;  %s1329_s0 = inlined_call_operand.vmem [shape: bf16[512,144], index: 0, kind: input, shape index: {}]   ;;  %s1330_s1 = inlined_call_operand.vmem [shape: bf16[144,32], index: 1, kind: input, shape index: {}]   ;;  %s1331_s2 = inlined_call_operand.vmem [shape: f32[1,32], index: 2, kind: input, shape index: {}]   ;;  %s1332_s3 = inlined_call_operand.vmem [shape: bf16[512,32], index: 3, kind: output, shape index: {}]  }
   0x1 LB: > { %s810_s13 = sadd.s32 4294967295, %s1068_s12   ;;  %p814_p0 = scmp.ge.s32.totalorder %s1068_s12, 1  ;;  %s1068_s12 = sphi %s1090_s12, %s13_s12  }
   0x2   : > { %p139_p1 = scmp.lt.s32.totalorder %s1068_s12, 3 }
   0x4   : > { %p140_p2 = pnand %p814_p0, %p139_p1 }
   0x5   : > { %s815_s18 = sshll.u32 (!%p140_p2), %s810_s13, 5 }
   0x6   : > { %143 = sbr.rel (%p140_p2) target bundleno = 304 (0x130), region = 32  ;;  %p165_p3 = scmp.lt.s32.totalorder (!%p140_p2), %s815_s18, 63 }
   0xb   : > { %v1042_v0 = vld [vmem:[%s1330_s1 + $0x38] sm:$0xff]  ;;  %v1043_v1 = vld [vmem:[%s1330_s1 + $0x40] sm:$0xff]  ;;  %v1041_v2 = vld [vmem:[%s1330_s1 + $0x30] sm:$0xff]  ;;  %s1334_s18 = smov (!%p165_p3, %s815_s18), 63  ;;  %vm430_vm0 = vcmask 130048   ;;  %vm721_vm1 = vcmask 257024  }
   0xc   : > { %479 = vmatpush.bf16.msra.mxu0 %v1042_v0  ;;  %1044 = vmatpush.bf16.msra.mxu2 %v1042_v0  ;;  %s1002_s21 = sshll.u32 %s1334_s18, 3  ;;  %v1040_v3 = vld [vmem:[%s1330_s1 + $0x28] sm:$0xff]  ;;  %v1039_v7 = vld [vmem:[%s1330_s1 + $0x20] sm:$0xff]  ;;  %v1038_v11 = vld [vmem:[%s1330_s1 + $0x18] sm:$0xff]  ;;  %s819_s13 = sshll.u32 %s1334_s18, 2 }
   0xd   : > { %575 = vmatpush.bf16.msra.mxu1 %v1043_v1  ;;  %1052 = vmatpush.bf16.msra.mxu3 %v1043_v1  ;;  %s1113_s24 = scalar_lea.vmem %s1329_s0, %s1002_s21  ;;  %v1037_v12 = vld [vmem:[%s1330_s1 + $0x10] sm:$0xff]  ;;  %v1036_v16 = vld [vmem:[%s1330_s1 + $0x8] sm:$0xff]  ;;  %v1035_v19 = vld [vmem:[%s1330_s1] sm:$0xff]  ;;  %s1223_s16 = scalar_lea.vmem %s1332_s3, %s819_s13 }
   0xe   : > { %v1003_v4 = vld [vmem:[%s1113_s24 + $0x4] sm:$0xf]  ;;  %v824_v5 = vld [vmem:[%s1113_s24 + $0x8] sm:$0xf0]  ;;  %v1021_v8 = vld [vmem:[%s1113_s24 + $0x94] sm:$0xf] }
   0xf   : > { %v827_v6 = vor.u32 %v1003_v4, %v824_v5  ;;  %v896_v9 = vld [vmem:[%s1113_s24 + $0x98] sm:$0xf0]  ;;  %v1005_v13 = vld [vmem:[%s1113_s24 + $0x14] sm:$0xf]  ;;  %v1023_v17 = vld [vmem:[%s1113_s24 + $0xa4] sm:$0xf] }
  0x10   : > { %480 = vmatpush.bf16.msra.mxu0 %v1041_v2  ;;  %1045 = vmatpush.bf16.msra.mxu2 %v1041_v2  ;;  %v899_v10 = vor.u32 %v1021_v8, %v896_v9  ;;  %v832_v14 = vld [vmem:[%s1113_s24 + $0x18] sm:$0xf0]  ;;  %v904_v18 = vld [vmem:[%s1113_s24 + $0xa8] sm:$0xf0]  ;;  %v822_v20 = vld [vmem:[%s1113_s24] sm:$0xf] }
  0x11   : > { %984 = vmatmul.msk.bf16.vlgmr.msra.gmra.mxu1 %vm430_vm0, %v827_v6  ;;  %v835_v15 = vor.u32 %v1005_v13, %v832_v14  ;;  %v1004_v21 = vld [vmem:[%s1113_s24 + $0x4] sm:$0xf0]  ;;  %v907_v22 = vor.u32 %v1023_v17, %v904_v18  ;;  %v886_v23 = vld [vmem:[%s1113_s24 + $0x80] sm:$0xf]  ;;  %v1007_v27 = vld [vmem:[%s1113_s24 + $0x24] sm:$0xf] }
  0x12   : > { %993 = vmatmul.msk.bf16.vlgmr.msra.gmra.mxu3 %vm430_vm0, %v899_v10  ;;  %v1020_v24 = vld [vmem:[%s1113_s24 + $0x84] sm:$0xf0]  ;;  %v823_v25 = vor.u32 %v1004_v21, %v822_v20  ;;  %v840_v28 = vld [vmem:[%s1113_s24 + $0x28] sm:$0xf0]  ;;  %v1025_v30 = vld [vmem:[%s1113_s24 + $0xb4] sm:$0xf] }
  0x13   : > { %v887_v26 = vor.u32 %v1020_v24, %v886_v23  ;;  %v843_v29 = vor.u32 %v1007_v27, %v840_v28  ;;  %v912_v31 = vld [vmem:[%s1113_s24 + $0xb8] sm:$0xf0]  ;;  %v830_v32 = vld [vmem:[%s1113_s24 + $0x10] sm:$0xf]  ;;  %v1006_v33 = vld [vmem:[%s1113_s24 + $0x14] sm:$0xf0] }
  0x14   : > { %481 = vmatpush.bf16.msra.mxu0 %v1040_v3  ;;  %1046 = vmatpush.bf16.msra.mxu2 %v1040_v3  ;;  %v915_v34 = vor.u32 %v1025_v30, %v912_v31  ;;  %v894_v35 = vld [vmem:[%s1113_s24 + $0x90] sm:$0xf]  ;;  %v1022_v36 = vld [vmem:[%s1113_s24 + $0x94] sm:$0xf0]  ;;  %v831_v37 = vor.u32 %v1006_v33, %v830_v32  ;;  %v1009_v39 = vld [vmem:[%s1113_s24 + $0x34] sm:$0xf] }
  0x15   : > { %v895_v38 = vor.u32 %v1022_v36, %v894_v35  ;;  %v848_v40 = vld [vmem:[%s1113_s24 + $0x38] sm:$0xf0]  ;;  %v1027_v42 = vld [vmem:[%s1113_s24 + $0xc4] sm:$0xf]  ;;  %v920_v43 = vld [vmem:[%s1113_s24 + $0xc8] sm:$0xf0] }
  0x16   : > { %v851_v41 = vor.u32 %v1009_v39, %v848_v40  ;;  %v838_v44 = vld [vmem:[%s1113_s24 + $0x20] sm:$0xf]  ;;  %v1008_v45 = vld [vmem:[%s1113_s24 + $0x24] sm:$0xf0]  ;;  %v923_v46 = vor.u32 %v1027_v42, %v920_v43  ;;  %v1011_v51 = vld [vmem:[%s1113_s24 + $0x44] sm:$0xf] }
  0x17   : > { %v902_v47 = vld [vmem:[%s1113_s24 + $0xa0] sm:$0xf]  ;;  %v1024_v48 = vld [vmem:[%s1113_s24 + $0xa4] sm:$0xf0]  ;;  %v839_v49 = vor.u32 %v1008_v45, %v838_v44  ;;  %v856_v52 = vld [vmem:[%s1113_s24 + $0x48] sm:$0xf0] }
  0x18   : > { %482 = vmatpush.bf16.msra.mxu0 %v1039_v7  ;;  %1047 = vmatpush.bf16.msra.mxu2 %v1039_v7  ;;  %v903_v50 = vor.u32 %v1024_v48, %v902_v47  ;;  %v859_v53 = vor.u32 %v1011_v51, %v856_v52  ;;  %v1029_v54 = vld [vmem:[%s1113_s24 + $0xd4] sm:$0xf]  ;;  %v928_v55 = vld [vmem:[%s1113_s24 + $0xd8] sm:$0xf0]  ;;  %v846_v56 = vld [vmem:[%s1113_s24 + $0x30] sm:$0xf] }
  0x19   : > { %v1010_v57 = vld [vmem:[%s1113_s24 + $0x34] sm:$0xf0]  ;;  %v931_v58 = vor.u32 %v1029_v54, %v928_v55  ;;  %v910_v59 = vld [vmem:[%s1113_s24 + $0xb0] sm:$0xf]  ;;  %v1013_v63 = vld [vmem:[%s1113_s24 + $0x54] sm:$0xf] }
  0x1a   : > { %v1026_v60 = vld [vmem:[%s1113_s24 + $0xb4] sm:$0xf0]  ;;  %v847_v61 = vor.u32 %v1010_v57, %v846_v56  ;;  %v864_v0 = vld [vmem:[%s1113_s24 + $0x58] sm:$0xf0]  ;;  %v1031_v2 = vld [vmem:[%s1113_s24 + $0xe4] sm:$0xf] }
  0x1b   : > { %v911_v62 = vor.u32 %v1026_v60, %v910_v59  ;;  %v867_v1 = vor.u32 %v1013_v63, %v864_v0  ;;  %v936_v3 = vld [vmem:[%s1113_s24 + $0xe8] sm:$0xf0]  ;;  %v854_v4 = vld [vmem:[%s1113_s24 + $0x40] sm:$0xf]  ;;  %v1012_v5 = vld [vmem:[%s1113_s24 + $0x44] sm:$0xf0] }
  0x1c   : > { %483 = vmatpush.bf16.msra.mxu0 %v1038_v11  ;;  %1048 = vmatpush.bf16.msra.mxu2 %v1038_v11  ;;  %v939_v6 = vor.u32 %v1031_v2, %v936_v3  ;;  %v918_v7 = vld [vmem:[%s1113_s24 + $0xc0] sm:$0xf]  ;;  %v1028_v8 = vld [vmem:[%s1113_s24 + $0xc4] sm:$0xf0]  ;;  %v855_v9 = vor.u32 %v1012_v5, %v854_v4  ;;  %v1015_v11 = vld [vmem:[%s1113_s24 + $0x64] sm:$0xf] }
  0x1d   : > { %v919_v10 = vor.u32 %v1028_v8, %v918_v7  ;;  %v1033_v14 = vld [vmem:[%s1113_s24 + $0xf4] sm:$0xf]  ;;  %v1014_v17 = vld [vmem:[%s1113_s24 + $0x54] sm:$0xf0]  ;;  %v880_v24 = vld [vmem:[%s1113_s24 + $0x78] sm:$0xf0] }
  0x1e   : > { %v1030_v20 = vld [vmem:[%s1113_s24 + $0xd4] sm:$0xf0]  ;;  %v1017_v23 = vld [vmem:[%s1113_s24 + $0x74] sm:$0xf]  ;;  %v1016_v27 = vld [vmem:[%s1113_s24 + $0x64] sm:$0xf0] }
  0x1f   : > { %v934_v28 = vld [vmem:[%s1113_s24 + $0xe0] sm:$0xf]  ;;  %v1019_v32 = vld [vmem:[%s1113_s24 + $0x84] sm:$0xf]  ;;  %v888_v33 = vld [vmem:[%s1113_s24 + $0x88] sm:$0xf0] }
  0x20   : > { %484 = vmatpush.bf16.msra.mxu0 %v1037_v12  ;;  %1049 = vmatpush.bf16.msra.mxu2 %v1037_v12  ;;  %v872_v12 = vld [vmem:[%s1113_s24 + $0x68] sm:$0xf0]  ;;  %v878_v36 = vld [vmem:[%s1113_s24 + $0x70] sm:$0xf]  ;;  %v1034_v39 = vld [vmem:[%s1113_s24 + $0xf4] sm:$0xf0] }
  0x21   : > { %985 = vmatmul.msk.bf16.gmra.mxu1 %vm430_vm0, %v835_v15  ;;  %v875_v13 = vor.u32 %v1015_v11, %v872_v12  ;;  %v944_v15 = vld [vmem:[%s1113_s24 + $0xf8] sm:$0xf0]  ;;  %v1216_v44 = vld [vmem:[%s1331_s2] ss:$0 sm:$0xff] }
  0x22   : > { %994 = vmatmul.msk.bf16.gmra.mxu3 %vm430_vm0, %v907_v22  ;;  %v947_v18 = vor.u32 %v1033_v14, %v944_v15 }
  0x24   : > { %485 = vmatpush.bf16.msra.mxu0 %v1036_v16  ;;  %1050 = vmatpush.bf16.msra.mxu2 %v1036_v16  ;;  %v862_v16 = vld [vmem:[%s1113_s24 + $0x50] sm:$0xf] }
  0x25   : > { %v863_v21 = vor.u32 %v1014_v17, %v862_v16 }
  0x28   : > { %486 = vmatpush.bf16.msra.mxu0 %v1035_v19  ;;  %1051 = vmatpush.bf16.msra.mxu2 %v1035_v19  ;;  %v926_v19 = vld [vmem:[%s1113_s24 + $0xd0] sm:$0xf] }
  0x29   : > { %v927_v22 = vor.u32 %v1030_v20, %v926_v19 }
  0x2b   : > { %487 = vmatmul.bf16.vlgmr.msra.gmra.mxu0 %v823_v25  ;;  %527 = vmatmul.bf16.vlgmr.msra.gmra.mxu2 %v887_v26  ;;  %v883_v25 = vor.u32 %v1017_v23, %v880_v24  ;;  %v870_v26 = vld [vmem:[%s1113_s24 + $0x60] sm:$0xf] }
  0x2c   : > { %v871_v30 = vor.u32 %v1016_v27, %v870_v26 }
  0x31   : > { %986 = vmatmul.msk.bf16.gmra.mxu1 %vm430_vm0, %v843_v29  ;;  %v1032_v29 = vld [vmem:[%s1113_s24 + $0xe4] sm:$0xf0] }
  0x32   : > { %995 = vmatmul.msk.bf16.gmra.mxu3 %vm430_vm0, %v915_v34  ;;  %v935_v31 = vor.u32 %v1032_v29, %v934_v28  ;;  %v891_v34 = vor.u32 %v1019_v32, %v888_v33 }
  0x3b   : > { %492 = vmatmul.bf16.gmra.mxu0 %v831_v37  ;;  %532 = vmatmul.bf16.gmra.mxu2 %v895_v38  ;;  %v1018_v37 = vld [vmem:[%s1113_s24 + $0x74] sm:$0xf0]  ;;  %v942_v38 = vld [vmem:[%s1113_s24 + $0xf0] sm:$0xf] }
  0x3c   : > { %v879_v40 = vor.u32 %v1018_v37, %v878_v36 }
  0x41   : > { %987 = vmatmul.msk.bf16.gmra.mxu1 %vm430_vm0, %v851_v41  ;;  %v943_v41 = vor.u32 %v1034_v39, %v942_v38 }
  0x42   : > { %996 = vmatmul.msk.bf16.gmra.mxu3 %vm430_vm0, %v923_v46 }
  0x4b   : > { %497 = vmatmul.bf16.gmra.mxu0 %v839_v49  ;;  %537 = vmatmul.bf16.gmra.mxu2 %v903_v50 }
  0x51   : > { %988 = vmatmul.msk.bf16.gmra.mxu1 %vm430_vm0, %v859_v53 }
  0x52   : > { %997 = vmatmul.msk.bf16.gmra.mxu3 %vm430_vm0, %v931_v58 }
  0x5b   : > { %502 = vmatmul.bf16.gmra.mxu0 %v847_v61  ;;  %542 = vmatmul.bf16.gmra.mxu2 %v911_v62 }
  0x61   : > { %989 = vmatmul.msk.bf16.gmra.mxu1 %vm430_vm0, %v867_v1 }
  0x62   : > { %998 = vmatmul.msk.bf16.gmra.mxu3 %vm430_vm0, %v939_v6 }
  0x6b   : > { %507 = vmatmul.bf16.gmra.mxu0 %v855_v9  ;;  %547 = vmatmul.bf16.gmra.mxu2 %v919_v10 }
  0x71   : > { %990 = vmatmul.msk.bf16.gmra.mxu1 %vm430_vm0, %v875_v13 }
  0x72   : > { %999 = vmatmul.msk.bf16.gmra.mxu3 %vm430_vm0, %v947_v18 }
  0x7b   : > { %512 = vmatmul.bf16.gmra.mxu0 %v863_v21  ;;  %552 = vmatmul.bf16.gmra.mxu2 %v927_v22 }
  0x81   : > { %991 = vmatmul.msk.bf16.gmra.mxu1 %vm430_vm0, %v883_v25 }
  0x8b   : > { %517 = vmatmul.bf16.gmra.mxu0 %v871_v30  ;;  %557 = vmatmul.bf16.gmra.mxu2 %v935_v31 }
  0x8e   : > { %v577_v35 = vpop.f32.mrf.mxu1 }
  0x91   : > { %992 = vmatmul.msk.bf16.gmra.mxu1 %vm430_vm0, %v891_v34 }
  0x95   : > { %v622_v45 = vpop.f32.mrf.mxu3 }
  0x96   : > { %v579_v42 = vpop.f32.mrf.mxu1 }
  0x9b   : > { %522 = vmatmul.bf16.gmra.mxu0 %v879_v40  ;;  %562 = vmatmul.bf16.gmra.mxu2 %v943_v41 }
  0x9d   : > { %v624_v56 = vpop.f32.mrf.mxu3 }
  0x9e   : > { %v582_v43 = vpop.f32.mrf.mxu1 }
  0xa5   : > { %v627_v1 = vpop.f32.mrf.mxu3 }
  0xa6   : > { %v584_v48 = vpop.f32.mrf.mxu1 }
  0xa8   : > { %v488_v46 = vpop.f32.mrf.mxu0 }
  0xa9   : > { %v489_v47 = vadd.f32 %v1216_v44, %v488_v46 }
  0xab   : > { %v578_v49 = vadd.f32 %v577_v35, %v489_v47 }
  0xad   : > { %v657_v50 = vmax.f32 %v578_v49, 0.0  ;;  %v629_v13 = vpop.f32.mrf.mxu3 }
  0xae   : > { %v1225_v52 = vpop.f32.mrf.mxu2  ;;  %v587_v55 = vpop.f32.mrf.mxu1 }
  0xaf   : > { %v689_v51 = vpack.c.bf16 %v657_v50, %v657_v50 }
  0xb0   : > { %v490_v53 = vpop.f32.mrf.mxu0 }
  0xb1   : > { %722 = vst.msk [vmem:[%s1223_s16] sm:$0xf] %vm721_vm1, %v689_v51  ;;  %v491_v54 = vadd.f32 %v1216_v44, %v490_v53 }
  0xb3   : > { %v580_v57 = vadd.f32 %v579_v42, %v491_v54 }
  0xb5   : > { %v658_v58 = vmax.f32 %v580_v57, 0.0  ;;  %v632_v28 = vpop.f32.mrf.mxu3 }
  0xb6   : > { %v1230_v60 = vpop.f32.mrf.mxu2  ;;  %v589_v63 = vpop.f32.mrf.mxu1 }
  0xb7   : > { %v690_v59 = vpack.c.bf16 %v658_v58, %v658_v58 }
  0xb8   : > { %v493_v61 = vpop.f32.mrf.mxu0 }
  0xb9   : > { %723 = vst.msk [vmem:[%s1223_s16 + $0x4] sm:$0xf] %vm721_vm1, %v690_v59  ;;  %v494_v62 = vadd.f32 %v1216_v44, %v493_v61 }
  0xbb   : > { %v583_v0 = vadd.f32 %v582_v43, %v494_v62 }
  0xbd   : > { %v659_v2 = vmax.f32 %v583_v0, 0.0 }
  0xbe   : > { %v533_v4 = vpop.f32.mrf.mxu2  ;;  %v592_v8 = vpop.f32.mrf.mxu1 }
  0xbf   : > { %v691_v3 = vpack.c.bf16 %v659_v2, %v659_v2  ;;  %v534_v5 = vadd.f32 %v1216_v44, %v533_v4 }
  0xc0   : > { %v495_v6 = vpop.f32.mrf.mxu0 }
  0xc1   : > { %724 = vst.msk [vmem:[%s1223_s16 + $0x8] sm:$0xf] %vm721_vm1, %v691_v3  ;;  %v496_v7 = vadd.f32 %v1216_v44, %v495_v6  ;;  %v623_v9 = vadd.f32 %v622_v45, %v534_v5  ;;  %v634_v45 = vpop.f32.mrf.mxu3 }
  0xc3   : > { %v585_v10 = vadd.f32 %v584_v48, %v496_v7  ;;  %v675_v11 = vmax.f32 %v623_v9, 0.0 }
  0xc5   : > { %v660_v12 = vmax.f32 %v585_v10, 0.0  ;;  %v707_v14 = vpack.c.bf16 %v675_v11, %v675_v11 }
  0xc6   : > { %v535_v16 = vpop.f32.mrf.mxu2  ;;  %v594_v20 = vpop.f32.mrf.mxu1 }
  0xc7   : > { %v692_v15 = vpack.c.bf16 %v660_v12, %v660_v12  ;;  %740 = vst.msk [vmem:[%s1223_s16 + $0x48] sm:$0xf] %vm721_vm1, %v707_v14  ;;  %v536_v17 = vadd.f32 %v1216_v44, %v535_v16 }
  0xc8   : > { %v498_v18 = vpop.f32.mrf.mxu0 }
  0xc9   : > { %725 = vst.msk [vmem:[%s1223_s16 + $0xc] sm:$0xf] %vm721_vm1, %v692_v15  ;;  %v499_v19 = vadd.f32 %v1216_v44, %v498_v18  ;;  %v625_v21 = vadd.f32 %v624_v56, %v536_v17  ;;  %v637_v61 = vpop.f32.mrf.mxu3 }
  0xcb   : > { %v588_v22 = vadd.f32 %v587_v55, %v499_v19  ;;  %v676_v23 = vmax.f32 %v625_v21, 0.0 }
  0xcd   : > { %v661_v24 = vmax.f32 %v588_v22, 0.0  ;;  %v708_v25 = vpack.c.bf16 %v676_v23, %v676_v23 }
  0xce   : > { %v538_v27 = vpop.f32.mrf.mxu2  ;;  %v597_v32 = vpop.f32.mrf.mxu1 }
  0xcf   : > { %v693_v26 = vpack.c.bf16 %v661_v24, %v661_v24  ;;  %741 = vst.msk [vmem:[%s1223_s16 + $0x4c] sm:$0xf] %vm721_vm1, %v708_v25  ;;  %v539_v29 = vadd.f32 %v1216_v44, %v538_v27 }
  0xd0   : > { %v500_v30 = vpop.f32.mrf.mxu0 }
  0xd1   : > { %726 = vst.msk [vmem:[%s1223_s16 + $0x10] sm:$0xf] %vm721_vm1, %v693_v26  ;;  %v501_v31 = vadd.f32 %v1216_v44, %v500_v30  ;;  %v628_v33 = vadd.f32 %v627_v1, %v539_v29  ;;  %v639_v11 = vpop.f32.mrf.mxu3 }
  0xd3   : > { %v590_v34 = vadd.f32 %v589_v63, %v501_v31  ;;  %v677_v35 = vmax.f32 %v628_v33, 0.0 }
  0xd5   : > { %v662_v36 = vmax.f32 %v590_v34, 0.0  ;;  %v709_v37 = vpack.c.bf16 %v677_v35, %v677_v35 }
  0xd6   : > { %v540_v39 = vpop.f32.mrf.mxu2  ;;  %v599_v43 = vpop.f32.mrf.mxu1 }
  0xd7   : > { %v694_v38 = vpack.c.bf16 %v662_v36, %v662_v36  ;;  %742 = vst.msk [vmem:[%s1223_s16 + $0x50] sm:$0xf] %vm721_vm1, %v709_v37  ;;  %v541_v40 = vadd.f32 %v1216_v44, %v540_v39 }
  0xd8   : > { %v503_v41 = vpop.f32.mrf.mxu0 }
  0xd9   : > { %727 = vst.msk [vmem:[%s1223_s16 + $0x14] sm:$0xf] %vm721_vm1, %v694_v38  ;;  %v504_v42 = vadd.f32 %v1216_v44, %v503_v41  ;;  %v630_v46 = vadd.f32 %v629_v13, %v541_v40  ;;  %v642_v26 = vpop.f32.mrf.mxu3 }
  0xdb   : > { %v593_v47 = vadd.f32 %v592_v8, %v504_v42  ;;  %v678_v48 = vmax.f32 %v630_v46, 0.0 }
  0xdd   : > { %v663_v49 = vmax.f32 %v593_v47, 0.0  ;;  %v710_v50 = vpack.c.bf16 %v678_v48, %v678_v48 }
  0xde   : > { %v543_v53 = vpop.f32.mrf.mxu2  ;;  %v602_v57 = vpop.f32.mrf.mxu1 }
  0xdf   : > { %v695_v51 = vpack.c.bf16 %v663_v49, %v663_v49  ;;  %743 = vst.msk [vmem:[%s1223_s16 + $0x54] sm:$0xf] %vm721_vm1, %v710_v50  ;;  %v544_v54 = vadd.f32 %v1216_v44, %v543_v53 }
  0xe0   : > { %v505_v55 = vpop.f32.mrf.mxu0 }
  0xe1   : > { %728 = vst.msk [vmem:[%s1223_s16 + $0x18] sm:$0xf] %vm721_vm1, %v695_v51  ;;  %v506_v56 = vadd.f32 %v1216_v44, %v505_v55  ;;  %v633_v58 = vadd.f32 %v632_v28, %v544_v54  ;;  %v644_v42 = vpop.f32.mrf.mxu3 }
  0xe3   : > { %v595_v59 = vadd.f32 %v594_v20, %v506_v56  ;;  %v679_v62 = vmax.f32 %v633_v58, 0.0 }
  0xe5   : > { %v664_v63 = vmax.f32 %v595_v59, 0.0  ;;  %v711_v0 = vpack.c.bf16 %v679_v62, %v679_v62 }
  0xe6   : > { %v545_v2 = vpop.f32.mrf.mxu2  ;;  %v604_v6 = vpop.f32.mrf.mxu1 }
  0xe7   : > { %v696_v1 = vpack.c.bf16 %v664_v63, %v664_v63  ;;  %744 = vst.msk [vmem:[%s1223_s16 + $0x58] sm:$0xf] %vm721_vm1, %v711_v0  ;;  %v546_v3 = vadd.f32 %v1216_v44, %v545_v2 }
  0xe8   : > { %v508_v4 = vpop.f32.mrf.mxu0 }
  0xe9   : > { %729 = vst.msk [vmem:[%s1223_s16 + $0x1c] sm:$0xf] %vm721_vm1, %v696_v1  ;;  %v509_v5 = vadd.f32 %v1216_v44, %v508_v4  ;;  %v635_v7 = vadd.f32 %v634_v45, %v546_v3  ;;  %v647_v58 = vpop.f32.mrf.mxu3  ;;  %v529_v1 = vadd.f32 %v1216_v44, %v1225_v52 }
  0xeb   : > { %v598_v8 = vadd.f32 %v597_v32, %v509_v5  ;;  %v680_v9 = vmax.f32 %v635_v7, 0.0 }
  0xed   : > { %v665_v10 = vmax.f32 %v598_v8, 0.0  ;;  %v712_v12 = vpack.c.bf16 %v680_v9, %v680_v9 }
  0xee   : > { %v548_v14 = vpop.f32.mrf.mxu2  ;;  %v607_v18 = vpop.f32.mrf.mxu1 }
  0xef   : > { %v697_v13 = vpack.c.bf16 %v665_v10, %v665_v10  ;;  %745 = vst.msk [vmem:[%s1223_s16 + $0x5c] sm:$0xf] %vm721_vm1, %v712_v12  ;;  %v549_v15 = vadd.f32 %v1216_v44, %v548_v14 }
  0xf0   : > { %v510_v16 = vpop.f32.mrf.mxu0 }
  0xf1   : > { %730 = vst.msk [vmem:[%s1223_s16 + $0x20] sm:$0xf] %vm721_vm1, %v697_v13  ;;  %v511_v17 = vadd.f32 %v1216_v44, %v510_v16  ;;  %v638_v19 = vadd.f32 %v637_v61, %v549_v15  ;;  %v649_v52 = vpop.f32.mrf.mxu3  ;;  %v531_v16 = vadd.f32 %v1216_v44, %v1230_v60 }
  0xf3   : > { %v600_v20 = vadd.f32 %v599_v43, %v511_v17  ;;  %v681_v21 = vmax.f32 %v638_v19, 0.0 }
  0xf5   : > { %v666_v22 = vmax.f32 %v600_v20, 0.0  ;;  %v713_v23 = vpack.c.bf16 %v681_v21, %v681_v21 }
  0xf6   : > { %v550_v25 = vpop.f32.mrf.mxu2  ;;  %v609_v30 = vpop.f32.mrf.mxu1 }
  0xf7   : > { %v698_v24 = vpack.c.bf16 %v666_v22, %v666_v22  ;;  %746 = vst.msk [vmem:[%s1223_s16 + $0x60] sm:$0xf] %vm721_vm1, %v713_v23  ;;  %v551_v27 = vadd.f32 %v1216_v44, %v550_v25 }
  0xf8   : > { %v513_v28 = vpop.f32.mrf.mxu0 }
  0xf9   : > { %731 = vst.msk [vmem:[%s1223_s16 + $0x24] sm:$0xf] %vm721_vm1, %v698_v24  ;;  %v514_v29 = vadd.f32 %v1216_v44, %v513_v28  ;;  %v640_v31 = vadd.f32 %v639_v11, %v551_v27 }
  0xfb   : > { %v603_v32 = vadd.f32 %v602_v57, %v514_v29  ;;  %v682_v33 = vmax.f32 %v640_v31, 0.0  ;;  %v652_v29 = vpop.f32.mrf.mxu3 }
  0xfd   : > { %v667_v34 = vmax.f32 %v603_v32, 0.0  ;;  %v714_v35 = vpack.c.bf16 %v682_v33, %v682_v33 }
  0xfe   : > { %v553_v37 = vpop.f32.mrf.mxu2  ;;  %v612_v41 = vpop.f32.mrf.mxu1 }
  0xff   : > { %v699_v36 = vpack.c.bf16 %v667_v34, %v667_v34  ;;  %747 = vst.msk [vmem:[%s1223_s16 + $0x64] sm:$0xf] %vm721_vm1, %v714_v35  ;;  %v554_v38 = vadd.f32 %v1216_v44, %v553_v37 }
 0x100   : > { %v515_v39 = vpop.f32.mrf.mxu0 }
 0x101   : > { %732 = vst.msk [vmem:[%s1223_s16 + $0x28] sm:$0xf] %vm721_vm1, %v699_v36  ;;  %v516_v40 = vadd.f32 %v1216_v44, %v515_v39  ;;  %v643_v43 = vadd.f32 %v642_v26, %v554_v38 }
 0x103   : > { %v605_v45 = vadd.f32 %v604_v6, %v516_v40  ;;  %v683_v46 = vmax.f32 %v643_v43, 0.0 }
 0x105   : > { %v668_v47 = vmax.f32 %v605_v45, 0.0  ;;  %v715_v48 = vpack.c.bf16 %v683_v46, %v683_v46 }
 0x106   : > { %v555_v50 = vpop.f32.mrf.mxu2  ;;  %v614_v55 = vpop.f32.mrf.mxu1 }
 0x107   : > { %v700_v49 = vpack.c.bf16 %v668_v47, %v668_v47  ;;  %748 = vst.msk [vmem:[%s1223_s16 + $0x68] sm:$0xf] %vm721_vm1, %v715_v48  ;;  %v556_v51 = vadd.f32 %v1216_v44, %v555_v50 }
 0x108   : > { %v518_v53 = vpop.f32.mrf.mxu0 }
 0x109   : > { %733 = vst.msk [vmem:[%s1223_s16 + $0x2c] sm:$0xf] %vm721_vm1, %v700_v49  ;;  %v519_v54 = vadd.f32 %v1216_v44, %v518_v53  ;;  %v645_v56 = vadd.f32 %v644_v42, %v556_v51  ;;  %v654_v42 = vpop.f32.mrf.mxu3 }
 0x10b   : > { %v608_v57 = vadd.f32 %v607_v18, %v519_v54  ;;  %v684_v59 = vmax.f32 %v645_v56, 0.0 }
 0x10d   : > { %v669_v61 = vmax.f32 %v608_v57, 0.0  ;;  %v716_v62 = vpack.c.bf16 %v684_v59, %v684_v59 }
 0x10e   : > { %v558_v0 = vpop.f32.mrf.mxu2  ;;  %v617_v5 = vpop.f32.mrf.mxu1 }
 0x10f   : > { %v701_v63 = vpack.c.bf16 %v669_v61, %v669_v61  ;;  %749 = vst.msk [vmem:[%s1223_s16 + $0x6c] sm:$0xf] %vm721_vm1, %v716_v62  ;;  %v559_v2 = vadd.f32 %v1216_v44, %v558_v0  ;;  %v618_v7 = vadd.f32 %v617_v5, %v529_v1 }
 0x110   : > { %v520_v3 = vpop.f32.mrf.mxu0 }
 0x111   : > { %734 = vst.msk [vmem:[%s1223_s16 + $0x30] sm:$0xf] %vm721_vm1, %v701_v63  ;;  %v521_v4 = vadd.f32 %v1216_v44, %v520_v3  ;;  %v648_v6 = vadd.f32 %v647_v58, %v559_v2  ;;  %v673_v10 = vmax.f32 %v618_v7, 0.0 }
 0x113   : > { %v610_v8 = vadd.f32 %v609_v30, %v521_v4  ;;  %v685_v9 = vmax.f32 %v648_v6, 0.0  ;;  %v705_v13 = vpack.c.bf16 %v673_v10, %v673_v10 }
 0x115   : > { %v670_v11 = vmax.f32 %v610_v8, 0.0  ;;  %v717_v12 = vpack.c.bf16 %v685_v9, %v685_v9  ;;  %738 = vst.msk [vmem:[%s1223_s16 + $0x40] sm:$0xf] %vm721_vm1, %v705_v13 }
 0x116   : > { %v560_v15 = vpop.f32.mrf.mxu2  ;;  %v619_v20 = vpop.f32.mrf.mxu1 }
 0x117   : > { %v702_v14 = vpack.c.bf16 %v670_v11, %v670_v11  ;;  %750 = vst.msk [vmem:[%s1223_s16 + $0x70] sm:$0xf] %vm721_vm1, %v717_v12  ;;  %v561_v17 = vadd.f32 %v1216_v44, %v560_v15  ;;  %v620_v22 = vadd.f32 %v619_v20, %v531_v16 }
 0x118   : > { %v523_v18 = vpop.f32.mrf.mxu0 }
 0x119   : > { %735 = vst.msk [vmem:[%s1223_s16 + $0x34] sm:$0xf] %vm721_vm1, %v702_v14  ;;  %v524_v19 = vadd.f32 %v1216_v44, %v523_v18  ;;  %v650_v21 = vadd.f32 %v649_v52, %v561_v17  ;;  %v674_v60 = vmax.f32 %v620_v22, 0.0 }
 0x11b   : > { %v613_v23 = vadd.f32 %v612_v41, %v524_v19  ;;  %v686_v24 = vmax.f32 %v650_v21, 0.0  ;;  %v706_v27 = vpack.c.bf16 %v674_v60, %v674_v60 }
 0x11d   : > { %v671_v25 = vmax.f32 %v613_v23, 0.0  ;;  %v718_v26 = vpack.c.bf16 %v686_v24, %v686_v24  ;;  %739 = vst.msk [vmem:[%s1223_s16 + $0x44] sm:$0xf] %vm721_vm1, %v706_v27 }
 0x11e   : > { %v563_v30 = vpop.f32.mrf.mxu2 }
 0x11f   : > { %v703_v28 = vpack.c.bf16 %v671_v25, %v671_v25  ;;  %751 = vst.msk [vmem:[%s1223_s16 + $0x74] sm:$0xf] %vm721_vm1, %v718_v26  ;;  %v564_v31 = vadd.f32 %v1216_v44, %v563_v30 }
 0x120   : > { %v525_v32 = vpop.f32.mrf.mxu0 }
 0x121   : > { %736 = vst.msk [vmem:[%s1223_s16 + $0x38] sm:$0xf] %vm721_vm1, %v703_v28  ;;  %v526_v33 = vadd.f32 %v1216_v44, %v525_v32  ;;  %v653_v34 = vadd.f32 %v652_v29, %v564_v31 }
 0x123   : > { %v615_v35 = vadd.f32 %v614_v55, %v526_v33  ;;  %v687_v36 = vmax.f32 %v653_v34, 0.0 }
 0x125   : > { %v672_v37 = vmax.f32 %v615_v35, 0.0  ;;  %v719_v38 = vpack.c.bf16 %v687_v36, %v687_v36 }
 0x126   : > { %v565_v40 = vpop.f32.mrf.mxu2 }
 0x127   : > { %v704_v39 = vpack.c.bf16 %v672_v37, %v672_v37  ;;  %752 = vst.msk [vmem:[%s1223_s16 + $0x78] sm:$0xf] %vm721_vm1, %v719_v38  ;;  %v566_v41 = vadd.f32 %v1216_v44, %v565_v40 }
 0x129   : > { %737 = vst.msk [vmem:[%s1223_s16 + $0x3c] sm:$0xf] %vm721_vm1, %v704_v39  ;;  %v655_v43 = vadd.f32 %v654_v42, %v566_v41 }
 0x12b   : > { %v688_v45 = vmax.f32 %v655_v43, 0.0 }
 0x12d   : > { %v720_v46 = vpack.c.bf16 %v688_v45, %v688_v45 }
 0x12f   : > { %753 = vst.msk [vmem:[%s1223_s16 + $0x7c] sm:$0xf] %vm721_vm1, %v720_v46 }
 0x130 PF: > { %s13_s12 = sadd.s32 1, %s1068_s12  }
 0x131   : > { %p10_p4 = scmp.ge.s32.totalorder %s13_s12, 4  }
 0x133   :  { %12 = sbr.rel (!%p10_p4) target bundleno = 1 (0x1), region = 62 }

// kernel: base_encoder_forward.11
= control target key start
LH: loop header
LB: loop body
LE: loop exit
PB: predicated region body
PF: predicated region fallthrough
CT: control target
= control target key end

     0   :  { %vm315_vm0 = vcmask 261120   ;;  %vm519_vm1 = vcmask 519168   ;;  %s1086_s1 = inlined_call_operand.vmem [shape: bf16[288,64], index: 1, kind: input, shape index: {}]   ;;  %s1087_s0 = inlined_call_operand.vmem [shape: bf16[128,288], index: 0, kind: input, shape index: {}]   ;;  %s1088_s2 = inlined_call_operand.vmem [shape: f32[1,64], index: 2, kind: input, shape index: {}]   ;;  %s1089_s3 = inlined_call_operand.vmem [shape: bf16[128,64], index: 3, kind: output, shape index: {}]  }
   0x1   :  { %v747_v0 = vld [vmem:[%s1086_s1 + $0x38] sm:$0xff]  ;;  %v757_v1 = vld [vmem:[%s1086_s1 + $0x88] sm:$0xff]  ;;  %v746_v3 = vld [vmem:[%s1086_s1 + $0x30] sm:$0xff] }
   0x2   :  { %v755_v2 = vld [vmem:[%s1086_s1 + $0x78] sm:$0xff]  ;;  %340 = vmatpush.bf16.msra.mxu0 %v747_v0  ;;  %758 = vmatpush.bf16.msra.mxu3 %v747_v0  ;;  %v756_v4 = vld [vmem:[%s1086_s1 + $0x80] sm:$0xff]  ;;  %v754_v5 = vld [vmem:[%s1086_s1 + $0x70] sm:$0xff] }
   0x3   :  { %444 = vmatpush.bf16.msra.mxu2 %v757_v1  ;;  %389 = vmatpush.bf16.msra.mxu1 %v755_v2  ;;  %v550_v6 = vld [vmem:[%s1087_s0 + $0x8] sm:$0xf]  ;;  %v718_v7 = vld [vmem:[%s1087_s0 + $0x10] sm:$0xf0]  ;;  %v744_v11 = vld [vmem:[%s1086_s1 + $0x20] sm:$0xff] }
   0x4   :  { %v551_v8 = vor.u32 %v718_v7, %v550_v6  ;;  %v745_v9 = vld [vmem:[%s1086_s1 + $0x28] sm:$0xff]  ;;  %v752_v12 = vld [vmem:[%s1086_s1 + $0x60] sm:$0xff]  ;;  %v743_v13 = vld [vmem:[%s1086_s1 + $0x18] sm:$0xff] }
   0x5   :  { %v753_v10 = vld [vmem:[%s1086_s1 + $0x68] sm:$0xff]  ;;  %v751_v14 = vld [vmem:[%s1086_s1 + $0x58] sm:$0xff]  ;;  %v742_v15 = vld [vmem:[%s1086_s1 + $0x10] sm:$0xff] }
   0x6   :  { %341 = vmatpush.bf16.msra.mxu0 %v746_v3  ;;  %759 = vmatpush.bf16.msra.mxu3 %v746_v3  ;;  %v750_v16 = vld [vmem:[%s1086_s1 + $0x50] sm:$0xff]  ;;  %v562_v17 = vld [vmem:[%s1087_s0 + $0x20] sm:$0xf]  ;;  %v721_v18 = vld [vmem:[%s1087_s0 + $0x28] sm:$0xf0] }
   0x7   :  { %445 = vmatpush.bf16.msra.mxu2 %v756_v4  ;;  %390 = vmatpush.bf16.msra.mxu1 %v754_v5  ;;  %v563_v19 = vor.u32 %v721_v18, %v562_v17  ;;  %v741_v20 = vld [vmem:[%s1086_s1 + $0x8] sm:$0xff]  ;;  %v740_v22 = vld [vmem:[%s1086_s1] sm:$0xff]  ;;  %v614_v26 = vld [vmem:[%s1087_s0 + $0x90] sm:$0xf] }
   0x8   :  { %v749_v21 = vld [vmem:[%s1086_s1 + $0x48] sm:$0xff]  ;;  %v748_v23 = vld [vmem:[%s1086_s1 + $0x40] sm:$0xff]  ;;  %v735_v27 = vld [vmem:[%s1087_s0 + $0x98] sm:$0xf0] }
   0x9   :  { %v542_v24 = vld [vmem:[%s1087_s0] sm:$0xf]  ;;  %v717_v25 = vld [vmem:[%s1087_s0 + $0x8] sm:$0xf0]  ;;  %v716_v28 = vld [vmem:[%s1087_s0 + $0x4] sm:$0xf]  ;;  %v615_v31 = vor.u32 %v735_v27, %v614_v26 }
   0xa   :  { %708 = vmatmul.msk.bf16.vlgmr.msra.gmra.mxu2 %vm315_vm0, %v551_v8  ;;  %342 = vmatpush.bf16.msra.mxu0 %v745_v9  ;;  %v544_v29 = vld [vmem:[%s1087_s0 + $0xc] sm:$0xf0]  ;;  %v543_v30 = vor.u32 %v717_v25, %v542_v24  ;;  %v574_v33 = vld [vmem:[%s1087_s0 + $0x38] sm:$0xf]  ;;  %v724_v34 = vld [vmem:[%s1087_s0 + $0x40] sm:$0xf0] }
   0xb   :  { %760 = vmatpush.bf16.msra.mxu3 %v745_v9  ;;  %391 = vmatpush.bf16.msra.mxu1 %v753_v10  ;;  %v547_v32 = vor.u32 %v716_v28, %v544_v29  ;;  %v575_v35 = vor.u32 %v724_v34, %v574_v33  ;;  %v554_v36 = vld [vmem:[%s1087_s0 + $0x18] sm:$0xf]  ;;  %v720_v37 = vld [vmem:[%s1087_s0 + $0x20] sm:$0xf0]  ;;  %v626_v38 = vld [vmem:[%s1087_s0 + $0xa8] sm:$0xf] }
   0xc   :  { %v738_v39 = vld [vmem:[%s1087_s0 + $0xb0] sm:$0xf0]  ;;  %v719_v40 = vld [vmem:[%s1087_s0 + $0x1c] sm:$0xf]  ;;  %v556_v41 = vld [vmem:[%s1087_s0 + $0x24] sm:$0xf0]  ;;  %v555_v42 = vor.u32 %v720_v37, %v554_v36 }
   0xd   :  { %v627_v43 = vor.u32 %v738_v39, %v626_v38  ;;  %v559_v44 = vor.u32 %v719_v40, %v556_v41  ;;  %v586_v45 = vld [vmem:[%s1087_s0 + $0x50] sm:$0xf]  ;;  %v727_v46 = vld [vmem:[%s1087_s0 + $0x58] sm:$0xf0]  ;;  %v734_v50 = vld [vmem:[%s1087_s0 + $0x94] sm:$0xf] }
   0xe   :  { %343 = vmatpush.bf16.msra.mxu0 %v744_v11  ;;  %v587_v47 = vor.u32 %v727_v46, %v586_v45  ;;  %v566_v48 = vld [vmem:[%s1087_s0 + $0x30] sm:$0xf]  ;;  %v723_v49 = vld [vmem:[%s1087_s0 + $0x38] sm:$0xf0]  ;;  %v616_v51 = vld [vmem:[%s1087_s0 + $0x9c] sm:$0xf0] }
   0xf   :  { %761 = vmatpush.bf16.msra.mxu3 %v744_v11  ;;  %392 = vmatpush.bf16.msra.mxu1 %v752_v12  ;;  %v722_v52 = vld [vmem:[%s1087_s0 + $0x34] sm:$0xf]  ;;  %v568_v53 = vld [vmem:[%s1087_s0 + $0x3c] sm:$0xf0]  ;;  %v567_v54 = vor.u32 %v723_v49, %v566_v48  ;;  %v619_v55 = vor.u32 %v734_v50, %v616_v51  ;;  %v598_v57 = vld [vmem:[%s1087_s0 + $0x68] sm:$0xf] }
  0x10   :  { %v571_v56 = vor.u32 %v722_v52, %v568_v53  ;;  %v730_v58 = vld [vmem:[%s1087_s0 + $0x70] sm:$0xf0]  ;;  %v578_v60 = vld [vmem:[%s1087_s0 + $0x48] sm:$0xf]  ;;  %v737_v62 = vld [vmem:[%s1087_s0 + $0xac] sm:$0xf] }
  0x11   :  { %v599_v59 = vor.u32 %v730_v58, %v598_v57  ;;  %v726_v61 = vld [vmem:[%s1087_s0 + $0x50] sm:$0xf0]  ;;  %v628_v63 = vld [vmem:[%s1087_s0 + $0xb4] sm:$0xf0]  ;;  %v725_v0 = vld [vmem:[%s1087_s0 + $0x4c] sm:$0xf] }
  0x12   :  { %344 = vmatpush.bf16.msra.mxu0 %v743_v13  ;;  %v580_v1 = vld [vmem:[%s1087_s0 + $0x54] sm:$0xf0]  ;;  %v631_v3 = vor.u32 %v737_v62, %v628_v63  ;;  %v733_v6 = vld [vmem:[%s1087_s0 + $0x88] sm:$0xf0]  ;;  %v590_v8 = vld [vmem:[%s1087_s0 + $0x60] sm:$0xf] }
  0x13   :  { %762 = vmatpush.bf16.msra.mxu3 %v743_v13  ;;  %393 = vmatpush.bf16.msra.mxu1 %v751_v14  ;;  %v583_v4 = vor.u32 %v725_v0, %v580_v1  ;;  %v729_v9 = vld [vmem:[%s1087_s0 + $0x68] sm:$0xf0]  ;;  %v592_v11 = vld [vmem:[%s1087_s0 + $0x6c] sm:$0xf0]  ;;  %v602_v17 = vld [vmem:[%s1087_s0 + $0x78] sm:$0xf] }
  0x14   :  { %v732_v18 = vld [vmem:[%s1087_s0 + $0x80] sm:$0xf0]  ;;  %v739_v24 = vld [vmem:[%s1087_s0 + $0xb8] sm:$0xf0]  ;;  %v1004_v28 = vld [vmem:[%s1088_s2] ss:$0 sm:$0xff] }
  0x16   :  { %345 = vmatpush.bf16.msra.mxu0 %v742_v15 }
  0x17   :  { %763 = vmatpush.bf16.msra.mxu3 %v742_v15  ;;  %394 = vmatpush.bf16.msra.mxu1 %v750_v16  ;;  %v736_v15 = vld [vmem:[%s1087_s0 + $0xa0] sm:$0xf0] }
  0x1a   :  { %709 = vmatmul.msk.bf16.gmra.mxu2 %vm315_vm0, %v563_v19  ;;  %346 = vmatpush.bf16.msra.mxu0 %v741_v20  ;;  %v731_v19 = vld [vmem:[%s1087_s0 + $0x7c] sm:$0xf] }
  0x1b   :  { %764 = vmatpush.bf16.msra.mxu3 %v741_v20  ;;  %395 = vmatpush.bf16.msra.mxu1 %v749_v21  ;;  %v604_v20 = vld [vmem:[%s1087_s0 + $0x84] sm:$0xf0] }
  0x1e   :  { %347 = vmatpush.bf16.msra.mxu0 %v740_v22 }
  0x1f   :  { %765 = vmatpush.bf16.msra.mxu3 %v740_v22  ;;  %396 = vmatpush.bf16.msra.mxu1 %v748_v23  ;;  %v607_v22 = vor.u32 %v731_v19, %v604_v20 }
  0x21   :  { %348 = vmatmul.bf16.vlgmr.msra.gmra.mxu0 %v543_v30 }
  0x22   :  { %378 = vmatmul.bf16.vlgmr.msra.gmra.mxu3 %v615_v31  ;;  %397 = vmatmul.bf16.vlgmr.msra.gmra.mxu1 %v547_v32 }
  0x23   :  { %766 = vmatpush.bf16.msrb.mxu3 %v755_v2  ;;  %v579_v2 = vor.u32 %v726_v61, %v578_v60 }
  0x27   :  { %767 = vmatpush.bf16.msrb.mxu3 %v754_v5  ;;  %v610_v5 = vld [vmem:[%s1087_s0 + $0x80] sm:$0xf] }
  0x28   :  { %v611_v7 = vor.u32 %v733_v6, %v610_v5 }
  0x2a   :  { %710 = vmatmul.msk.bf16.gmra.mxu2 %vm315_vm0, %v575_v35 }
  0x2b   :  { %768 = vmatpush.bf16.msrb.mxu3 %v753_v10  ;;  %v728_v10 = vld [vmem:[%s1087_s0 + $0x64] sm:$0xf] }
  0x2c   :  { %v595_v13 = vor.u32 %v728_v10, %v592_v11 }
  0x2f   :  { %769 = vmatpush.bf16.msrb.mxu3 %v752_v12  ;;  %v591_v12 = vor.u32 %v729_v9, %v590_v8 }
  0x31   :  { %353 = vmatmul.bf16.gmra.mxu0 %v555_v42 }
  0x32   :  { %383 = vmatmul.bf16.gmra.mxu3 %v627_v43  ;;  %402 = vmatmul.bf16.gmra.mxu1 %v559_v44 }
  0x33   :  { %770 = vmatpush.bf16.msrb.mxu3 %v751_v14  ;;  %v622_v14 = vld [vmem:[%s1087_s0 + $0x98] sm:$0xf] }
  0x37   :  { %771 = vmatpush.bf16.msrb.mxu3 %v750_v16  ;;  %v623_v16 = vor.u32 %v736_v15, %v622_v14 }
  0x3a   :  { %711 = vmatmul.msk.bf16.gmra.mxu2 %vm315_vm0, %v587_v47 }
  0x3b   :  { %772 = vmatpush.bf16.msrb.mxu3 %v749_v21  ;;  %v603_v21 = vor.u32 %v732_v18, %v602_v17 }
  0x3f   :  { %773 = vmatpush.bf16.msrb.mxu3 %v748_v23  ;;  %v634_v23 = vld [vmem:[%s1087_s0 + $0xb0] sm:$0xf] }
  0x40   :  { %v635_v25 = vor.u32 %v739_v24, %v634_v23 }
  0x41   :  { %358 = vmatmul.bf16.gmra.mxu0 %v567_v54 }
  0x42   :  { %427 = vmatmul.bf16.vlgmr.msrb.gmra.mxu3 %v619_v55  ;;  %407 = vmatmul.bf16.gmra.mxu1 %v571_v56 }
  0x4a   :  { %712 = vmatmul.msk.bf16.gmra.mxu2 %vm315_vm0, %v599_v59 }
  0x51   :  { %363 = vmatmul.bf16.gmra.mxu0 %v579_v2 }
  0x52   :  { %432 = vmatmul.bf16.gmra.mxu3 %v631_v3  ;;  %412 = vmatmul.bf16.gmra.mxu1 %v583_v4 }
  0x5a   :  { %713 = vmatmul.msk.bf16.gmra.mxu2 %vm315_vm0, %v611_v7 }
  0x61   :  { %368 = vmatmul.bf16.gmra.mxu0 %v591_v12 }
  0x62   :  { %417 = vmatmul.bf16.gmra.mxu1 %v595_v13 }
  0x6a   :  { %714 = vmatmul.msk.bf16.gmra.mxu2 %vm315_vm0, %v623_v16 }
  0x71   :  { %373 = vmatmul.bf16.gmra.mxu0 %v603_v21 }
  0x72   :  { %422 = vmatmul.bf16.gmra.mxu1 %v607_v22 }
  0x7a   :  { %715 = vmatmul.msk.bf16.gmra.mxu2 %vm315_vm0, %v635_v25 }
  0x8d   :  { %v447_v26 = vpop.f32.mrf.mxu2 }
  0x95   :  { %v449_v27 = vpop.f32.mrf.mxu2 }
  0x9d   :  { %v452_v29 = vpop.f32.mrf.mxu2 }
  0x9e   :  { %v349_v30 = vpop.f32.mrf.mxu0 }
  0x9f   :  { %v350_v31 = vadd.f32 %v1004_v28, %v349_v30  ;;  %v398_v32 = vpop.f32.mrf.mxu1 }
  0xa1   :  { %v399_v33 = vadd.f32 %v398_v32, %v350_v31 }
  0xa3   :  { %v448_v34 = vadd.f32 %v447_v26, %v399_v33 }
  0xa5   :  { %v487_v35 = vmax.f32 %v448_v34, 0.0  ;;  %v454_v36 = vpop.f32.mrf.mxu2  ;;  %v379_v58 = vpop.f32.mrf.mxu3 }
  0xa6   :  { %v351_v37 = vpop.f32.mrf.mxu0 }
  0xa7   :  { %v503_v38 = vpack.c.bf16 %v487_v35, %v487_v35  ;;  %v352_v39 = vadd.f32 %v1004_v28, %v351_v37  ;;  %v400_v40 = vpop.f32.mrf.mxu1 }
  0xa9   :  { %520 = vst.msk [vmem:[%s1089_s3] sm:$0xf] %vm519_vm1, %v503_v38  ;;  %v401_v41 = vadd.f32 %v400_v40, %v352_v39 }
  0xab   :  { %v450_v42 = vadd.f32 %v449_v27, %v401_v41 }
  0xad   :  { %v488_v43 = vmax.f32 %v450_v42, 0.0  ;;  %v457_v44 = vpop.f32.mrf.mxu2  ;;  %v381_v4 = vpop.f32.mrf.mxu3 }
  0xae   :  { %v354_v45 = vpop.f32.mrf.mxu0 }
  0xaf   :  { %v504_v46 = vpack.c.bf16 %v488_v43, %v488_v43  ;;  %v355_v47 = vadd.f32 %v1004_v28, %v354_v45  ;;  %v403_v48 = vpop.f32.mrf.mxu1 }
  0xb1   :  { %521 = vst.msk [vmem:[%s1089_s3 + $0x4] sm:$0xf] %vm519_vm1, %v504_v46  ;;  %v404_v49 = vadd.f32 %v403_v48, %v355_v47  ;;  %v380_v47 = vadd.f32 %v1004_v28, %v379_v58 }
  0xb3   :  { %v453_v50 = vadd.f32 %v452_v29, %v404_v49 }
  0xb5   :  { %v489_v51 = vmax.f32 %v453_v50, 0.0  ;;  %v459_v52 = vpop.f32.mrf.mxu2  ;;  %v384_v16 = vpop.f32.mrf.mxu3 }
  0xb6   :  { %v356_v53 = vpop.f32.mrf.mxu0 }
  0xb7   :  { %v505_v54 = vpack.c.bf16 %v489_v51, %v489_v51  ;;  %v357_v55 = vadd.f32 %v1004_v28, %v356_v53  ;;  %v405_v56 = vpop.f32.mrf.mxu1 }
  0xb9   :  { %522 = vst.msk [vmem:[%s1089_s3 + $0x8] sm:$0xf] %vm519_vm1, %v505_v54  ;;  %v406_v57 = vadd.f32 %v405_v56, %v357_v55 }
  0xbb   :  { %v455_v59 = vadd.f32 %v454_v36, %v406_v57 }
  0xbd   :  { %v490_v60 = vmax.f32 %v455_v59, 0.0  ;;  %v462_v61 = vpop.f32.mrf.mxu2  ;;  %v386_v29 = vpop.f32.mrf.mxu3 }
  0xbe   :  { %v359_v62 = vpop.f32.mrf.mxu0 }
  0xbf   :  { %v506_v63 = vpack.c.bf16 %v490_v60, %v490_v60  ;;  %v360_v0 = vadd.f32 %v1004_v28, %v359_v62  ;;  %v408_v1 = vpop.f32.mrf.mxu1  ;;  %v382_v60 = vadd.f32 %v1004_v28, %v381_v4 }
  0xc1   :  { %523 = vst.msk [vmem:[%s1089_s3 + $0xc] sm:$0xf] %vm519_vm1, %v506_v63  ;;  %v409_v2 = vadd.f32 %v408_v1, %v360_v0 }
  0xc3   :  { %v458_v3 = vadd.f32 %v457_v44, %v409_v2 }
  0xc5   :  { %v491_v5 = vmax.f32 %v458_v3, 0.0  ;;  %v464_v6 = vpop.f32.mrf.mxu2  ;;  %v428_v39 = vpop.f32.mrf.mxu3 }
  0xc6   :  { %v361_v7 = vpop.f32.mrf.mxu0  ;;  %v429_v50 = vadd.f32 %v428_v39, %v380_v47 }
  0xc7   :  { %v507_v8 = vpack.c.bf16 %v491_v5, %v491_v5  ;;  %v362_v9 = vadd.f32 %v1004_v28, %v361_v7  ;;  %v410_v10 = vpop.f32.mrf.mxu1 }
  0xc9   :  { %524 = vst.msk [vmem:[%s1089_s3 + $0x10] sm:$0xf] %vm519_vm1, %v507_v8  ;;  %v411_v11 = vadd.f32 %v410_v10, %v362_v9  ;;  %v385_v9 = vadd.f32 %v1004_v28, %v384_v16  ;;  %v387_v16 = vadd.f32 %v1004_v28, %v386_v29 }
  0xcb   :  { %v460_v12 = vadd.f32 %v459_v52, %v411_v11 }
  0xcd   :  { %v492_v13 = vmax.f32 %v460_v12, 0.0  ;;  %v467_v14 = vpop.f32.mrf.mxu2  ;;  %v430_v51 = vpop.f32.mrf.mxu3 }
  0xce   :  { %v364_v15 = vpop.f32.mrf.mxu0  ;;  %v431_v0 = vadd.f32 %v430_v51, %v382_v60 }
  0xcf   :  { %v508_v17 = vpack.c.bf16 %v492_v13, %v492_v13  ;;  %v365_v18 = vadd.f32 %v1004_v28, %v364_v15  ;;  %v413_v19 = vpop.f32.mrf.mxu1 }
  0xd1   :  { %525 = vst.msk [vmem:[%s1089_s3 + $0x14] sm:$0xf] %vm519_vm1, %v508_v17  ;;  %v414_v20 = vadd.f32 %v413_v19, %v365_v18 }
  0xd3   :  { %v463_v21 = vadd.f32 %v462_v61, %v414_v20 }
  0xd5   :  { %v493_v22 = vmax.f32 %v463_v21, 0.0  ;;  %v469_v23 = vpop.f32.mrf.mxu2  ;;  %v433_v4 = vpop.f32.mrf.mxu3 }
  0xd6   :  { %v366_v24 = vpop.f32.mrf.mxu0 }
  0xd7   :  { %v509_v25 = vpack.c.bf16 %v493_v22, %v493_v22  ;;  %v367_v26 = vadd.f32 %v1004_v28, %v366_v24  ;;  %v415_v27 = vpop.f32.mrf.mxu1 }
  0xd9   :  { %526 = vst.msk [vmem:[%s1089_s3 + $0x18] sm:$0xf] %vm519_vm1, %v509_v25  ;;  %v416_v30 = vadd.f32 %v415_v27, %v367_v26 }
  0xdb   :  { %v465_v31 = vadd.f32 %v464_v6, %v416_v30 }
  0xdd   :  { %v494_v32 = vmax.f32 %v465_v31, 0.0  ;;  %v472_v33 = vpop.f32.mrf.mxu2  ;;  %v435_v21 = vpop.f32.mrf.mxu3 }
  0xde   :  { %v369_v34 = vpop.f32.mrf.mxu0 }
  0xdf   :  { %v510_v35 = vpack.c.bf16 %v494_v32, %v494_v32  ;;  %v370_v36 = vadd.f32 %v1004_v28, %v369_v34  ;;  %v418_v37 = vpop.f32.mrf.mxu1 }
  0xe1   :  { %527 = vst.msk [vmem:[%s1089_s3 + $0x1c] sm:$0xf] %vm519_vm1, %v510_v35  ;;  %v419_v38 = vadd.f32 %v418_v37, %v370_v36 }
  0xe3   :  { %v468_v40 = vadd.f32 %v467_v14, %v419_v38  ;;  %v434_v14 = vadd.f32 %v433_v4, %v385_v9 }
  0xe5   :  { %v495_v41 = vmax.f32 %v468_v40, 0.0  ;;  %v474_v42 = vpop.f32.mrf.mxu2 }
  0xe6   :  { %v371_v43 = vpop.f32.mrf.mxu0 }
  0xe7   :  { %v511_v44 = vpack.c.bf16 %v495_v41, %v495_v41  ;;  %v372_v45 = vadd.f32 %v1004_v28, %v371_v43  ;;  %v420_v46 = vpop.f32.mrf.mxu1 }
  0xe9   :  { %528 = vst.msk [vmem:[%s1089_s3 + $0x20] sm:$0xf] %vm519_vm1, %v511_v44  ;;  %v421_v48 = vadd.f32 %v420_v46, %v372_v45 }
  0xeb   :  { %v470_v49 = vadd.f32 %v469_v23, %v421_v48  ;;  %v436_v23 = vadd.f32 %v435_v21, %v387_v16 }
  0xed   :  { %v496_v52 = vmax.f32 %v470_v49, 0.0  ;;  %v477_v53 = vpop.f32.mrf.mxu2 }
  0xee   :  { %v478_v54 = vadd.f32 %v477_v53, %v429_v50  ;;  %v374_v55 = vpop.f32.mrf.mxu0 }
  0xef   :  { %v512_v56 = vpack.c.bf16 %v496_v52, %v496_v52  ;;  %v375_v57 = vadd.f32 %v1004_v28, %v374_v55  ;;  %v423_v59 = vpop.f32.mrf.mxu1 }
  0xf0   :  { %v499_v58 = vmax.f32 %v478_v54, 0.0 }
  0xf1   :  { %529 = vst.msk [vmem:[%s1089_s3 + $0x24] sm:$0xf] %vm519_vm1, %v512_v56  ;;  %v424_v61 = vadd.f32 %v423_v59, %v375_v57 }
  0xf2   :  { %v515_v62 = vpack.c.bf16 %v499_v58, %v499_v58 }
  0xf3   :  { %v473_v63 = vadd.f32 %v472_v33, %v424_v61 }
  0xf4   :  { %532 = vst.msk [vmem:[%s1089_s3 + $0x30] sm:$0xf] %vm519_vm1, %v515_v62 }
  0xf5   :  { %v497_v1 = vmax.f32 %v473_v63, 0.0  ;;  %v479_v2 = vpop.f32.mrf.mxu2 }
  0xf6   :  { %v480_v3 = vadd.f32 %v479_v2, %v431_v0  ;;  %v376_v5 = vpop.f32.mrf.mxu0 }
  0xf7   :  { %v513_v6 = vpack.c.bf16 %v497_v1, %v497_v1  ;;  %v377_v7 = vadd.f32 %v1004_v28, %v376_v5  ;;  %v425_v8 = vpop.f32.mrf.mxu1 }
  0xf8   :  { %v500_v10 = vmax.f32 %v480_v3, 0.0 }
  0xf9   :  { %530 = vst.msk [vmem:[%s1089_s3 + $0x28] sm:$0xf] %vm519_vm1, %v513_v6  ;;  %v426_v11 = vadd.f32 %v425_v8, %v377_v7 }
  0xfa   :  { %v516_v12 = vpack.c.bf16 %v500_v10, %v500_v10 }
  0xfb   :  { %v475_v13 = vadd.f32 %v474_v42, %v426_v11 }
  0xfc   :  { %533 = vst.msk [vmem:[%s1089_s3 + $0x34] sm:$0xf] %vm519_vm1, %v516_v12 }
  0xfd   :  { %v498_v15 = vmax.f32 %v475_v13, 0.0  ;;  %v482_v17 = vpop.f32.mrf.mxu2 }
  0xfe   :  { %v483_v18 = vadd.f32 %v482_v17, %v434_v14 }
  0xff   :  { %v514_v19 = vpack.c.bf16 %v498_v15, %v498_v15 }
 0x100   :  { %v501_v20 = vmax.f32 %v483_v18, 0.0 }
 0x101   :  { %531 = vst.msk [vmem:[%s1089_s3 + $0x2c] sm:$0xf] %vm519_vm1, %v514_v19 }
 0x102   :  { %v517_v22 = vpack.c.bf16 %v501_v20, %v501_v20 }
 0x104   :  { %534 = vst.msk [vmem:[%s1089_s3 + $0x38] sm:$0xf] %vm519_vm1, %v517_v22 }
 0x105   :  { %v484_v24 = vpop.f32.mrf.mxu2 }
 0x106   :  { %v485_v25 = vadd.f32 %v484_v24, %v436_v23 }
 0x108   :  { %v502_v26 = vmax.f32 %v485_v25, 0.0 }
 0x10a   :  { %v518_v27 = vpack.c.bf16 %v502_v26, %v502_v26 }
 0x10c   :  { %535 = vst.msk [vmem:[%s1089_s3 + $0x3c] sm:$0xf] %vm519_vm1, %v518_v27 }

// kernel: base_encoder_forward.12
= control target key start
LH: loop header
LB: loop body
LE: loop exit
PB: predicated region body
PF: predicated region fallthrough
CT: control target
= control target key end

     0   :  { %vm369_vm0 = vcmask 523264   ;;  %vm479_vm1 = vcmask 781312   ;;  %s932_s1 = inlined_call_operand.vmem [shape: bf16[576,96], index: 1, kind: input, shape index: {}]   ;;  %s933_s2 = inlined_call_operand.vmem [shape: f32[1,96], index: 2, kind: input, shape index: {}]   ;;  %s934_s0 = inlined_call_operand.vmem [shape: bf16[32,576], index: 0, kind: input, shape index: {}]   ;;  %s935_s3 = inlined_call_operand.vmem [shape: bf16[32,96], index: 3, kind: output, shape index: {}]  }
   0x1   :  { %v691_v0 = vld [vmem:[%s932_s1 + $0x38] sm:$0xff]  ;;  %v690_v4 = vld [vmem:[%s932_s1 + $0x30] sm:$0xff]  ;;  %v689_v8 = vld [vmem:[%s932_s1 + $0x28] sm:$0xff] }
   0x2   :  { %v699_v1 = vld [vmem:[%s932_s1 + $0x78] sm:$0xff]  ;;  %376 = vmatpush.bf16.msra.mxu0 %v691_v0  ;;  %v698_v5 = vld [vmem:[%s932_s1 + $0x70] sm:$0xff]  ;;  %v697_v9 = vld [vmem:[%s932_s1 + $0x68] sm:$0xff] }
   0x3   :  { %v707_v2 = vld [vmem:[%s932_s1 + $0xb8] sm:$0xff]  ;;  %395 = vmatpush.bf16.msra.mxu1 %v699_v1  ;;  %v706_v6 = vld [vmem:[%s932_s1 + $0xb0] sm:$0xff]  ;;  %v705_v10 = vld [vmem:[%s932_s1 + $0xa8] sm:$0xff] }
   0x4   :  { %v715_v3 = vld [vmem:[%s932_s1 + $0xf8] sm:$0xff]  ;;  %414 = vmatpush.bf16.msra.mxu2 %v707_v2  ;;  %v714_v7 = vld [vmem:[%s932_s1 + $0xf0] sm:$0xff]  ;;  %v713_v11 = vld [vmem:[%s932_s1 + $0xe8] sm:$0xff] }
   0x5   :  { %433 = vmatpush.bf16.msra.mxu3 %v715_v3  ;;  %v688_v12 = vld [vmem:[%s932_s1 + $0x20] sm:$0xff]  ;;  %v687_v16 = vld [vmem:[%s932_s1 + $0x18] sm:$0xff]  ;;  %v686_v20 = vld [vmem:[%s932_s1 + $0x10] sm:$0xff] }
   0x6   :  { %377 = vmatpush.bf16.msra.mxu0 %v690_v4  ;;  %v696_v13 = vld [vmem:[%s932_s1 + $0x60] sm:$0xff]  ;;  %v695_v17 = vld [vmem:[%s932_s1 + $0x58] sm:$0xff]  ;;  %v694_v21 = vld [vmem:[%s932_s1 + $0x50] sm:$0xff] }
   0x7   :  { %396 = vmatpush.bf16.msra.mxu1 %v698_v5  ;;  %v704_v14 = vld [vmem:[%s932_s1 + $0xa0] sm:$0xff]  ;;  %v703_v18 = vld [vmem:[%s932_s1 + $0x98] sm:$0xff]  ;;  %v702_v22 = vld [vmem:[%s932_s1 + $0x90] sm:$0xff] }
   0x8   :  { %415 = vmatpush.bf16.msra.mxu2 %v706_v6  ;;  %v712_v15 = vld [vmem:[%s932_s1 + $0xe0] sm:$0xff]  ;;  %v711_v19 = vld [vmem:[%s932_s1 + $0xd8] sm:$0xff]  ;;  %v710_v23 = vld [vmem:[%s932_s1 + $0xd0] sm:$0xff] }
   0x9   :  { %434 = vmatpush.bf16.msra.mxu3 %v714_v7  ;;  %v685_v24 = vld [vmem:[%s932_s1 + $0x8] sm:$0xff]  ;;  %v684_v28 = vld [vmem:[%s932_s1] sm:$0xff]  ;;  %v676_v33 = vld [vmem:[%s934_s0 + $0x10] sm:$0xf0] }
   0xa   :  { %378 = vmatpush.bf16.msra.mxu0 %v689_v8  ;;  %v693_v25 = vld [vmem:[%s932_s1 + $0x48] sm:$0xff]  ;;  %v692_v29 = vld [vmem:[%s932_s1 + $0x40] sm:$0xff]  ;;  %v492_v35 = vld [vmem:[%s934_s0 + $0x14] sm:$0xf0] }
   0xb   :  { %397 = vmatpush.bf16.msra.mxu1 %v697_v9  ;;  %v701_v26 = vld [vmem:[%s932_s1 + $0x88] sm:$0xff]  ;;  %v700_v30 = vld [vmem:[%s932_s1 + $0x80] sm:$0xff]  ;;  %v677_v37 = vld [vmem:[%s934_s0 + $0x18] sm:$0xf0] }
   0xc   :  { %416 = vmatpush.bf16.msra.mxu2 %v705_v10  ;;  %v709_v27 = vld [vmem:[%s932_s1 + $0xc8] sm:$0xff]  ;;  %v708_v31 = vld [vmem:[%s932_s1 + $0xc0] sm:$0xff]  ;;  %v719_v40 = vld [vmem:[%s932_s1 + $0x118] sm:$0xff] }
   0xd   :  { %435 = vmatpush.bf16.msra.mxu3 %v713_v11  ;;  %v490_v32 = vld [vmem:[%s934_s0] sm:$0xf]  ;;  %v674_v34 = vld [vmem:[%s934_s0 + $0x4] sm:$0xf]  ;;  %v498_v36 = vld [vmem:[%s934_s0 + $0x8] sm:$0xf] }
   0xe   :  { %379 = vmatpush.bf16.msra.mxu0 %v688_v12  ;;  %v675_v38 = vld [vmem:[%s934_s0 + $0xc] sm:$0xf]  ;;  %v500_v39 = vld [vmem:[%s934_s0 + $0x1c] sm:$0xf0]  ;;  %v491_v41 = vor.u32 %v676_v33, %v490_v32  ;;  %v495_v42 = vor.u32 %v674_v34, %v492_v35  ;;  %v499_v43 = vor.u32 %v677_v37, %v498_v36  ;;  %v718_v45 = vld [vmem:[%s932_s1 + $0x110] sm:$0xff] }
   0xf   :  { %398 = vmatpush.bf16.msra.mxu1 %v696_v13  ;;  %v503_v44 = vor.u32 %v675_v38, %v500_v39  ;;  %v717_v46 = vld [vmem:[%s932_s1 + $0x108] sm:$0xff]  ;;  %v716_v47 = vld [vmem:[%s932_s1 + $0x100] sm:$0xff]  ;;  %v681_v49 = vld [vmem:[%s934_s0 + $0x38] sm:$0xf0] }
  0x10   :  { %417 = vmatpush.bf16.msra.mxu2 %v704_v14  ;;  %v510_v48 = vld [vmem:[%s934_s0 + $0x28] sm:$0xf]  ;;  %v679_v50 = vld [vmem:[%s934_s0 + $0x2c] sm:$0xf]  ;;  %v512_v51 = vld [vmem:[%s934_s0 + $0x3c] sm:$0xf0] }
  0x11   :  { %436 = vmatpush.bf16.msra.mxu3 %v712_v15  ;;  %v518_v52 = vld [vmem:[%s934_s0 + $0x30] sm:$0xf]  ;;  %v682_v53 = vld [vmem:[%s934_s0 + $0x40] sm:$0xf0]  ;;  %v680_v54 = vld [vmem:[%s934_s0 + $0x34] sm:$0xf]  ;;  %v511_v56 = vor.u32 %v681_v49, %v510_v48  ;;  %v515_v57 = vor.u32 %v679_v50, %v512_v51 }
  0x12   :  { %380 = vmatpush.bf16.msra.mxu0 %v687_v16  ;;  %v520_v55 = vld [vmem:[%s934_s0 + $0x44] sm:$0xf0]  ;;  %v519_v58 = vor.u32 %v682_v53, %v518_v52  ;;  %v506_v60 = vld [vmem:[%s934_s0 + $0x10] sm:$0xf]  ;;  %v678_v61 = vld [vmem:[%s934_s0 + $0x20] sm:$0xf0] }
  0x13   :  { %399 = vmatpush.bf16.msra.mxu1 %v695_v17  ;;  %v523_v59 = vor.u32 %v680_v54, %v520_v55  ;;  %v526_v62 = vld [vmem:[%s934_s0 + $0x38] sm:$0xf]  ;;  %v683_v63 = vld [vmem:[%s934_s0 + $0x48] sm:$0xf0]  ;;  %v507_v0 = vor.u32 %v678_v61, %v506_v60  ;;  %v724_v11 = vld [vmem:[%s933_s2] ss:$0 sm:$0xff] }
  0x14   :  { %418 = vmatpush.bf16.msra.mxu2 %v703_v18  ;;  %v527_v1 = vor.u32 %v683_v63, %v526_v62 }
  0x15   :  { %437 = vmatpush.bf16.msra.mxu3 %v711_v19 }
  0x16   :  { %381 = vmatpush.bf16.msra.mxu0 %v686_v20 }
  0x17   :  { %400 = vmatpush.bf16.msra.mxu1 %v694_v21 }
  0x18   :  { %419 = vmatpush.bf16.msra.mxu2 %v702_v22 }
  0x19   :  { %438 = vmatpush.bf16.msra.mxu3 %v710_v23 }
  0x1a   :  { %382 = vmatpush.bf16.msra.mxu0 %v685_v24 }
  0x1b   :  { %401 = vmatpush.bf16.msra.mxu1 %v693_v25 }
  0x1c   :  { %420 = vmatpush.bf16.msra.mxu2 %v701_v26 }
  0x1d   :  { %439 = vmatpush.bf16.msra.mxu3 %v709_v27 }
  0x1e   :  { %383 = vmatpush.bf16.msra.mxu0 %v684_v28 }
  0x1f   :  { %402 = vmatpush.bf16.msra.mxu1 %v692_v29 }
  0x20   :  { %421 = vmatpush.bf16.msra.mxu2 %v700_v30 }
  0x21   :  { %440 = vmatpush.bf16.msra.mxu3 %v708_v31  ;;  %384 = vmatmul.bf16.vlgmr.msra.gmra.mxu0 %v491_v41 }
  0x22   :  { %456 = vmatpush.bf16.msrb.mxu0 %v719_v40  ;;  %403 = vmatmul.bf16.vlgmr.msra.gmra.mxu1 %v495_v42 }
  0x23   :  { %720 = vmatpush.bf16.msrb.mxu1 %v719_v40  ;;  %422 = vmatmul.bf16.vlgmr.msra.gmra.mxu2 %v499_v43 }
  0x24   :  { %441 = vmatmul.bf16.vlgmr.msra.gmra.mxu3 %v503_v44 }
  0x26   :  { %457 = vmatpush.bf16.msrb.mxu0 %v718_v45 }
  0x27   :  { %721 = vmatpush.bf16.msrb.mxu1 %v718_v45 }
  0x2a   :  { %458 = vmatpush.bf16.msrb.mxu0 %v717_v46 }
  0x2b   :  { %722 = vmatpush.bf16.msrb.mxu1 %v717_v46 }
  0x2e   :  { %459 = vmatpush.bf16.msrb.mxu0 %v716_v47 }
  0x2f   :  { %723 = vmatpush.bf16.msrb.mxu1 %v716_v47 }
  0x31   :  { %389 = vmatmul.bf16.gmra.mxu0 %v511_v56 }
  0x32   :  { %408 = vmatmul.bf16.gmra.mxu1 %v515_v57 }
  0x33   :  { %427 = vmatmul.bf16.gmra.mxu2 %v519_v58 }
  0x34   :  { %446 = vmatmul.bf16.gmra.mxu3 %v523_v59 }
  0x41   :  { %672 = vmatmul.msk.bf16.vlgmr.msrb.gmra.mxu0 %vm369_vm0, %v507_v0 }
  0x42   :  { %673 = vmatmul.msk.bf16.vlgmr.msrb.gmra.mxu1 %vm369_vm0, %v527_v1 }
  0x9e   :  { %v385_v2 = vpop.f32.mrf.mxu0 }
  0x9f   :  { %v404_v3 = vpop.f32.mrf.mxu1  ;;  %v386_v13 = vadd.f32 %v724_v11, %v385_v2 }
  0xa1   :  { %v405_v18 = vadd.f32 %v404_v3, %v386_v13 }
  0xa6   :  { %v423_v4 = vpop.f32.mrf.mxu2  ;;  %v387_v6 = vpop.f32.mrf.mxu0 }
  0xa7   :  { %v442_v5 = vpop.f32.mrf.mxu3  ;;  %v406_v7 = vpop.f32.mrf.mxu1  ;;  %v424_v20 = vadd.f32 %v423_v4, %v405_v18  ;;  %v388_v23 = vadd.f32 %v724_v11, %v387_v6 }
  0xa9   :  { %v443_v25 = vadd.f32 %v442_v5, %v424_v20  ;;  %v407_v30 = vadd.f32 %v406_v7, %v388_v23 }
  0xae   :  { %v425_v8 = vpop.f32.mrf.mxu2  ;;  %v390_v9 = vpop.f32.mrf.mxu0 }
  0xaf   :  { %v409_v10 = vpop.f32.mrf.mxu1  ;;  %v444_v12 = vpop.f32.mrf.mxu3  ;;  %v391_v14 = vadd.f32 %v724_v11, %v390_v9  ;;  %v426_v34 = vadd.f32 %v425_v8, %v407_v30 }
  0xb1   :  { %v410_v19 = vadd.f32 %v409_v10, %v391_v14  ;;  %v445_v41 = vadd.f32 %v444_v12, %v426_v34 }
  0xb6   :  { %v428_v15 = vpop.f32.mrf.mxu2  ;;  %v392_v16 = vpop.f32.mrf.mxu0 }
  0xb7   :  { %v411_v17 = vpop.f32.mrf.mxu1  ;;  %v429_v21 = vadd.f32 %v428_v15, %v410_v19  ;;  %v447_v22 = vpop.f32.mrf.mxu3  ;;  %v393_v24 = vadd.f32 %v724_v11, %v392_v16 }
  0xb9   :  { %v448_v26 = vadd.f32 %v447_v22, %v429_v21  ;;  %v412_v31 = vadd.f32 %v411_v17, %v393_v24 }
  0xbe   :  { %v430_v27 = vpop.f32.mrf.mxu2  ;;  %v461_v28 = vpop.f32.mrf.mxu0 }
  0xbf   :  { %v466_v29 = vpop.f32.mrf.mxu1  ;;  %v462_v32 = vadd.f32 %v461_v28, %v443_v25  ;;  %v431_v35 = vadd.f32 %v430_v27, %v412_v31  ;;  %v449_v40 = vpop.f32.mrf.mxu3 }
  0xc0   :  { %v467_v33 = vadd.f32 %v466_v29, %v448_v26 }
  0xc1   :  { %v471_v36 = vmax.f32 %v462_v32, 0.0  ;;  %v450_v42 = vadd.f32 %v449_v40, %v431_v35 }
  0xc2   :  { %v473_v37 = vmax.f32 %v467_v33, 0.0 }
  0xc3   :  { %v475_v38 = vpack.c.bf16 %v471_v36, %v471_v36 }
  0xc4   :  { %v477_v39 = vpack.c.bf16 %v473_v37, %v473_v37 }
  0xc5   :  { %480 = vst.msk [vmem:[%s935_s3] sm:$0xf] %vm479_vm1, %v475_v38 }
  0xc6   :  { %482 = vst.msk [vmem:[%s935_s3 + $0x8] sm:$0xf] %vm479_vm1, %v477_v39  ;;  %v463_v43 = vpop.f32.mrf.mxu0 }
  0xc7   :  { %v468_v44 = vpop.f32.mrf.mxu1  ;;  %v464_v45 = vadd.f32 %v463_v43, %v445_v41 }
  0xc8   :  { %v469_v46 = vadd.f32 %v468_v44, %v450_v42 }
  0xc9   :  { %v472_v47 = vmax.f32 %v464_v45, 0.0 }
  0xca   :  { %v474_v48 = vmax.f32 %v469_v46, 0.0 }
  0xcb   :  { %v476_v49 = vpack.c.bf16 %v472_v47, %v472_v47 }
  0xcc   :  { %v478_v50 = vpack.c.bf16 %v474_v48, %v474_v48 }
  0xcd   :  { %481 = vst.msk [vmem:[%s935_s3 + $0x4] sm:$0xf] %vm479_vm1, %v476_v49 }
  0xce   :  { %483 = vst.msk [vmem:[%s935_s3 + $0xc] sm:$0xf] %vm479_vm1, %v478_v50 }

// kernel: base_encoder_forward.14
= control target key start
LH: loop header
LB: loop body
LE: loop exit
PB: predicated region body
PF: predicated region fallthrough
CT: control target
= control target key end

     0   :  { %s356_s1 = inlined_call_operand.vmem [shape: bf16[128,256], index: 1, kind: input, shape index: {}]   ;;  %s357_s0 = inlined_call_operand.vmem [shape: bf16[8,128], index: 0, kind: input, shape index: {}]   ;;  %s358_s2 = inlined_call_operand.vmem [shape: f32[1,256], index: 2, kind: input, shape index: {}]   ;;  %s359_s3 = inlined_call_operand.vmem [shape: bf16[8,256], index: 3, kind: output, shape index: {}]  }
   0x1   :  { %v209_v0 = vld [vmem:[%s356_s1 + $0x70] sm:$0xf]  ;;  %v230_v1 = vld [vmem:[%s356_s1 + $0x74] sm:$0xf0]  ;;  %v229_v2 = vld [vmem:[%s356_s1 + $0x74] sm:$0xf] }
   0x2   :  { %v210_v3 = vor.u32 %v230_v1, %v209_v0  ;;  %v211_v4 = vld [vmem:[%s356_s1 + $0x78] sm:$0xf0]  ;;  %v201_v5 = vld [vmem:[%s356_s1 + $0x60] sm:$0xf]  ;;  %v228_v6 = vld [vmem:[%s356_s1 + $0x64] sm:$0xf0] }
   0x3   :  { %v214_v7 = vor.u32 %v229_v2, %v211_v4  ;;  %v227_v8 = vld [vmem:[%s356_s1 + $0x64] sm:$0xf]  ;;  %v203_v9 = vld [vmem:[%s356_s1 + $0x68] sm:$0xf0]  ;;  %v202_v10 = vor.u32 %v228_v6, %v201_v5  ;;  %v193_v12 = vld [vmem:[%s356_s1 + $0x50] sm:$0xf] }
   0x4   :  { %117 = vmatpush.bf16.msra.mxu0 %v210_v3  ;;  %v206_v11 = vor.u32 %v227_v8, %v203_v9  ;;  %v226_v13 = vld [vmem:[%s356_s1 + $0x54] sm:$0xf0]  ;;  %v225_v14 = vld [vmem:[%s356_s1 + $0x54] sm:$0xf]  ;;  %v195_v15 = vld [vmem:[%s356_s1 + $0x58] sm:$0xf0] }
   0x5   :  { %130 = vmatpush.bf16.msra.mxu1 %v214_v7  ;;  %v194_v16 = vor.u32 %v226_v13, %v193_v12  ;;  %v198_v17 = vor.u32 %v225_v14, %v195_v15  ;;  %v185_v18 = vld [vmem:[%s356_s1 + $0x40] sm:$0xf]  ;;  %v224_v19 = vld [vmem:[%s356_s1 + $0x44] sm:$0xf0]  ;;  %v223_v20 = vld [vmem:[%s356_s1 + $0x44] sm:$0xf] }
   0x6   :  { %v187_v21 = vld [vmem:[%s356_s1 + $0x48] sm:$0xf0]  ;;  %v186_v22 = vor.u32 %v224_v19, %v185_v18  ;;  %v177_v24 = vld [vmem:[%s356_s1 + $0x30] sm:$0xf]  ;;  %v222_v25 = vld [vmem:[%s356_s1 + $0x34] sm:$0xf0] }
   0x7   :  { %v190_v23 = vor.u32 %v223_v20, %v187_v21  ;;  %v221_v26 = vld [vmem:[%s356_s1 + $0x34] sm:$0xf]  ;;  %v179_v27 = vld [vmem:[%s356_s1 + $0x38] sm:$0xf0]  ;;  %v178_v28 = vor.u32 %v222_v25, %v177_v24  ;;  %v169_v30 = vld [vmem:[%s356_s1 + $0x20] sm:$0xf] }
   0x8   :  { %118 = vmatpush.bf16.msra.mxu0 %v202_v10  ;;  %v182_v29 = vor.u32 %v221_v26, %v179_v27  ;;  %v220_v31 = vld [vmem:[%s356_s1 + $0x24] sm:$0xf0]  ;;  %v219_v32 = vld [vmem:[%s356_s1 + $0x24] sm:$0xf]  ;;  %v171_v33 = vld [vmem:[%s356_s1 + $0x28] sm:$0xf0] }
   0x9   :  { %131 = vmatpush.bf16.msra.mxu1 %v206_v11  ;;  %v170_v34 = vor.u32 %v220_v31, %v169_v30  ;;  %v174_v35 = vor.u32 %v219_v32, %v171_v33  ;;  %v161_v36 = vld [vmem:[%s356_s1 + $0x10] sm:$0xf]  ;;  %v218_v37 = vld [vmem:[%s356_s1 + $0x14] sm:$0xf0]  ;;  %v217_v38 = vld [vmem:[%s356_s1 + $0x14] sm:$0xf] }
   0xa   :  { %v163_v39 = vld [vmem:[%s356_s1 + $0x18] sm:$0xf0]  ;;  %v162_v40 = vor.u32 %v218_v37, %v161_v36  ;;  %v153_v42 = vld [vmem:[%s356_s1] sm:$0xf]  ;;  %v216_v43 = vld [vmem:[%s356_s1 + $0x4] sm:$0xf0] }
   0xb   :  { %v166_v41 = vor.u32 %v217_v38, %v163_v39  ;;  %v215_v44 = vld [vmem:[%s356_s1 + $0x4] sm:$0xf]  ;;  %v155_v45 = vld [vmem:[%s356_s1 + $0x8] sm:$0xf0]  ;;  %v154_v46 = vor.u32 %v216_v43, %v153_v42  ;;  %v14_v48 = vld [vmem:[%s357_s0] sm:$0xf] }
   0xc   :  { %119 = vmatpush.bf16.msra.mxu0 %v194_v16  ;;  %v158_v47 = vor.u32 %v215_v44, %v155_v45  ;;  %v31_v49 = vld [vmem:[%s358_s2] sm:$0x3] }
   0xd   :  { %132 = vmatpush.bf16.msra.mxu1 %v198_v17  ;;  %v33_v50 = vperm.slane %v31_v49, 0  ;;  %v34_v51 = vperm.slane %v31_v49, 1 }
  0x10   :  { %120 = vmatpush.bf16.msra.mxu0 %v186_v22 }
  0x11   :  { %133 = vmatpush.bf16.msra.mxu1 %v190_v23 }
  0x14   :  { %121 = vmatpush.bf16.msra.mxu0 %v178_v28 }
  0x15   :  { %134 = vmatpush.bf16.msra.mxu1 %v182_v29 }
  0x18   :  { %122 = vmatpush.bf16.msra.mxu0 %v170_v34 }
  0x19   :  { %135 = vmatpush.bf16.msra.mxu1 %v174_v35 }
  0x1c   :  { %123 = vmatpush.bf16.msra.mxu0 %v162_v40 }
  0x1d   :  { %136 = vmatpush.bf16.msra.mxu1 %v166_v41 }
  0x20   :  { %124 = vmatpush.bf16.msra.mxu0 %v154_v46 }
  0x21   :  { %137 = vmatpush.bf16.msra.mxu1 %v158_v47 }
  0x23   :  { %125 = vmatmul.bf16.vlgmr.msra.gmra.mxu0 %v14_v48 }
  0x24   :  { %138 = vmatmul.bf16.vlgmr.msra.gmra.mxu1 %v14_v48 }
  0xa0   :  { %v126_v52 = vpop.f32.mrf.mxu0 }
  0xa1   :  { %v127_v53 = vadd.f32 %v126_v52, %v33_v50  ;;  %v139_v54 = vpop.f32.mrf.mxu1 }
  0xa2   :  { %v140_v55 = vadd.f32 %v139_v54, %v34_v51 }
  0xa3   :  { %v143_v56 = vmax.f32 %v127_v53, 0.0 }
  0xa4   :  { %v144_v57 = vmax.f32 %v140_v55, 0.0 }
  0xa6   :  { %v145_v58 = vpack.c.bf16 %v144_v57, %v143_v56 }
  0xa8   :  { %146 = vst [vmem:[%s359_s3] sm:$0xff] %v145_v58  ;;  %v128_v59 = vpop.f32.mrf.mxu0 }
  0xa9   :  { %v141_v60 = vpop.f32.mrf.mxu1 }

// kernel: base_encoder_forward.15
= control target key start
LH: loop header
LB: loop body
LE: loop exit
PB: predicated region body
PF: predicated region fallthrough
CT: control target
= control target key end

     0   :  { %vm22_vm0 = vcmask 64512   ;;  %s324_s0 = inlined_call_operand.vmem [shape: bf16[8,256], index: 0, kind: input, shape index: {}]   ;;  %s325_s1 = inlined_call_operand.vmem [shape: f32[2,8], index: 1, kind: input, shape index: {}]   ;;  %s326_s2 = inlined_call_operand.vmem [shape: f32[256,10], index: 2, kind: input, shape index: {}]   ;;  %s327_s3 = inlined_call_operand.vmem [shape: f32[1,10], index: 3, kind: input, shape index: {}]   ;;  %s328_s4 = inlined_call_operand.hbm [shape: f32[2,10], index: 4, kind: output, shape index: {}]  }
   0x1   :  { %v18_v0 = vld [vmem:[%s324_s0] sm:$0xff]  ;;  %v81_v1 = vld [vmem:[%s326_s2 + $0x78] sm:$0xff]  ;;  %v80_v6 = vld [vmem:[%s326_s2 + $0x70] sm:$0xff] }
   0x2   :  { %v19_v2 = vunpack.c.l.bf16 %v18_v0  ;;  %v21_v3 = vld [vmem:[%s325_s1] sm:$0x3]  ;;  %v20_v4 = vunpack.c.h.bf16 %v18_v0  ;;  %102 = vmatpush.msra.mxu2 %v81_v1  ;;  %v97_v5 = vld [vmem:[%s326_s2 + $0xf8] sm:$0xff]  ;;  %v96_v7 = vld [vmem:[%s326_s2 + $0xf0] sm:$0xff] }
   0x3   :  { %122 = vmatpush.msra.mxu3 %v97_v5  ;;  %v79_v8 = vld [vmem:[%s326_s2 + $0x68] sm:$0xff]  ;;  %v78_v10 = vld [vmem:[%s326_s2 + $0x60] sm:$0xff]  ;;  %v77_v12 = vld [vmem:[%s326_s2 + $0x58] sm:$0xff] }
   0x4   :  { %41 = vmatpush.msra.mxu0 %v19_v2  ;;  %61 = vmatpush.msra.mxu1 %v20_v4  ;;  %v95_v9 = vld [vmem:[%s326_s2 + $0xe8] sm:$0xff]  ;;  %v94_v11 = vld [vmem:[%s326_s2 + $0xe0] sm:$0xff]  ;;  %v93_v13 = vld [vmem:[%s326_s2 + $0xd8] sm:$0xff] }
   0x5   :  { %160 = vmatmul.msk.f32.vlgmr.msra.gmra.mxu0 %vm22_vm0, %v21_v3  ;;  %161 = vmatmul.msk.f32.vlgmr.msra.gmra.mxu1 %vm22_vm0, %v21_v3  ;;  %v76_v14 = vld [vmem:[%s326_s2 + $0x50] sm:$0xff] }
   0x6   :  { %103 = vmatpush.msra.mxu2 %v80_v6  ;;  %123 = vmatpush.msra.mxu3 %v96_v7  ;;  %v92_v15 = vld [vmem:[%s326_s2 + $0xd0] sm:$0xff] }
   0x8   :  { %104 = vmatpush.msra.mxu2 %v79_v8  ;;  %124 = vmatpush.msra.mxu3 %v95_v9 }
   0xa   :  { %105 = vmatpush.msra.mxu2 %v78_v10  ;;  %125 = vmatpush.msra.mxu3 %v94_v11 }
   0xb   :  { %9 = vsyncpa [#allocation3], 0  ;;  %v75_v16 = vld [vmem:[%s326_s2 + $0x48] sm:$0xff]  ;;  %v74_v18 = vld [vmem:[%s326_s2 + $0x40] sm:$0xff]  ;;  %s190_s27 = smov [#allocation2]   ;;  %s151_s5 = sshll.u32 %s328_s4, 4  ;;  %s152_s5 = int_to_ptr.hbm [resolvable:$true] %s151_s5 }
   0xc   :  { %106 = vmatpush.msra.mxu2 %v77_v12  ;;  %126 = vmatpush.msra.mxu3 %v93_v13  ;;  %v91_v17 = vld [vmem:[%s326_s2 + $0xc8] sm:$0xff]  ;;  %v90_v19 = vld [vmem:[%s326_s2 + $0xc0] sm:$0xff]  ;;  %v73_v20 = vld [vmem:[%s326_s2 + $0x38] sm:$0xff]  ;;  %s149_s28 = sshll.u32 %s190_s27, 4  ;;  %vm142_vm1 = vcmask 74752   ;;  %s150_s28 = int_to_ptr.vmem [resolvable:$true] %s149_s28 }
   0xd   :  { %v89_v21 = vld [vmem:[%s326_s2 + $0xb8] sm:$0xff]  ;;  %v72_v22 = vld [vmem:[%s326_s2 + $0x30] sm:$0xff]  ;;  %v71_v24 = vld [vmem:[%s326_s2 + $0x28] sm:$0xff] }
   0xe   :  { %107 = vmatpush.msra.mxu2 %v76_v14  ;;  %127 = vmatpush.msra.mxu3 %v92_v15  ;;  %v88_v23 = vld [vmem:[%s326_s2 + $0xb0] sm:$0xff]  ;;  %v87_v25 = vld [vmem:[%s326_s2 + $0xa8] sm:$0xff]  ;;  %v70_v26 = vld [vmem:[%s326_s2 + $0x20] sm:$0xff] }
   0xf   :  { %v86_v27 = vld [vmem:[%s326_s2 + $0xa0] sm:$0xff]  ;;  %v69_v28 = vld [vmem:[%s326_s2 + $0x18] sm:$0xff]  ;;  %v68_v30 = vld [vmem:[%s326_s2 + $0x10] sm:$0xff] }
  0x10   :  { %108 = vmatpush.msra.mxu2 %v75_v16  ;;  %128 = vmatpush.msra.mxu3 %v91_v17  ;;  %v85_v29 = vld [vmem:[%s326_s2 + $0x98] sm:$0xff]  ;;  %v84_v31 = vld [vmem:[%s326_s2 + $0x90] sm:$0xff]  ;;  %v67_v32 = vld [vmem:[%s326_s2 + $0x8] sm:$0xff] }
  0x11   :  { %v66_v33 = vld [vmem:[%s326_s2] sm:$0xff]  ;;  %v83_v34 = vld [vmem:[%s326_s2 + $0x88] sm:$0xff] }
  0x12   :  { %109 = vmatpush.msra.mxu2 %v74_v18  ;;  %129 = vmatpush.msra.mxu3 %v90_v19  ;;  %v82_v35 = vld [vmem:[%s326_s2 + $0x80] sm:$0xff] }
  0x13   :  { %v163_v38 = vld [vmem:[%s327_s3] ss:$0 sm:$0xff] }
  0x14   :  { %110 = vmatpush.msra.mxu2 %v73_v20  ;;  %130 = vmatpush.msra.mxu3 %v89_v21 }
  0x16   :  { %111 = vmatpush.msra.mxu2 %v72_v22  ;;  %131 = vmatpush.msra.mxu3 %v88_v23 }
  0x18   :  { %112 = vmatpush.msra.mxu2 %v71_v24  ;;  %132 = vmatpush.msra.mxu3 %v87_v25 }
  0x1a   :  { %113 = vmatpush.msra.mxu2 %v70_v26  ;;  %133 = vmatpush.msra.mxu3 %v86_v27 }
  0x1c   :  { %114 = vmatpush.msra.mxu2 %v69_v28  ;;  %134 = vmatpush.msra.mxu3 %v85_v29 }
  0x1e   :  { %115 = vmatpush.msra.mxu2 %v68_v30  ;;  %135 = vmatpush.msra.mxu3 %v84_v31 }
  0x20   :  { %116 = vmatpush.msra.mxu2 %v67_v32  ;;  %136 = vmatpush.msra.mxu3 %v83_v34 }
  0x22   :  { %117 = vmatpush.msra.mxu2 %v66_v33  ;;  %137 = vmatpush.msra.mxu3 %v82_v35 }
  0x82   :  { %v43_v36 = vpop.f32.mrf.mxu0  ;;  %v63_v37 = vpop.f32.mrf.mxu1 }
  0x83   :  { %118 = vmatmul.f32.vlgmr.msra.gmra.mxu2 %v43_v36  ;;  %138 = vmatmul.f32.vlgmr.msra.gmra.mxu3 %v63_v37 }
 0x106   :  { %v119_v39 = vpop.f32.mrf.mxu2  ;;  %v139_v40 = vpop.f32.mrf.mxu3 }
 0x107   :  { %v120_v41 = vadd.f32 %v163_v38, %v119_v39 }
 0x109   :  { %v140_v42 = vadd.f32 %v139_v40, %v120_v41 }
 0x10b   :  { %143 = vst.msk [vmem:[#allocation2] sm:$0x3] %vm142_vm1, %v140_v42 }
 0x10c   :  { %154 = dma.vmem_to_hbm [thread:$0]  %s150_s28, 32, %s152_s5, [#allocation3]  }
 0x10d   :  { %188 = dma.done.wait [#allocation3], 32  }
 0x10e   :  { %189 = vsyncadd [#allocation3], 4294967264 }
 0x10f   :  { %159 = vsyncpa [#allocation3], 1 }

// kernel: base_encoder_forward.13
= control target key start
LH: loop header
LB: loop body
LE: loop exit
PB: predicated region body
PF: predicated region fallthrough
CT: control target
= control target key end

     0   :  { %vm479_vm0 = vcmask 785408   ;;  %s1053_s1 = inlined_call_operand.vmem [shape: bf16[864,128], index: 1, kind: input, shape index: {}]   ;;  %s1054_s2 = inlined_call_operand.vmem [shape: f32[1,128], index: 2, kind: input, shape index: {}]   ;;  %s1055_s0 = inlined_call_operand.vmem [shape: bf16[8,864], index: 0, kind: input, shape index: {}]   ;;  %s1056_s3 = inlined_call_operand.vmem [shape: bf16[8,128], index: 3, kind: output, shape index: {}]  }
   0x1   :  { %v805_v0 = vld [vmem:[%s1053_s1 + $0x38] sm:$0xff]  ;;  %v804_v3 = vld [vmem:[%s1053_s1 + $0x30] sm:$0xff]  ;;  %v803_v7 = vld [vmem:[%s1053_s1 + $0x28] sm:$0xff] }
   0x2   :  { %v813_v1 = vld [vmem:[%s1053_s1 + $0x78] sm:$0xff]  ;;  %483 = vmatpush.bf16.msra.mxu0 %v805_v0  ;;  %v812_v4 = vld [vmem:[%s1053_s1 + $0x70] sm:$0xff]  ;;  %v811_v8 = vld [vmem:[%s1053_s1 + $0x68] sm:$0xff] }
   0x3   :  { %v821_v2 = vld [vmem:[%s1053_s1 + $0xb8] sm:$0xff]  ;;  %496 = vmatpush.bf16.msra.mxu1 %v813_v1  ;;  %v820_v5 = vld [vmem:[%s1053_s1 + $0xb0] sm:$0xff]  ;;  %v819_v9 = vld [vmem:[%s1053_s1 + $0xa8] sm:$0xff] }
   0x4   :  { %509 = vmatpush.bf16.msra.mxu2 %v821_v2  ;;  %v829_v6 = vld [vmem:[%s1053_s1 + $0xf8] sm:$0xff]  ;;  %v828_v10 = vld [vmem:[%s1053_s1 + $0xf0] sm:$0xff]  ;;  %v802_v11 = vld [vmem:[%s1053_s1 + $0x20] sm:$0xff] }
   0x5   :  { %522 = vmatpush.bf16.msra.mxu3 %v829_v6  ;;  %v810_v12 = vld [vmem:[%s1053_s1 + $0x60] sm:$0xff]  ;;  %v827_v14 = vld [vmem:[%s1053_s1 + $0xe8] sm:$0xff]  ;;  %v801_v15 = vld [vmem:[%s1053_s1 + $0x18] sm:$0xff] }
   0x6   :  { %484 = vmatpush.bf16.msra.mxu0 %v804_v3  ;;  %v818_v13 = vld [vmem:[%s1053_s1 + $0xa0] sm:$0xff]  ;;  %v809_v16 = vld [vmem:[%s1053_s1 + $0x58] sm:$0xff]  ;;  %v800_v19 = vld [vmem:[%s1053_s1 + $0x10] sm:$0xff] }
   0x7   :  { %497 = vmatpush.bf16.msra.mxu1 %v812_v4  ;;  %v817_v17 = vld [vmem:[%s1053_s1 + $0x98] sm:$0xff]  ;;  %v826_v18 = vld [vmem:[%s1053_s1 + $0xe0] sm:$0xff]  ;;  %v808_v20 = vld [vmem:[%s1053_s1 + $0x50] sm:$0xff] }
   0x8   :  { %510 = vmatpush.bf16.msra.mxu2 %v820_v5  ;;  %v816_v21 = vld [vmem:[%s1053_s1 + $0x90] sm:$0xff]  ;;  %v825_v22 = vld [vmem:[%s1053_s1 + $0xd8] sm:$0xff]  ;;  %v799_v23 = vld [vmem:[%s1053_s1 + $0x8] sm:$0xff] }
   0x9   :  { %523 = vmatpush.bf16.msra.mxu3 %v828_v10  ;;  %v807_v24 = vld [vmem:[%s1053_s1 + $0x48] sm:$0xff]  ;;  %v15_v25 = vld [vmem:[%s1055_s0] sm:$0xff]  ;;  %v824_v27 = vld [vmem:[%s1053_s1 + $0xd0] sm:$0xff] }
   0xa   :  { %485 = vmatpush.bf16.msra.mxu0 %v803_v7  ;;  %v815_v26 = vld [vmem:[%s1053_s1 + $0x88] sm:$0xff]  ;;  %v135_v29 = vunpack.c.l.b16 %v15_v25  ;;  %v798_v30 = vld [vmem:[%s1053_s1] sm:$0xff]  ;;  %v136_v33 = vunpack.c.h.b16 %v15_v25  ;;  %v837_v35 = vld [vmem:[%s1053_s1 + $0x138] sm:$0xff] }
   0xb   :  { %498 = vmatpush.bf16.msra.mxu1 %v811_v8  ;;  %v16_v28 = vld [vmem:[%s1055_s0 + $0x8] sm:$0xff]  ;;  %v806_v31 = vld [vmem:[%s1053_s1 + $0x40] sm:$0xff]  ;;  %v845_v36 = vld [vmem:[%s1053_s1 + $0x178] sm:$0xff] }
   0xc   :  { %511 = vmatpush.bf16.msra.mxu2 %v819_v9  ;;  %v137_v32 = vunpack.c.l.b16 %v16_v28  ;;  %v814_v34 = vld [vmem:[%s1053_s1 + $0x80] sm:$0xff]  ;;  %v851_v37 = vld [vmem:[%s1053_s1 + $0x1a8] sm:$0xff]  ;;  %v142_v38 = vpack.c.b16 %v135_v29, %v135_v29  ;;  %v143_v41 = vpack.c.b16 %v136_v33, %v136_v33  ;;  %v836_v42 = vld [vmem:[%s1053_s1 + $0x130] sm:$0xff]  ;;  %v138_v46 = vunpack.c.h.b16 %v16_v28 }
   0xd   :  { %524 = vmatpush.bf16.msra.mxu3 %v827_v14  ;;  %v823_v39 = vld [vmem:[%s1053_s1 + $0xc8] sm:$0xff]  ;;  %v844_v43 = vld [vmem:[%s1053_s1 + $0x170] sm:$0xff]  ;;  %v850_v44 = vld [vmem:[%s1053_s1 + $0x1a0] sm:$0xff] }
   0xe   :  { %486 = vmatpush.bf16.msra.mxu0 %v802_v11  ;;  %v144_v40 = vpack.c.b16 %v137_v32, %v137_v32  ;;  %v822_v45 = vld [vmem:[%s1053_s1 + $0xc0] sm:$0xff]  ;;  %v835_v47 = vld [vmem:[%s1053_s1 + $0x128] sm:$0xff]  ;;  %v849_v49 = vld [vmem:[%s1053_s1 + $0x198] sm:$0xff]  ;;  %v145_v50 = vpack.c.b16 %v138_v46, %v138_v46 }
   0xf   :  { %499 = vmatpush.bf16.msra.mxu1 %v810_v12  ;;  %v843_v48 = vld [vmem:[%s1053_s1 + $0x168] sm:$0xff]  ;;  %v834_v51 = vld [vmem:[%s1053_s1 + $0x120] sm:$0xff]  ;;  %v848_v53 = vld [vmem:[%s1053_s1 + $0x190] sm:$0xff] }
  0x10   :  { %512 = vmatpush.bf16.msra.mxu2 %v818_v13  ;;  %v842_v52 = vld [vmem:[%s1053_s1 + $0x160] sm:$0xff]  ;;  %v833_v54 = vld [vmem:[%s1053_s1 + $0x118] sm:$0xff]  ;;  %v847_v56 = vld [vmem:[%s1053_s1 + $0x188] sm:$0xff] }
  0x11   :  { %525 = vmatpush.bf16.msra.mxu3 %v826_v18  ;;  %v841_v55 = vld [vmem:[%s1053_s1 + $0x158] sm:$0xff]  ;;  %v832_v58 = vld [vmem:[%s1053_s1 + $0x110] sm:$0xff]  ;;  %v846_v61 = vld [vmem:[%s1053_s1 + $0x180] sm:$0xff] }
  0x12   :  { %487 = vmatpush.bf16.msra.mxu0 %v801_v15  ;;  %v18_v57 = vld [vmem:[%s1055_s0 + $0x18] sm:$0xf]  ;;  %v840_v60 = vld [vmem:[%s1053_s1 + $0x150] sm:$0xff]  ;;  %v831_v63 = vld [vmem:[%s1053_s1 + $0x108] sm:$0xff] }
  0x13   :  { %500 = vmatpush.bf16.msra.mxu1 %v809_v16  ;;  %v141_v59 = vunpack.c.l.b16 %v18_v57  ;;  %v17_v0 = vld [vmem:[%s1055_s0 + $0x10] sm:$0xff]  ;;  %v839_v1 = vld [vmem:[%s1053_s1 + $0x148] sm:$0xff]  ;;  %v830_v3 = vld [vmem:[%s1053_s1 + $0x100] sm:$0xff] }
  0x14   :  { %513 = vmatpush.bf16.msra.mxu2 %v817_v17  ;;  %v139_v2 = vunpack.c.l.b16 %v17_v0  ;;  %v140_v4 = vunpack.c.h.b16 %v17_v0  ;;  %v838_v5 = vld [vmem:[%s1053_s1 + $0x140] sm:$0xff] }
  0x15   :  { %526 = vmatpush.bf16.msra.mxu3 %v825_v22  ;;  %v148_v62 = vpack.c.b16 %v141_v59, %v141_v59  ;;  %v852_v13 = vld [vmem:[%s1054_s2] ss:$0 sm:$0xff] }
  0x16   :  { %488 = vmatpush.bf16.msra.mxu0 %v800_v19  ;;  %v146_v6 = vpack.c.b16 %v139_v2, %v139_v2  ;;  %v147_v7 = vpack.c.b16 %v140_v4, %v140_v4 }
  0x17   :  { %501 = vmatpush.bf16.msra.mxu1 %v808_v20 }
  0x18   :  { %514 = vmatpush.bf16.msra.mxu2 %v816_v21 }
  0x19   :  { %527 = vmatpush.bf16.msra.mxu3 %v824_v27 }
  0x1a   :  { %489 = vmatpush.bf16.msra.mxu0 %v799_v23 }
  0x1b   :  { %502 = vmatpush.bf16.msra.mxu1 %v807_v24 }
  0x1c   :  { %515 = vmatpush.bf16.msra.mxu2 %v815_v26 }
  0x1d   :  { %528 = vmatpush.bf16.msra.mxu3 %v823_v39 }
  0x1e   :  { %490 = vmatpush.bf16.msra.mxu0 %v798_v30 }
  0x1f   :  { %503 = vmatpush.bf16.msra.mxu1 %v806_v31 }
  0x20   :  { %516 = vmatpush.bf16.msra.mxu2 %v814_v34 }
  0x21   :  { %491 = vmatmul.bf16.vlgmr.msra.gmra.mxu0 %v142_v38  ;;  %529 = vmatpush.bf16.msra.mxu3 %v822_v45 }
  0x22   :  { %535 = vmatpush.bf16.msrb.mxu0 %v837_v35  ;;  %504 = vmatmul.bf16.vlgmr.msra.gmra.mxu1 %v143_v41 }
  0x23   :  { %548 = vmatpush.bf16.msrb.mxu1 %v845_v36  ;;  %517 = vmatmul.bf16.vlgmr.msra.gmra.mxu2 %v144_v40 }
  0x24   :  { %563 = vmatpush.bf16.msrb.mxu2 %v851_v37  ;;  %530 = vmatmul.bf16.vlgmr.msra.gmra.mxu3 %v145_v50 }
  0x26   :  { %536 = vmatpush.bf16.msrb.mxu0 %v836_v42 }
  0x27   :  { %549 = vmatpush.bf16.msrb.mxu1 %v844_v43 }
  0x28   :  { %564 = vmatpush.bf16.msrb.mxu2 %v850_v44 }
  0x2a   :  { %537 = vmatpush.bf16.msrb.mxu0 %v835_v47 }
  0x2b   :  { %550 = vmatpush.bf16.msrb.mxu1 %v843_v48 }
  0x2c   :  { %565 = vmatpush.bf16.msrb.mxu2 %v849_v49 }
  0x2e   :  { %538 = vmatpush.bf16.msrb.mxu0 %v834_v51 }
  0x2f   :  { %551 = vmatpush.bf16.msrb.mxu1 %v842_v52 }
  0x30   :  { %566 = vmatpush.bf16.msrb.mxu2 %v848_v53 }
  0x32   :  { %539 = vmatpush.bf16.msrb.mxu0 %v833_v54 }
  0x33   :  { %552 = vmatpush.bf16.msrb.mxu1 %v841_v55 }
  0x34   :  { %567 = vmatpush.bf16.msrb.mxu2 %v847_v56 }
  0x36   :  { %540 = vmatpush.bf16.msrb.mxu0 %v832_v58 }
  0x37   :  { %553 = vmatpush.bf16.msrb.mxu1 %v840_v60 }
  0x38   :  { %568 = vmatpush.bf16.msrb.mxu2 %v846_v61 }
  0x3a   :  { %541 = vmatpush.bf16.msrb.mxu0 %v831_v63 }
  0x3b   :  { %797 = vmatmul.msk.bf16.vlgmr.msrb.gmra.mxu2 %vm479_vm0, %v148_v62  ;;  %554 = vmatpush.bf16.msrb.mxu1 %v839_v1 }
  0x3e   :  { %542 = vmatpush.bf16.msrb.mxu0 %v830_v3 }
  0x3f   :  { %555 = vmatpush.bf16.msrb.mxu1 %v838_v5 }
  0x41   :  { %543 = vmatmul.bf16.vlgmr.msrb.gmra.mxu0 %v146_v6 }
  0x42   :  { %556 = vmatmul.bf16.vlgmr.msrb.gmra.mxu1 %v147_v7 }
  0x9e   :  { %v492_v8 = vpop.f32.mrf.mxu0 }
  0x9f   :  { %v505_v9 = vpop.f32.mrf.mxu1  ;;  %v493_v16 = vadd.f32 %v852_v13, %v492_v8 }
  0xa1   :  { %v506_v17 = vadd.f32 %v505_v9, %v493_v16 }
  0xa6   :  { %v518_v10 = vpop.f32.mrf.mxu2  ;;  %v494_v11 = vpop.f32.mrf.mxu0 }
  0xa7   :  { %v507_v12 = vpop.f32.mrf.mxu1  ;;  %v531_v14 = vpop.f32.mrf.mxu3  ;;  %v519_v19 = vadd.f32 %v518_v10, %v506_v17 }
  0xa9   :  { %v532_v20 = vadd.f32 %v531_v14, %v519_v19 }
  0xae   :  { %v520_v15 = vpop.f32.mrf.mxu2 }
  0xaf   :  { %v533_v18 = vpop.f32.mrf.mxu3 }
  0xbe   :  { %v570_v21 = vpop.f32.mrf.mxu2  ;;  %v544_v22 = vpop.f32.mrf.mxu0 }
  0xbf   :  { %v545_v23 = vadd.f32 %v544_v22, %v532_v20  ;;  %v557_v24 = vpop.f32.mrf.mxu1 }
  0xc1   :  { %v558_v25 = vadd.f32 %v557_v24, %v545_v23 }
  0xc3   :  { %v571_v26 = vadd.f32 %v570_v21, %v558_v25 }
  0xc5   :  { %v574_v27 = vmax.f32 %v571_v26, 0.0 }
  0xc6   :  { %v572_v28 = vpop.f32.mrf.mxu2  ;;  %v546_v29 = vpop.f32.mrf.mxu0 }
  0xc7   :  { %v575_v30 = vpack.c.bf16 %v574_v27, %v574_v27  ;;  %v559_v31 = vpop.f32.mrf.mxu1 }
  0xc9   :  { %576 = vst [vmem:[%s1056_s3] sm:$0xf] %v575_v30 }

</bundles_post_ra>
